<compile_context>
chip_gen: v5e
topology: v5e:2x2
jax: 0.10.0
libtpu: 0.0.40
codegen_flags: <defaults>
</compile_context>

<pallas_src>
import math

import jax
import jax.numpy as jnp
from jax.experimental import pallas as pl
from jax.experimental.pallas import tpu as pltpu


def _gfp_kernel(x_ref, w_ref, out_ref):
    # x_ref:   (1, 1, TB)    f32  lane-dense batch tile
    # w_ref:   (1, H_pad)    f32  resident across the grid
    # out_ref: (TB, 2*H_pad) out_dtype
    tb = out_ref.shape[0]
    h_pad = w_ref.shape[1]
    two_pi = jnp.float32(2.0 * math.pi)
    w_scaled = w_ref[...] * two_pi              # (1, H_pad): fold 2*pi into W once
    x_col = x_ref[...].reshape(tb, 1)           # lane -> sublane relayout (XLU, tiny)
    x_proj = x_col * w_scaled                   # (TB, H_pad) VPU outer product (not MXU)
    # Two lane-aligned, unmasked half-stores — no concatenate temporary.
    out_ref[:, :h_pad] = jnp.sin(x_proj).astype(out_ref.dtype)
    out_ref[:, h_pad:] = jnp.cos(x_proj).astype(out_ref.dtype)


def _gfp_reference(x, W):
    x_proj = x.astype(jnp.float32)[:, None] * W.astype(jnp.float32)[None, :] * (
        2.0 * math.pi
    )
    return jnp.concatenate([jnp.sin(x_proj), jnp.cos(x_proj)], axis=-1)


def _round_up(n, m):
    return (n + m - 1) // m * m


def gaussian_fourier_projection(
    x,
    W,
    *,
    out_dtype=jnp.float32,
    block_b=4096,
    force_pallas=False,
    vmem_tile_budget_bytes=16 << 20,
):
    """x: (B,) float, W: (H,) float  ->  (B, 2*H) out_dtype."""
    B = int(x.shape[0])
    H = int(W.shape[0])
    E = 2 * H

    xf = x.astype(jnp.float32)
    wf = W.astype(jnp.float32)

    # Tiny problems: a pallas_call carries ~us launch + per-step overhead;
    # let XLA fuse sin/cos/concat instead.
    if not force_pallas and B * E < (1 << 14):
        return _gfp_reference(xf, wf).astype(out_dtype)

    # Lane-pad H to a multiple of 128 so the output block is lane-dense and
    # both half-stores are unmasked.  Padding columns are sliced off below.
    H_pad = _round_up(H, 128)
    E_pad = 2 * H_pad
    if H_pad != H:
        wf = jnp.pad(wf, (0, H_pad - H))

    out_itemsize = jnp.dtype(out_dtype).itemsize
    # Minimum sublane tile for the output dtype (f32: 8, bf16: 16, int8/fp8: 32).
    sublane = {4: 8, 2: 16, 1: 32}.get(out_itemsize, 8)

    # VMEM-aware batch tile: double-buffered out tile + f32 intermediates
    # (x_proj, sin, cos) per row, against a conservative tile budget.
    per_row_bytes = E_pad * (2 * out_itemsize + 10) + 64
    tb = max(sublane, (vmem_tile_budget_bytes // per_row_bytes) // sublane * sublane)
    tb = min(tb, _round_up(block_b, sublane))
    # Guarantee >= 2 grid steps when the batch allows it (v7x megacore split).
    b_ceil = _round_up(B, sublane)
    tb = min(tb, max(sublane, _round_up(pl.cdiv(b_ceil, 2), sublane)))

    b_pad = _round_up(B, tb)
    if b_pad != B:
        xf = jnp.pad(xf, (0, b_pad - B))

    grid = b_pad // tb
    x3d = xf.reshape(grid, 1, tb)   # lane-dense x: each tile DMAs tb*4 bytes
    w2d = wf.reshape(1, H_pad)

    cost = pl.CostEstimate(
        flops=2 * b_pad * H_pad,
        transcendentals=2 * b_pad * H_pad,
        bytes_accessed=(b_pad + H_pad) * 4 + b_pad * E_pad * out_itemsize,
    )

    out = pl.pallas_call(
        _gfp_kernel,
        out_shape=jax.ShapeDtypeStruct((b_pad, E_pad), out_dtype),
        grid_spec=pltpu.PrefetchScalarGridSpec(
            num_scalar_prefetch=0,
            grid=(grid,),
            in_specs=[
                pl.BlockSpec((1, 1, tb), lambda i: (i, 0, 0)),   # lane-dense x tile
                pl.BlockSpec((1, H_pad), lambda i: (0, 0)),      # W resident across grid
            ],
            out_specs=pl.BlockSpec((tb, E_pad), lambda i: (i, 0)),
        ),
        compiler_params=pltpu.CompilerParams(
            dimension_semantics=("parallel",),   # let v7x split the grid over 2 TCs
            vmem_limit_bytes=32 << 20,           # safe on v5e(16 MiB default)/v7x(64 MiB)
        ),
        cost_estimate=cost,
    )(x3d, w2d)

    if b_pad != B:
        out = out[:B]
    if H_pad != H:
        # Drop the lane padding: sin half lives in [:H], cos half in [H_pad:H_pad+H].
        out = jnp.concatenate([out[:, :H], out[:, H_pad:H_pad + H]], axis=-1)
    return out


if __name__ == "__main__":
    key = jax.random.PRNGKey(0)
    kx1, kw1, kx2, kw2 = jax.random.split(key, 4)

    # Case 1: default embedding_size=256, batch not a multiple of the tile
    # (exercises multi-step grid, lane-dense x, W residency, batch pad/slice).
    B1, E1 = 200, 256
    W1 = jax.random.normal(kw1, (E1 // 2,), dtype=jnp.float32)
    x1 = jax.random.uniform(kx1, (B1,), dtype=jnp.float32)
    out1 = jax.block_until_ready(gaussian_fourier_projection(x1, W1))
    ref1 = _gfp_reference(x1, W1)
    assert out1.shape == (B1, E1)
    assert jnp.allclose(out1, ref1, atol=1e-5, rtol=1e-5)

    # Case 2: small E=32 (H=16, not a multiple of 128), forced through the
    # Pallas path (exercises H lane-padding + output slicing).
    B2, E2 = 8, 32
    W2 = jax.random.normal(kw2, (E2 // 2,), dtype=jnp.float32)
    x2 = jax.random.uniform(kx2, (B2,), dtype=jnp.float32)
    out2 = jax.block_until_ready(
        gaussian_fourier_projection(x2, W2, force_pallas=True)
    )
    ref2 = _gfp_reference(x2, W2)
    assert out2.shape == (B2, E2)
    assert jnp.allclose(out2, ref2, atol=1e-5, rtol=1e-5)

    # Case 3: same tiny shape through the default path -> XLA-fusion fallback.
    out3 = jax.block_until_ready(gaussian_fourier_projection(x2, W2))
    assert jnp.allclose(out3, ref2, atol=1e-5, rtol=1e-5)

    # Case 4: bf16 output (f32 math, narrow store) — exercises the 16-sublane
    # tile rounding and the halved HBM writeback path.
    out4 = jax.block_until_ready(
        gaussian_fourier_projection(x1, W1, out_dtype=jnp.bfloat16)
    )
    assert out4.dtype == jnp.bfloat16
    assert out4.shape == (B1, E1)
    assert jnp.allclose(out4.astype(jnp.float32), ref1, atol=2e-2, rtol=2e-2)

    print("KERNEL_OK")
</pallas_src>

<mosaic_0001>
module attributes {stable_mosaic.version = 11 : i64} {
  func.func @_gfp_kernel(%arg0: i32, %arg1: memref<1x1x104xf32, #tpu.memory_space<vmem>>, %arg2: memref<1x128xf32, #tpu.memory_space<vmem>>, %arg3: memref<104x256xf32, #tpu.memory_space<vmem>>) attributes {dimension_semantics = [#tpu.dimension_semantics<parallel>], iteration_bounds = array<i64: 2>, scalar_prefetch = 0 : i64, scratch_operands = 0 : i64, tpu.core_type = #tpu.core_type<tc>, window_params = [{transform_indices = @transform_0, window_bounds = array<i64: 1, 1, 104>}, {pipeline_mode = #tpu.pipeline_mode<synchronous>, transform_indices = @transform_1, window_bounds = array<i64: 1, 128>}, {transform_indices = @transform_2, window_bounds = array<i64: 104, 256>}]} {
    %c0 = arith.constant 0 : index
    %c0_0 = arith.constant 0 : index
    %0 = vector.load %arg2[%c0, %c0_0] : memref<1x128xf32, #tpu.memory_space<vmem>>, vector<1x128xf32>
    %cst = arith.constant 6.28318548 : f32
    %1 = vector.broadcast %cst : f32 to vector<1x128xf32>
    %2 = arith.mulf %0, %1 : vector<1x128xf32>
    %c0_1 = arith.constant 0 : index
    %c0_2 = arith.constant 0 : index
    %c0_3 = arith.constant 0 : index
    %3 = vector.load %arg1[%c0_1, %c0_2, %c0_3] : memref<1x1x104xf32, #tpu.memory_space<vmem>>, vector<1x1x104xf32>
    %4 = vector.shape_cast %3 : vector<1x1x104xf32> to vector<104x1xf32>
    %5 = vector.broadcast %4 : vector<104x1xf32> to vector<104x128xf32>
    %6 = vector.broadcast %2 : vector<1x128xf32> to vector<104x128xf32>
    %7 = arith.mulf %5, %6 : vector<104x128xf32>
    %8 = math.sin %7 : vector<104x128xf32>
    %c0_4 = arith.constant 0 : index
    %c0_5 = arith.constant 0 : index
    %9 = vector.load %arg3[%c0_4, %c0_5] : memref<104x256xf32, #tpu.memory_space<vmem>>, vector<104x128xf32>
    tpu.vector_store %arg3[%c0_4, %c0_5], %8 {strides = array<i32>} : memref<104x256xf32, #tpu.memory_space<vmem>>, vector<104x128xf32>,
    %10 = math.cos %7 : vector<104x128xf32>
    %c0_6 = arith.constant 0 : index
    %c128 = arith.constant 128 : index
    %11 = vector.load %arg3[%c0_6, %c128] : memref<104x256xf32, #tpu.memory_space<vmem>>, vector<104x128xf32>
    tpu.vector_store %arg3[%c0_6, %c128], %10 {strides = array<i32>} : memref<104x256xf32, #tpu.memory_space<vmem>>, vector<104x128xf32>,
    return
  }
  func.func @transform_0(%arg0: i32) -> (i32, i32, i32) {
    %c0_i32 = arith.constant 0 : i32
    %c0_i32_0 = arith.constant 0 : i32
    %c0_i32_1 = arith.constant 0 : i32
    return %arg0, %c0_i32, %c0_i32_0 : i32, i32, i32
  }
  func.func @transform_1(%arg0: i32) -> (i32, i32) {
    %c0_i32 = arith.constant 0 : i32
    %c0_i32_0 = arith.constant 0 : i32
    %c0_i32_1 = arith.constant 0 : i32
    return %c0_i32, %c0_i32_0 : i32, i32
  }
  func.func @transform_2(%arg0: i32) -> (i32, i32) {
    %c0_i32 = arith.constant 0 : i32
    %c0_i32_0 = arith.constant 0 : i32
    return %arg0, %c0_i32 : i32, i32
  }
}

</mosaic_0001>

<bundles_post_ra>
// kernel: tpu_custom_call.1
= control target key start
LH: loop header
LB: loop body
LE: loop exit
PB: predicated region body
PF: predicated region fallthrough
CT: control target
= control target key end

     0   :  { %7 = vsyncpa [#allocation3], 0  ;;  %s6506_s0 = inlined_call_operand.hbm [shape: f32[2,1,104], index: 0, kind: input, shape index: {}]   ;;  %s6507_s1 = inlined_call_operand.hbm [shape: f32[1,128], index: 1, kind: input, shape index: {}]   ;;  %s6508_s2 = inlined_call_operand.hbm [shape: f32[208,256], index: 2, kind: output, shape index: {}]  }
   0x1   :  { %9 = vsyncpa [#allocation3 + $0x1], 0 }
   0x2   :  { %10 = vsyncpa [#allocation6], 0 }
   0x3   :  { %11 = vsyncpa [#allocation4], 0 }
   0x4   :  { %13 = vsyncpa [#allocation4 + $0x1], 0  ;;  %s4740_s9 = smov 0   ;;  %s4742_s10 = smov 0  }
   0x5   :  { %s4744_s11 = smov 0   ;;  %s4746_s12 = smov 0  }
   0x6 LB: > { %s4761_s13 = sadd.s32 4294967295, %s4713_s12   ;;  %s4410_s14 = sadd.s32 4294967294, %s4713_s12   ;;  %s4713_s12 = sphi %s4746_s12, %s6530_s12   ;;  %s4709_s11 = sphi %s4744_s11, %s6529_s11   ;;  %s4705_s10 = sphi %s4742_s10, %s6528_s10   ;;  %s4701_s9 = sphi %s4740_s9, %s6527_s9  }
   0x7   : > { %p39_p0 = scmp.ne.s32.totalorder %s4705_s10, %s4701_s9  ;;  %p40_p1 = scmp.eq.s32.totalorder %s4761_s13, 0 }
   0x8   : > { %p84_p2 = scmp.eq.s32.totalorder %s4761_s13, 1  ;;  %p90_p3 = scmp.eq.s32.totalorder %s4410_s14, 1 }
   0x9   : > { %p4770_p4 = por %p40_p1, %p39_p0  ;;  %p4411_p5 = scmp.ge.s32.totalorder %s4713_s12, 1 }
   0xa   : > { %p4775_p6 = por %p90_p3, %p39_p0  ;;  %p97_p7 = scmp.lt.s32.totalorder %s4713_s12, 3 }
   0xb   : > { %s109_s19 = sshll.u32 %s6507_s1, 4  ;;  %s4715_s21 = smov [#allocation5]   ;;  %s110_s19 = int_to_ptr.hbm [resolvable:$true] %s109_s19 }
   0xc   : > { %p4783_p8 = pnand %p4411_p5, %p97_p7  ;;  %s111_s22 = sshll.u32 %s4715_s21, 4  ;;  %s112_s22 = int_to_ptr.vmem [resolvable:$true] %s111_s22 }
   0xd   : > { %s4793_s23 = sadd.s32 1, %s4713_s12   ;;  %s26_s24 = sadd.s32 1, %s4709_s11 }
   0xe   : > { %p4510_p10 = pneg %p4783_p8  ;;  %s23_s25 = ssub.s32 %s4713_s12, %s4793_s23 }
   0xf   : > { %p24_p12 = scmp.eq.s32.totalorder %s23_s25, 0  ;;  %p33_p13 = scmp.ne.s32.totalorder %s4709_s11, %s4705_s10 }
  0x10   : > { %p4511_p11 = pnand %p4510_p10, %p40_p1  ;;  %p34_p0 = scmp.eq.s32.totalorder %s4713_s12, 0 }
  0x11   : > { %p4523_p3 = scmp.lt.s32.totalorder %s4713_s12, 2  ;;  %p4807_p7 = por %p84_p2, %p33_p13 }
  0x12   : > { %4513 = dma.hbm_to_vmem [thread:$0]  (!%p4511_p11), %s110_s19, 16, %s112_s22, [#allocation6]  }
  0x13   : > { %s4803_s26 = scalar_select %p24_p12, %s4709_s11, %s26_s24  }
  0x14   : > { %p35_p5 = por %p34_p0, %p33_p13  ;;  %s122_s28 = sand.u32 1, %s4709_s11  }
  0x15   : > { %s128_s3 = scalar_lea.hbm %s6506_s0, %s4713_s12  ;;  %s125_s5 = scalar_lea.vmem [#allocation2], %s122_s28 }
  0x16   : > { %s130_s4 = sshll.u32 %s128_s3, 4  ;;  %s132_s6 = sshll.u32 %s125_s5, 4  ;;  %s131_s4 = int_to_ptr.hbm [resolvable:$true] %s130_s4  ;;  %s133_s6 = int_to_ptr.vmem [resolvable:$true] %s132_s6 }
  0x17   : > { %p4816_p10 = pnand %p4523_p3, %p35_p5  ;;  %s123_s8 = scalar_lea.sflag [#allocation3], %s122_s28 }
  0x18   : > { %s4613_s14 = sshra.s32 %s131_s4, 4  ;;  %s4620_s21 = scalar_lea.hbm %s6506_s0, 2  ;;  %s4614_s14 = int_to_ptr.hbm [resolvable:$true] %s4613_s14 }
  0x19   : > { %s4615_s17 = scalar_lea.hbm %s4614_s14, 1  ;;  %p4617_p11 = pneg %p4816_p10 }
  0x1a   : > { %p4616_p2 = scmp.ne.s32.totalorder %s4614_s14, %s4615_s17  ;;  %p4621_p0 = scmp.lt.s32.totalorder %s4614_s14, %s6506_s0 }
  0x1b   : > { %p4622_p3 = scmp.lt.s32.totalorder %s4620_s21, %s4615_s17 }
  0x1c   : > { %p4618_p12 = pnand %p4617_p11, %p4616_p2 }
  0x1d   : > { %p4623_p5 = por %p4622_p3, %p4621_p0 }
  0x1e   : > { %p4619_p13 = pneg %p4618_p12 }
  0x20   : > { %p4624_p9 = pnand %p4623_p5, %p4619_p13 }
  0x22   : > { %4627 = shalt.err (!%p4624_p9)
}
  0x23   : > { %4517 = dma.hbm_to_vmem [thread:$0]  (!%p4816_p10), %s131_s4, 16, %s133_s6, %s123_s8  }
  0x24   : > { %141 = sbr.rel (%p4783_p8) target bundleno = 709 (0x2c5), region = 28  ;;  %s4833_s25 = sand.u32 (!%p4783_p8), 1, %s4705_s10  }
  0x25   : > { %s144_s28 = scalar_lea.sflag (!%p4783_p8), [#allocation3], %s4833_s25  ;;  %s146_s29 = scalar_lea.vmem (!%p4783_p8), [#allocation2], %s4833_s25 }
  0x29   : > { %4688 = dma.done.wait (%p4770_p4), %s144_s28, 16  }
  0x2a   : > { %4690 = vsyncadd (%p4770_p4), %s144_s28, 4294967280 }
  0x2b   : > { %4692 = dma.done.wait (%p40_p1), [#allocation6], 16  }
  0x2c   : > { %4694 = vsyncadd (%p40_p1), [#allocation6], 4294967280  ;;  %v177_v0 = vlaneseq  ;;  %v4582_v4 = vld [vmem:[%s146_s29] ss:$0 sm:$0xff]  ;;  %v173_v15 = vld [vmem:[#allocation5] sm:$0x1] }
  0x2d   : > { %v174_v16 = vmul.f32 6.2831855, %v173_v15  ;;  %v4716_v31 = vmov 683565275   ;;  %v4717_v33 = vmov 2475754826  }
  0x2e   : > { %v178_v1 = vshrl.u32 %v177_v0, 7  ;;  %v4718_v35 = vmov 2131351028   ;;  %v4719_v37 = vmov 2102212464   ;;  %s4501_s15 = smul.u32 208, %s4833_s25 }
  0x2f   : > { %v4845_v17 = vperm.slane %v174_v16, 0  ;;  %v4720_v39 = vmov 920167782   ;;  %v4721_v45 = vmov 1326507024   ;;  %s4500_s30 = smul.u32 208, %s4761_s13 }
  0x30   : > { %4568 = vset.pattern.permute.xlu0 %v178_v1  ;;  %v203_v2 = vadd.s32 32, %v178_v1  ;;  %v191_v3 = vadd.s32 16, %v178_v1  ;;  %v185_v5 = vadd.s32 8, %v178_v1  ;;  %v209_v6 = vadd.s32 40, %v178_v1  ;;  %s5118_s20 = scalar_lea.vmem [#allocation7], %s4501_s15  ;;  %s4315_s7 = scalar_lea.sflag [#allocation4], %s4833_s25 }
  0x31   : > { %v197_v7 = vadd.s32 24, %v178_v1  ;;  %v227_v8 = vadd.s32 64, %v178_v1  ;;  %v221_v9 = vadd.s32 56, %v178_v1  ;;  %v215_v10 = vadd.s32 48, %v178_v1  ;;  %s4327_s5 = scalar_lea.hbm %s6508_s2, %s4500_s30  ;;  %s4328_s6 = sshll.u32 %s5118_s20, 4  ;;  %s4329_s6 = int_to_ptr.vmem [resolvable:$true] %s4328_s6 }
  0x32   : > { %4572 = vset.pattern.permute.xlu2 %v203_v2  ;;  %4570 = vset.pattern.permute.xlu1 %v191_v3  ;;  %v239_v11 = vadd.s32 80, %v178_v1  ;;  %v233_v12 = vadd.s32 72, %v178_v1  ;;  %v251_v13 = vadd.s32 96, %v178_v1  ;;  %v245_v14 = vadd.s32 88, %v178_v1  ;;  %s4330_s13 = sshll.u32 %s4327_s5, 4  ;;  %s4663_s19 = scalar_lea.hbm %s6508_s2, 416  ;;  %s4331_s13 = int_to_ptr.hbm [resolvable:$true] %s4330_s13 }
  0x33   : > { %s4657_s8 = sshra.s32 %s4331_s13, 4  ;;  %s4658_s8 = int_to_ptr.hbm [resolvable:$true] %s4657_s8 }
  0x34   : > { %s4659_s14 = scalar_lea.hbm %s4658_s8, 208  ;;  %p4664_p9 = scmp.lt.s32.totalorder %s4658_s8, %s6508_s2 }
  0x35   : > { %p4660_p1 = scmp.ne.s32.totalorder %s4658_s8, %s4659_s14  ;;  %p4665_p10 = scmp.lt.s32.totalorder %s4663_s19, %s4659_s14 }
  0x37   : > { %p4661_p4 = pnand %p4660_p1, %p4807_p7  ;;  %p4666_p2 = por %p4665_p10, %p4664_p9 }
  0x38   : > { %181 = vperm.xlu0 %4568, %v4582_v4  }
  0x39   : > { %p4662_p8 = pneg %p4661_p4 }
  0x3a   : > { %205 = vperm.xlu2 %4572, %v4582_v4   ;;  %193 = vperm.xlu1 %4570, %v4582_v4  }
  0x3b   : > { %p4667_p11 = pnand %p4666_p2, %p4662_p8 }
  0x40   : > { %4569 = vset.pattern.permute.xlu0 %v185_v5 }
  0x42   : > { %4573 = vset.pattern.permute.xlu2 %v209_v6  ;;  %4571 = vset.pattern.permute.xlu1 %v197_v7 }
  0x48   : > { %187 = vperm.xlu0 %4569, %v4582_v4  }
  0x4a   : > { %211 = vperm.xlu2 %4573, %v4582_v4   ;;  %199 = vperm.xlu1 %4571, %v4582_v4  }
  0x50   : > { %4576 = vset.pattern.permute.xlu0 %v227_v8 }
  0x52   : > { %4575 = vset.pattern.permute.xlu2 %v221_v9  ;;  %4574 = vset.pattern.permute.xlu1 %v215_v10 }
  0x58   : > { %229 = vperm.xlu0 %4576, %v4582_v4  }
  0x5a   : > { %223 = vperm.xlu2 %4575, %v4582_v4   ;;  %217 = vperm.xlu1 %4574, %v4582_v4  }
  0x60   : > { %4581 = vset.pattern.permute.xlu0 %v251_v13 }
  0x62   : > { %4578 = vset.pattern.permute.xlu2 %v239_v11  ;;  %4577 = vset.pattern.permute.xlu1 %v233_v12 }
  0x6a   : > { %241 = vperm.xlu2 %4578, %v4582_v4   ;;  %235 = vperm.xlu1 %4577, %v4582_v4  }
  0x72   : > { %4580 = vset.pattern.permute.xlu2 %v251_v13  ;;  %4579 = vset.pattern.permute.xlu1 %v245_v14 }
  0x7a   : > { %253 = vperm.xlu2 %4580, %v4582_v4   ;;  %247 = vperm.xlu1 %4579, %v4582_v4  }
  0x94   : > { %v206_v18 = vpop.permute.xlu2 %205 }
  0x95   : > { %v4848_v19 = vmul.f32 %v4845_v17, %v206_v18 }
  0x97   : > { %v894_v20 = vand.u32 2139095040, %v4848_v19  ;;  %v891_v22 = vand.u32 2147483647, %v4848_v19 }
  0x99   : > { %v895_v21 = vshrl.u32 %v894_v20, 23  ;;  %v898_v25 = vand.u32 8388607, %v891_v22 }
  0x9b   : > { %v4428_v23 = vadd.s32 4294967169, %v895_v21  ;;  %v899_v28 = vor.u32 8388608, %v898_v25 }
  0x9d   : > { %v901_v24 = vadd.s32 1, %v4428_v23  ;;  %v4867_v47 = vshll.u32 %v899_v28, 8 }
  0x9f   : > { %vm902_vm0 = vcmp.gt.s32.totalorder %v901_v24, 0  ;;  %v940_v58 = vand.u32 65535, %v4867_v47  ;;  %v941_v61 = vshrl.u32 %v4867_v47, 16 }
  0xa0   : > { %v903_v26 = vsel %vm902_vm0, %v901_v24, 0 }
  0xa1   : > { %v905_v27 = vand.u32 31, %v903_v26  ;;  %v4854_v29 = vshrl.u32 %v903_v26, 5 }
  0xa3   : > { %v906_v30 = vsub.s32 32, %v905_v27  ;;  %v908_v32 = vshll.u32 %v4716_v31, %v905_v27  ;;  %v911_v34 = vshll.u32 %v4717_v33, %v905_v27  ;;  %v914_v36 = vshll.u32 %v4718_v35, %v905_v27 }
  0xa4   : > { %v917_v38 = vshll.u32 %v4719_v37, %v905_v27  ;;  %v920_v40 = vshll.u32 %v4720_v39, %v905_v27  ;;  %vm923_vm1 = vcmp.lt.s32.totalorder %v4854_v29, 1  ;;  %vm926_vm2 = vcmp.lt.s32.totalorder %v4854_v29, 4  ;;  %v212_v53 = vpop.permute.xlu2 %211 }
  0xa5   : > { %v909_v41 = vshrl.u32 %v4717_v33, %v906_v30  ;;  %v912_v42 = vshrl.u32 %v4718_v35, %v906_v30  ;;  %v915_v43 = vshrl.u32 %v4719_v37, %v906_v30  ;;  %v918_v44 = vshrl.u32 %v4720_v39, %v906_v30 }
  0xa6   : > { %v921_v46 = vshrl.u32 %v4721_v45, %v906_v30  ;;  %vm925_vm3 = vcmp.lt.s32.totalorder %v4854_v29, 3  ;;  %vm924_vm4 = vcmp.lt.s32.totalorder %v4854_v29, 2  ;;  %v4887_v62 = vmul.f32 %v4845_v17, %v212_v53 }
  0xa7   : > { %v910_v48 = vor.u32 %v909_v41, %v908_v32  ;;  %v913_v49 = vor.u32 %v912_v42, %v911_v34  ;;  %v916_v50 = vor.u32 %v915_v43, %v914_v36  ;;  %v919_v51 = vor.u32 %v918_v44, %v917_v38 }
  0xa8   : > { %v922_v52 = vor.u32 %v921_v46, %v920_v40  ;;  %v907_v63 = vshrl.u32 %v4716_v31, %v906_v30  ;;  %v1049_v10 = vand.u32 2139095040, %v4887_v62  ;;  %v1046_v26 = vand.u32 2147483647, %v4887_v62 }
  0xa9   : > { %v931_v54 = vsel %vm923_vm1, %v910_v48, %v913_v49  ;;  %v935_v55 = vsel %vm923_vm1, %v913_v49, %v916_v50  ;;  %v932_v56 = vsel %vm926_vm2, %v919_v51, 920167782  ;;  %v928_v6 = vsel %vm926_vm2, %v916_v50, 2102212464 }
  0xaa   : > { %v936_v57 = vsel %vm926_vm2, %v922_v52, 1326507024  ;;  %v933_v59 = vsel %vm925_vm3, %v916_v50, %v932_v56  ;;  %v927_v14 = vsel %vm923_vm1, %v907_v63, %v910_v48  ;;  %v929_v20 = vsel %vm925_vm3, %v913_v49, %v928_v6 }
  0xab   : > { %v937_v60 = vsel %vm925_vm3, %v919_v51, %v936_v57  ;;  %v934_v0 = vsel %vm924_vm4, %v931_v54, %v933_v59  ;;  %v1050_v27 = vshrl.u32 %v1049_v10, 23  ;;  %v4722_v30 = vmov 0  }
  0xac   : > { %v938_v1 = vsel %vm924_vm4, %v935_v55, %v937_v60  ;;  %v964_v4 = vand.u32 65535, %v934_v0  ;;  %v965_v5 = vshrl.u32 %v934_v0, 16  ;;  %v1053_v52 = vand.u32 8388607, %v1046_v26  ;;  %v182_v0 = vpop.permute.xlu0 %181 }
  0xad   : > { %v942_v2 = vand.u32 65535, %v938_v1  ;;  %v943_v3 = vshrl.u32 %v938_v1, 16  ;;  %v4431_v40 = vadd.s32 4294967169, %v1050_v27  ;;  %v930_v53 = vsel %vm924_vm4, %v927_v14, %v929_v20 }
  0xae   : > { %v966_v11 = vmul.u32 %v964_v4, %v940_v58  ;;  %v967_v12 = vmul.u32 %v965_v5, %v940_v58  ;;  %v968_v13 = vmul.u32 %v964_v4, %v941_v61  ;;  %v969_v21 = vmul.u32 %v965_v5, %v941_v61 }
  0xaf   : > { %v944_v7 = vmul.u32 %v942_v2, %v940_v58  ;;  %v945_v8 = vmul.u32 %v943_v3, %v940_v58  ;;  %v946_v9 = vmul.u32 %v942_v2, %v941_v61  ;;  %v947_v15 = vmul.u32 %v943_v3, %v941_v61 }
  0xb0   : > { %v970_v23 = vshll.u32 %v967_v12, 16  ;;  %v972_v24 = vshll.u32 %v968_v13, 16  ;;  %v971_v42 = vshrl.u32 %v967_v12, 16  ;;  %v1056_v49 = vadd.s32 1, %v4431_v40 }
  0xb1   : > { %v948_v16 = vshll.u32 %v945_v8, 16  ;;  %v950_v18 = vshll.u32 %v946_v9, 16  ;;  %v949_v28 = vshrl.u32 %v945_v8, 16  ;;  %v951_v44 = vshrl.u32 %v946_v9, 16 }
  0xb2   : > { %vm974_vm6 = vc.u32 %v966_v11, %v970_v23  ;;  %v976_v34 = vadd.s32 %v970_v23, %v966_v11  ;;  %v973_v50 = vshrl.u32 %v968_v13, 16  ;;  %vm1057_vm9 = vcmp.gt.s32.totalorder %v1056_v49, 0 }
  0xb3   : > { %vm952_vm5 = vc.u32 %v944_v7, %v948_v16  ;;  %v954_v25 = vadd.s32 %v948_v16, %v944_v7  ;;  %v975_v38 = vsel %vm974_vm6, 1, %v4722_v30  ;;  %v1058_v57 = vsel %vm1057_vm9, %v1056_v49, 0 }
  0xb4   : > { %v953_v32 = vsel %vm952_vm5, 1, %v4722_v30  ;;  %v977_v43 = vadd.s32 %v975_v38, %v969_v21  ;;  %vm978_vm8 = vc.u32 %v976_v34, %v972_v24  ;;  %v4910_v55 = vadd.s32 %v976_v34, %v972_v24 }
  0xb5   : > { %v955_v36 = vadd.s32 %v953_v32, %v947_v15  ;;  %vm956_vm7 = vc.u32 %v954_v25, %v950_v18  ;;  %v979_v48 = vsel %vm978_vm8, 1, %v4722_v30  ;;  %v1060_v59 = vand.u32 31, %v1058_v57 }
  0xb6   : > { %v957_v41 = vsel %vm956_vm7, 1, %v4722_v30  ;;  %v981_v51 = vadd.s32 %v979_v48, %v977_v43  ;;  %v984_v61 = vmul.u32 %v4867_v47, %v930_v53  ;;  %v1054_v63 = vor.u32 8388608, %v1053_v52 }
  0xb7   : > { %v959_v46 = vadd.s32 %v957_v41, %v955_v36  ;;  %v4917_v1 = vshrl.u32 %v1058_v57, 5  ;;  %v1061_v29 = vsub.s32 32, %v1060_v59  ;;  %v1063_v2 = vshll.u32 %v4716_v31, %v1060_v59 }
  0xb8   : > { %v982_v56 = vadd.s32 %v981_v51, %v971_v42  ;;  %v1066_v4 = vshll.u32 %v4717_v33, %v1060_v59  ;;  %v1069_v5 = vshll.u32 %v4718_v35, %v1060_v59  ;;  %v1072_v6 = vshll.u32 %v4719_v37, %v1060_v59 }
  0xb9   : > { %v960_v54 = vadd.s32 %v959_v46, %v949_v28  ;;  %v1064_v7 = vshrl.u32 %v4717_v33, %v1061_v29  ;;  %v1067_v47 = vshrl.u32 %v4718_v35, %v1061_v29  ;;  %v1070_v8 = vshrl.u32 %v4719_v37, %v1061_v29 }
  0xba   : > { %v983_v60 = vadd.s32 %v982_v56, %v973_v50  ;;  %v4927_v9 = vmul.f32 %v4845_v17, %v182_v0  ;;  %v1073_v11 = vshrl.u32 %v4720_v39, %v1061_v29  ;;  %v1075_v12 = vshll.u32 %v4720_v39, %v1060_v59 }
  0xbb   : > { %v4912_v58 = vadd.s32 %v960_v54, %v951_v44  ;;  %v1076_v13 = vshrl.u32 %v4721_v45, %v1061_v29  ;;  %v1068_v15 = vor.u32 %v1067_v47, %v1066_v4  ;;  %v1071_v16 = vor.u32 %v1070_v8, %v1069_v5 }
  0xbc   : > { %v987_v3 = vadd.s32 1, %v983_v60  ;;  %v4932_v18 = vshll.u32 %v1054_v63, 8  ;;  %v1065_v20 = vor.u32 %v1064_v7, %v1063_v2  ;;  %v1074_v21 = vor.u32 %v1073_v11, %v1072_v6 }
  0xbd   : > { %vm986_vm10 = vc.u32 %v4912_v58, %v4910_v55  ;;  %v1077_v23 = vor.u32 %v1076_v13, %v1075_v12  ;;  %vm1078_vm11 = vcmp.lt.s32.totalorder %v4917_v1, 1  ;;  %vm1080_vm12 = vcmp.lt.s32.totalorder %v4917_v1, 3 }
  0xbe   : > { %v988_v10 = vsel %vm986_vm10, %v987_v3, %v983_v60  ;;  %vm1081_vm13 = vcmp.lt.s32.totalorder %v4917_v1, 4  ;;  %vm1079_vm14 = vcmp.lt.s32.totalorder %v4917_v1, 2  ;;  %v1090_v27 = vsel %vm1078_vm11, %v1068_v15, %v1071_v16 }
  0xbf   : > { %v989_v14 = vadd.s32 %v988_v10, %v984_v61  ;;  %v1087_v25 = vsel %vm1081_vm13, %v1074_v21, 920167782  ;;  %v1091_v32 = vsel %vm1081_vm13, %v1077_v23, 1326507024  ;;  %v1095_v34 = vand.u32 65535, %v4932_v18 }
  0xc0   : > { %v274_v36 = vand.u32 2139095040, %v4927_v9  ;;  %v1086_v38 = vsel %vm1078_vm11, %v1065_v20, %v1068_v15  ;;  %v1088_v40 = vsel %vm1080_vm12, %v1071_v16, %v1087_v25  ;;  %v1092_v41 = vsel %vm1080_vm12, %v1074_v21, %v1091_v32 }
  0xc1   : > { %v990_v24 = vadd.s32 536870912, %v989_v14  ;;  %v1096_v42 = vshrl.u32 %v4932_v18, 16  ;;  %v1093_v44 = vsel %vm1079_vm14, %v1090_v27, %v1092_v41  ;;  %v1089_v50 = vsel %vm1079_vm14, %v1086_v38, %v1088_v40 }
  0xc2   : > { %v1097_v46 = vand.u32 65535, %v1093_v44  ;;  %v1098_v48 = vshrl.u32 %v1093_v44, 16  ;;  %v271_v51 = vand.u32 2147483647, %v4927_v9  ;;  %v275_v52 = vshrl.u32 %v274_v36, 23 }
  0xc3   : > { %v4942_v28 = vshrl.u32 %v990_v24, 30  ;;  %v1062_v59 = vshrl.u32 %v4716_v31, %v1061_v29  ;;  %v1119_v60 = vand.u32 65535, %v1089_v50  ;;  %v1120_v0 = vshrl.u32 %v1089_v50, 16 }
  0xc4   : > { %v1099_v53 = vmul.u32 %v1097_v46, %v1095_v34  ;;  %v1100_v54 = vmul.u32 %v1098_v48, %v1095_v34  ;;  %v1101_v56 = vmul.u32 %v1097_v46, %v1096_v42  ;;  %v1102_v61 = vmul.u32 %v1098_v48, %v1096_v42 }
  0xc5   : > { %v992_v43 = vshll.u32 %v4942_v28, 30  ;;  %v4416_v3 = vadd.s32 4294967169, %v275_v52  ;;  %v4964_v4 = vand.u32 8388607, %v271_v51  ;;  %v1083_v6 = vsel %vm1081_vm13, %v1071_v16, 2102212464 }
  0xc6   : > { %v1103_v63 = vshll.u32 %v1100_v54, 16  ;;  %v1105_v7 = vshll.u32 %v1101_v56, 16  ;;  %v985_v47 = vadd.s32 %v4910_v55, %v4912_v58  ;;  %v1082_v29 = vsel %vm1078_vm11, %v1062_v59, %v1065_v20 }
  0xc7   : > { %v993_v49 = vsub.s32 %v989_v14, %v992_v43  ;;  %v1123_v10 = vmul.u32 %v1119_v60, %v1096_v42  ;;  %v1122_v14 = vmul.u32 %v1120_v0, %v1095_v34  ;;  %v1084_v21 = vsel %vm1080_vm12, %v1068_v15, %v1083_v6 }
  0xc8   : > { %vm1107_vm0 = vc.u32 %v1099_v53, %v1103_v63  ;;  %v1109_v12 = vadd.s32 %v1103_v63, %v1099_v53  ;;  %v1104_v23 = vshrl.u32 %v1100_v54, 16  ;;  %v1106_v16 = vshrl.u32 %v1101_v56, 16 }
  0xc9   : > { %vm994_vm15 = vcmp.lt.s32.totalorder %v993_v49, 0  ;;  %v995_v57 = vsub.s32 0, %v993_v49  ;;  %v1108_v8 = vsel %vm1107_vm0, 1, %v4722_v30  ;;  %v1121_v24 = vmul.u32 %v1119_v60, %v1095_v34 }
  0xca   : > { %v1110_v13 = vadd.s32 %v1108_v8, %v1102_v61  ;;  %vm1111_vm2 = vc.u32 %v1109_v12, %v1105_v7  ;;  %v1124_v25 = vmul.u32 %v1120_v0, %v1096_v42  ;;  %v1125_v55 = vshll.u32 %v1122_v14, 16 }
  0xcb   : > { %v996_v2 = vsel %vm994_vm15, %v995_v57, %v993_v49  ;;  %v1112_v20 = vsel %vm1111_vm2, 1, %v4722_v30  ;;  %v1127_v27 = vshll.u32 %v1123_v10, 16  ;;  %v281_v32 = vadd.s32 1, %v4416_v3 }
  0xcc   : > { %v997_v5 = vclz %v996_v2  ;;  %v1114_v40 = vadd.s32 %v1112_v20, %v1110_v13  ;;  %v1126_v41 = vshrl.u32 %v1122_v14, 16  ;;  %vm1129_vm3 = vc.u32 %v1121_v24, %v1125_v55 }
  0xcd   : > { %v1131_v44 = vadd.s32 %v1125_v55, %v1121_v24  ;;  %vm282_vm4 = vcmp.gt.s32.totalorder %v281_v32, 0  ;;  %vm893_vm5 = vcmp.lt.s32.totalorder %v4848_v19, 0  ;;  %v1130_v42 = vsel %vm1129_vm3, 1, %v4722_v30 }
  0xce   : > { %v4429_v11 = vadd.s32 4294967294, %v997_v5  ;;  %v1115_v46 = vadd.s32 %v1114_v40, %v1104_v23  ;;  %v1132_v48 = vadd.s32 %v1130_v42, %v1124_v25  ;;  %v283_v52 = vsel %vm282_vm4, %v281_v32, 0 }
  0xcf   : > { %vm1133_vm6 = vc.u32 %v1131_v44, %v1127_v27  ;;  %v4978_v50 = vadd.s32 %v1131_v44, %v1127_v27  ;;  %vm4985_vm7 = vcmp.le.f32.partialorder %v891_v22, 0.7853982  ;;  %v1128_v59 = vshrl.u32 %v1123_v10, 16 }
  0xd0   : > { %vm4430_vm1 = vcmp.lt.s32.totalorder %v4429_v11, 0  ;;  %v4980_v56 = vadd.s32 %v1115_v46, %v1106_v16  ;;  %v285_v61 = vand.u32 31, %v283_v52  ;;  %v1015_v0 = vsub.s32 4, %v4942_v28 }
  0xd1   : > { %v1000_v58 = vsel %vm4430_vm1, 0, %v4429_v11  ;;  %v1085_v2 = vsel %vm1079_vm14, %v1082_v29, %v1084_v21  ;;  %v279_v3 = vor.u32 8388608, %v4964_v4  ;;  %v4993_v7 = vshrl.u32 %v283_v52, 5 }
  0xd2   : > { %v1001_v36 = vsub.s32 32, %v1000_v58  ;;  %v1005_v38 = vsub.s32 4294967266, %v1000_v58  ;;  %v1002_v43 = vshll.u32 %v993_v49, %v1000_v58  ;;  %v1134_v49 = vsel %vm1133_vm6, 1, %v4722_v30 }
  0xd3   : > { %v1136_v60 = vadd.s32 %v1134_v49, %v1132_v48  ;;  %vm1141_vm8 = vc.u32 %v4980_v56, %v4978_v50  ;;  %v291_v8 = vshll.u32 %v4717_v33, %v285_v61  ;;  %v297_v10 = vshll.u32 %v4719_v37, %v285_v61 }
  0xd4   : > { %v1003_v15 = vshrl.u32 %v985_v47, %v1001_v36  ;;  %v1006_v34 = vadd.s32 127, %v1005_v38  ;;  %v286_v47 = vsub.s32 32, %v285_v61  ;;  %v294_v1 = vshll.u32 %v4718_v35, %v285_v61 }
  0xd5   : > { %v1137_v6 = vadd.s32 %v1136_v60, %v1126_v41  ;;  %v300_v4 = vshll.u32 %v4720_v39, %v285_v61  ;;  %v1016_v23 = vsel %vm893_vm5, %v1015_v0, %v4942_v28  ;;  %v288_v24 = vshll.u32 %v4716_v31, %v285_v61 }
  0xd6   : > { %v1004_v53 = vor.u32 %v1003_v15, %v1002_v43  ;;  %v1007_v54 = vshll.u32 %v1006_v34, 23  ;;  %v292_v12 = vshrl.u32 %v4718_v35, %v286_v47  ;;  %v295_v13 = vshrl.u32 %v4719_v37, %v286_v47 }
  0xd7   : > { %v1138_v11 = vadd.s32 %v1137_v6, %v1128_v59  ;;  %v298_v14 = vshrl.u32 %v4720_v39, %v286_v47  ;;  %v301_v21 = vshrl.u32 %v4721_v45, %v286_v47  ;;  %v289_v25 = vshrl.u32 %v4717_v33, %v286_v47 }
  0xd8   : > { %v1008_v63 = vor.u32 4788187, %v1007_v54  ;;  %v1011_v5 = vcvt.s32.f32 %v1004_v53  ;;  %v1139_v58 = vmul.u32 %v4932_v18, %v1085_v2  ;;  %v5011_v20 = vor.u32 %v292_v12, %v291_v8 }
  0xd9   : > { %v1142_v16 = vadd.s32 1, %v1138_v11  ;;  %v299_v27 = vor.u32 %v298_v14, %v297_v10  ;;  %v5016_v36 = vor.u32 %v295_v13, %v294_v1  ;;  %v302_v38 = vor.u32 %v301_v21, %v300_v4 }
  0xda   : > { %v1009_v22 = vand.u32 2147483647, %v1008_v63  ;;  %vm306_vm9 = vcmp.lt.s32.totalorder %v4993_v7, 4  ;;  %v1018_v40 = vsel %vm4985_vm7, 0, %v1016_v23  ;;  %vm303_vm10 = vcmp.lt.s32.totalorder %v4993_v7, 1 }
  0xdb   : > { %v1143_v32 = vsel %vm1141_vm8, %v1142_v16, %v1138_v11  ;;  %v290_v43 = vor.u32 %v289_v25, %v288_v24  ;;  %vm305_vm11 = vcmp.lt.s32.totalorder %v4993_v7, 3  ;;  %v5030_v44 = vshll.u32 %v279_v3, 8 }
  0xdc   : > { %v1012_v29 = vmul.f32 %v1011_v5, %v1009_v22  ;;  %v1144_v41 = vadd.s32 %v1143_v32, %v1139_v58  ;;  %vm304_vm12 = vcmp.lt.s32.totalorder %v4993_v7, 2  ;;  %v312_v46 = vsel %vm306_vm9, %v299_v27, 920167782 }
  0xdd   : > { %v1035_v42 = vadd.s32 3, %v1018_v40  ;;  %v5037_v48 = vand.u32 3, %v1018_v40  ;;  %v315_v52 = vsel %vm303_vm10, %v5011_v20, %v5016_v36  ;;  %v316_v53 = vsel %vm306_vm9, %v302_v38, 1326507024 }
  0xde   : > { %v1013_v55 = vxor.u32 2147483648, %v1012_v29  ;;  %v1145_v34 = vadd.s32 536870912, %v1144_v41  ;;  %v317_v59 = vsel %vm305_vm11, %v299_v27, %v316_v53  ;;  %v311_v60 = vsel %vm303_vm10, %v290_v43, %v5011_v20 }
  0xdf   : > { %v313_v61 = vsel %vm305_vm11, %v5016_v36, %v312_v46  ;;  %v318_v63 = vsel %vm304_vm12, %v315_v52, %v317_v59  ;;  %v320_v0 = vand.u32 65535, %v5030_v44  ;;  %v5059_v6 = vand.u32 3, %v1035_v42 }
  0xe0   : > { %v1014_v28 = vsel %vm893_vm5, %v1013_v55, %v1012_v29  ;;  %v5045_v57 = vshrl.u32 %v1145_v34, 30  ;;  %v321_v22 = vshrl.u32 %v5030_v44, 16  ;;  %v322_v8 = vand.u32 65535, %v318_v63 }
  0xe1   : > { %v5027_v18 = vsel %vm4985_vm7, %v4848_v19, %v1014_v28  ;;  %v323_v10 = vshrl.u32 %v318_v63, 16  ;;  %v314_v4 = vsel %vm304_vm12, %v311_v60, %v313_v61  ;;  %vm3064_vm13 = vcmp.eq.s32.totalorder %v5037_v48, 2 }
  0xe2   : > { %v1019_v15 = vmul.f32 %v5027_v18, %v5027_v18  ;;  %v1147_v5 = vshll.u32 %v5045_v57, 30  ;;  %v287_v29 = vshrl.u32 %v4716_v31, %v286_v47  ;;  %v344_v14 = vand.u32 65535, %v314_v4 }
  0xe3   : > { %v5068_v13 = vmul.u32 %v323_v10, %v320_v0  ;;  %vm1038_vm15 = vcmp.eq.s32.totalorder %v5059_v6, 0  ;;  %vm3061_vm0 = vcmp.eq.s32.totalorder %v5037_v48, 0  ;;  %v324_v24 = vmul.u32 %v322_v8, %v320_v0 }
  0xe4   : > { %v1020_v54 = vmul.f32 -0.001358992, %v1019_v15  ;;  %v1027_v49 = vmul.f32 -0.00019511016, %v1019_v15  ;;  %v5062_v1 = vsub.s32 %v1144_v41, %v1147_v5  ;;  %v5074_v25 = vmul.u32 %v322_v8, %v321_v22 }
  0xe5   : > { %v345_v55 = vshrl.u32 %v314_v4, 16  ;;  %vm1037_vm1 = vcmp.lt.s32.totalorder %v5059_v6, 2  ;;  %vm3060_vm2 = vcmp.lt.s32.totalorder %v5037_v48, 2  ;;  %v328_v32 = vshll.u32 %v5068_v13, 16 }
  0xe6   : > { %v1021_v2 = vadd.f32 0.041655596, %v1020_v54  ;;  %v1028_v3 = vadd.f32 0.008332121, %v1027_v49  ;;  %vm1149_vm14 = vcmp.lt.s32.totalorder %v5062_v1, 0  ;;  %v1150_v16 = vsub.s32 0, %v5062_v1 }
  0xe7   : > { %vm1034_vm3 = vweird.f32 %v4848_v19  ;;  %vm1041_vm4 = vcmp.eq.s32.totalorder %v5059_v6, 2  ;;  %v1140_v38 = vadd.s32 %v4978_v50, %v4980_v56  ;;  %v5086_v40 = vsel %vm303_vm10, %v287_v29, %v290_v43 }
  0xe8   : > { %v1022_v11 = vmul.f32 %v1021_v2, %v1019_v15  ;;  %v1029_v12 = vmul.f32 %v1028_v3, %v1019_v15  ;;  %v1151_v47 = vsel %vm1149_vm14, %v1150_v16, %v5062_v1  ;;  %v308_v34 = vsel %vm306_vm9, %v5016_v36, 2102212464 }
  0xe9   : > { %v1152_v28 = vclz %v1151_v47  ;;  %v346_v46 = vmul.u32 %v344_v14, %v320_v0  ;;  %v327_v52 = vmul.u32 %v323_v10, %v321_v22  ;;  %v329_v53 = vshrl.u32 %v5068_v13, 16 }
  0xea   : > { %v1023_v21 = vadd.f32 -0.4999988, %v1022_v11  ;;  %v1030_v23 = vadd.f32 -0.16666654, %v1029_v12  ;;  %v5092_v54 = vmul.u32 %v345_v55, %v320_v0  ;;  %v330_v43 = vshll.u32 %v5074_v25, 16 }
  0xeb   : > { %v4432_v42 = vadd.s32 4294967294, %v1152_v28  ;;  %vm332_vm5 = vc.u32 %v324_v24, %v328_v32  ;;  %v334_v59 = vadd.s32 %v328_v32, %v324_v24  ;;  %v348_v60 = vmul.u32 %v344_v14, %v321_v22  ;;  %v194_v24 = vpop.permute.xlu1 %193 }
  0xec   : > { %v1024_v58 = vmul.f32 %v1023_v21, %v1019_v15  ;;  %v1031_v27 = vmul.f32 %v1030_v23, %v1019_v15  ;;  %v333_v49 = vsel %vm332_vm5, 1, %v4722_v30  ;;  %vm1048_vm7 = vcmp.lt.s32.totalorder %v4887_v62, 0 }
  0xed   : > { %vm4433_vm6 = vcmp.lt.s32.totalorder %v4432_v42, 0  ;;  %v335_v5 = vadd.s32 %v333_v49, %v327_v52  ;;  %vm336_vm8 = vc.u32 %v334_v59, %v330_v43  ;;  %v349_v11 = vmul.u32 %v345_v55, %v321_v22  ;;  %v224_v49 = vpop.permute.xlu2 %223 }
  0xee   : > { %v1025_v41 = vadd.f32 1.0, %v1024_v58  ;;  %v1032_v15 = vadd.f32 1.0, %v1031_v27  ;;  %v1155_v0 = vsel %vm4433_vm6, 0, %v4432_v42  ;;  %v337_v21 = vsel %vm336_vm8, 1, %v4722_v30 }
  0xef   : > { %v1157_v2 = vshll.u32 %v5062_v1, %v1155_v0  ;;  %v1160_v3 = vsub.s32 4294967266, %v1155_v0  ;;  %v350_v23 = vshll.u32 %v5092_v54, 16  ;;  %v1170_v22 = vsub.s32 4, %v5045_v57 }
  0xf0   : > { %v1033_v50 = vmul.f32 %v1032_v15, %v5027_v18  ;;  %v1042_v56 = vxor.u32 2147483648, %v1025_v41  ;;  %v1156_v18 = vsub.s32 32, %v1155_v0  ;;  %v339_v16 = vadd.s32 %v337_v21, %v335_v5 }
  0xf1   : > { %v1161_v13 = vadd.s32 127, %v1160_v3  ;;  %v309_v19 = vsel %vm305_vm11, %v5011_v20, %v308_v34  ;;  %v352_v55 = vshll.u32 %v348_v60, 16  ;;  %vm354_vm9 = vc.u32 %v346_v46, %v350_v23 }
  0xf2   : > { %v1039_v36 = vxor.u32 2147483648, %v1033_v50  ;;  %v1043_v61 = vsel %vm1041_vm4, %v1042_v56, %v1033_v50  ;;  %v3066_v63 = vsel %vm3064_vm13, %v1042_v56, %v1033_v50  ;;  %v1158_v29 = vshrl.u32 %v1140_v38, %v1156_v18 }
  0xf3   : > { %v1162_v48 = vshll.u32 %v1161_v13, 23  ;;  %v356_v58 = vadd.s32 %v350_v23, %v346_v46  ;;  %v331_v47 = vshrl.u32 %v5074_v25, 16  ;;  %v340_v32 = vadd.s32 %v339_v16, %v329_v53 }
  0xf4   : > { %v1040_v8 = vsel %vm1038_vm15, %v1025_v41, %v1039_v36  ;;  %v3063_v10 = vsel %vm3061_vm0, %v1025_v41, %v1039_v36  ;;  %v1159_v6 = vor.u32 %v1158_v29, %v1157_v2  ;;  %v355_v38 = vsel %vm354_vm9, 1, %v4722_v30 }
  0xf5   : > { %v1044_v12 = vsel %vm1037_vm1, %v1040_v8, %v1043_v61  ;;  %v3067_v4 = vsel %vm3060_vm2, %v3063_v10, %v3066_v63  ;;  %v1163_v27 = vor.u32 4788187, %v1162_v48  ;;  %v351_v28 = vshrl.u32 %v5092_v54, 16 }
  0xf6   : > { %v1045_v1 = vsel %vm1034_vm3, nan, %v1044_v12  ;;  %v3068_v14 = vsel %vm1034_vm3, nan, %v3067_v4  ;;  %v357_v41 = vadd.s32 %v355_v38, %v349_v11  ;;  %vm358_vm10 = vc.u32 %v356_v58, %v352_v55 }
  0xf7   : > { %2290 = vst [vmem:[%s5118_s20 + $0x40] sm:$0xff] %v1045_v1  ;;  %v5130_v15 = vmul.f32 %v4845_v17, %v194_v24  ;;  %v1164_v42 = vand.u32 2147483647, %v1163_v27  ;;  %v1166_v52 = vcvt.s32.f32 %v1159_v6  ;;  %v1171_v20 = vsel %vm1048_vm7, %v1170_v22, %v5045_v57 }
  0xf8   : > { %4305 = vst [vmem:[%s5118_s20 + $0x48] sm:$0xff] %v3068_v14  ;;  %v359_v34 = vsel %vm358_vm10, 1, %v4722_v30  ;;  %v353_v46 = vshrl.u32 %v348_v60, 16  ;;  %v341_v56 = vadd.s32 %v340_v32, %v331_v47  ;;  %v360_v43 = vadd.s32 %v356_v58, %v352_v55 }
  0xf9   : > { %v361_v25 = vadd.s32 %v359_v34, %v357_v41  ;;  %v581_v53 = vand.u32 2147483647, %v5130_v15  ;;  %v584_v50 = vand.u32 2139095040, %v5130_v15  ;;  %v1167_v54 = vmul.f32 %v1166_v52, %v1164_v42 }
  0xfa   : > { %vm1047_vm11 = vcmp.le.f32.partialorder %v1046_v26, 0.7853982  ;;  %v310_v59 = vsel %vm304_vm12, %v5086_v40, %v309_v19  ;;  %v5146_v2 = vmul.f32 %v4845_v17, %v224_v49  ;;  %vm366_vm13 = vc.u32 %v341_v56, %v360_v43 }
  0xfb   : > { %v362_v57 = vadd.s32 %v361_v25, %v351_v28  ;;  %v585_v36 = vshrl.u32 %v584_v50, 23  ;;  %v1168_v61 = vxor.u32 2147483648, %v1167_v54  ;;  %v1173_v60 = vsel %vm1047_vm11, 0, %v1171_v20 }
  0xfc   : > { %v588_v18 = vand.u32 8388607, %v581_v53  ;;  %v364_v26 = vmul.u32 %v5030_v44, %v310_v59  ;;  %v1190_v10 = vadd.s32 3, %v1173_v60  ;;  %v1359_v4 = vand.u32 2139095040, %v5146_v2 }
  0xfd   : > { %v363_v63 = vadd.s32 %v362_v57, %v353_v46  ;;  %v4422_v0 = vadd.s32 4294967169, %v585_v36  ;;  %v1169_v3 = vsel %vm1048_vm7, %v1168_v61, %v1167_v54  ;;  %v5153_v44 = vand.u32 3, %v1173_v60 }
  0xfe   : > { %v1172_v7 = vsel %vm1047_vm11, %v4887_v62, %v1169_v3  ;;  %v589_v12 = vor.u32 8388608, %v588_v18  ;;  %v5155_v22 = vand.u32 3, %v1190_v10  ;;  %v1356_v24 = vand.u32 2147483647, %v5146_v2 }
  0xff   : > { %v367_v40 = vadd.s32 1, %v363_v63  ;;  %v591_v5 = vadd.s32 1, %v4422_v0  ;;  %v1174_v8 = vmul.f32 %v1172_v7, %v1172_v7  ;;  %v1360_v19 = vshrl.u32 %v1359_v4, 23 }
 0x100   : > { %v5157_v16 = vshll.u32 %v589_v12, 8  ;;  %vm273_vm14 = vcmp.lt.s32.totalorder %v4927_v9, 0  ;;  %v5163_v28 = vadd.s32 %v360_v43, %v341_v56  ;;  %vm1193_vm15 = vcmp.eq.s32.totalorder %v5155_v22, 0 }
 0x101   : > { %v368_v11 = vsel %vm366_vm13, %v367_v40, %v363_v63  ;;  %vm592_vm12 = vcmp.gt.s32.totalorder %v591_v5, 0  ;;  %v1175_v29 = vmul.f32 -0.001358992, %v1174_v8  ;;  %v1182_v13 = vmul.f32 -0.00019511016, %v1174_v8 }
 0x102   : > { %v369_v1 = vadd.s32 %v368_v11, %v364_v26  ;;  %v593_v14 = vsel %vm592_vm12, %v591_v5, 0  ;;  %vm1196_vm0 = vcmp.eq.s32.totalorder %v5155_v22, 2  ;;  %vm3215_vm1 = vcmp.eq.s32.totalorder %v5153_v44, 0 }
 0x103   : > { %v595_v21 = vand.u32 31, %v593_v14  ;;  %v1176_v23 = vadd.f32 0.041655596, %v1175_v29  ;;  %v1183_v6 = vadd.f32 0.008332121, %v1182_v13  ;;  %vm3218_vm2 = vcmp.eq.s32.totalorder %v5153_v44, 2 }
 0x104   : > { %v370_v48 = vadd.s32 536870912, %v369_v1  ;;  %v5170_v42 = vand.u32 65535, %v5157_v16  ;;  %v5173_v52 = vshrl.u32 %v5157_v16, 16  ;;  %v5175_v20 = vadd.s32 4294967169, %v1360_v19 }
 0x105   : > { %v1177_v55 = vmul.f32 %v1176_v23, %v1174_v8  ;;  %v1184_v58 = vmul.f32 %v1183_v6, %v1174_v8  ;;  %v5160_v47 = vsub.s32 32, %v595_v21  ;;  %v5179_v34 = vand.u32 8388607, %v1356_v24 }
 0x106   : > { %v371_v27 = vshrl.u32 %v370_v48, 30  ;;  %vm1192_vm3 = vcmp.lt.s32.totalorder %v5155_v22, 2  ;;  %vm3214_vm4 = vcmp.lt.s32.totalorder %v5153_v44, 2  ;;  %v5185_v54 = vshrl.u32 %v593_v14, 5 }
 0x107   : > { %v1178_v32 = vadd.f32 -0.4999988, %v1177_v55  ;;  %v1185_v38 = vadd.f32 -0.16666654, %v1184_v58  ;;  %vm1189_vm5 = vweird.f32 %v4887_v62  ;;  %v598_v56 = vshll.u32 %v4716_v31, %v595_v21 }
 0x108   : > { %v372_v41 = vshll.u32 %v371_v27, 30  ;;  %v599_v43 = vshrl.u32 %v4717_v33, %v5160_v47  ;;  %v602_v49 = vshrl.u32 %v4718_v35, %v5160_v47  ;;  %v605_v59 = vshrl.u32 %v4719_v37, %v5160_v47 }
 0x109   : > { %v1179_v46 = vmul.f32 %v1178_v32, %v1174_v8  ;;  %v1186_v25 = vmul.f32 %v1185_v38, %v1174_v8  ;;  %v395_v60 = vsub.s32 4, %v371_v27  ;;  %v601_v63 = vshll.u32 %v4717_v33, %v595_v21 }
 0x10a   : > { %v5183_v50 = vsub.s32 %v369_v1, %v372_v41  ;;  %v608_v0 = vshrl.u32 %v4720_v39, %v5160_v47  ;;  %v611_v18 = vshrl.u32 %v4721_v45, %v5160_v47  ;;  %v604_v5 = vshll.u32 %v4718_v35, %v595_v21 }
 0x10b   : > { %v1180_v57 = vadd.f32 1.0, %v1179_v46  ;;  %v1187_v36 = vadd.f32 1.0, %v1186_v25  ;;  %vm5206_vm7 = vcmp.le.f32.partialorder %v271_v51, 0.7853982  ;;  %v607_v11 = vshll.u32 %v4719_v37, %v595_v21 }
 0x10c   : > { %vm374_vm6 = vcmp.lt.s32.totalorder %v5183_v50, 0  ;;  %v375_v61 = vsub.s32 0, %v5183_v50  ;;  %v610_v12 = vshll.u32 %v4720_v39, %v595_v21  ;;  %v1364_v4 = vor.u32 8388608, %v5179_v34 }
 0x10d   : > { %v1188_v3 = vmul.f32 %v1187_v36, %v1172_v7  ;;  %v1197_v26 = vxor.u32 2147483648, %v1180_v57  ;;  %v600_v7 = vor.u32 %v599_v43, %v598_v56  ;;  %v603_v13 = vor.u32 %v602_v49, %v601_v63 }
 0x10e   : > { %v376_v40 = vsel %vm374_vm6, %v375_v61, %v5183_v50  ;;  %v606_v1 = vor.u32 %v605_v59, %v604_v5  ;;  %v396_v23 = vsel %vm273_vm14, %v395_v60, %v371_v27  ;;  %v609_v51 = vor.u32 %v608_v0, %v607_v11 }
 0x10f   : > { %v377_v10 = vclz %v376_v40  ;;  %v1194_v29 = vxor.u32 2147483648, %v1188_v3  ;;  %v612_v6 = vor.u32 %v611_v18, %v610_v12  ;;  %v1198_v19 = vsel %vm1196_vm0, %v1197_v26, %v1188_v3 }
 0x110   : > { %v3220_v55 = vsel %vm3218_vm2, %v1197_v26, %v1188_v3  ;;  %vm613_vm9 = vcmp.lt.s32.totalorder %v5185_v54, 1  ;;  %vm614_vm10 = vcmp.lt.s32.totalorder %v5185_v54, 2  ;;  %vm615_vm11 = vcmp.lt.s32.totalorder %v5185_v54, 3 }
 0x111   : > { %v4417_v14 = vadd.s32 4294967294, %v377_v10  ;;  %v1195_v48 = vsel %vm1193_vm15, %v1180_v57, %v1194_v29  ;;  %v3217_v21 = vsel %vm3215_vm1, %v1180_v57, %v1194_v29  ;;  %vm616_vm13 = vcmp.lt.s32.totalorder %v5185_v54, 4 }
 0x112   : > { %v1199_v58 = vsel %vm1192_vm3, %v1195_v48, %v1198_v19  ;;  %v3221_v27 = vsel %vm3214_vm4, %v3217_v21, %v3220_v55  ;;  %v621_v22 = vsel %vm613_vm9, %v600_v7, %v603_v13  ;;  %v622_v62 = vsel %vm616_vm13, %v609_v51, 920167782 }
 0x113   : > { %vm4418_vm8 = vcmp.lt.s32.totalorder %v4417_v14, 0  ;;  %v1200_v32 = vsel %vm1189_vm5, nan, %v1199_v58  ;;  %v3222_v38 = vsel %vm1189_vm5, nan, %v3221_v27  ;;  %v625_v56 = vsel %vm613_vm9, %v603_v13, %v606_v1 }
 0x114   : > { %v380_v41 = vsel %vm4418_vm8, 0, %v4417_v14  ;;  %2291 = vst [vmem:[%s5118_s20 + $0x50] sm:$0xff] %v1200_v32  ;;  %v623_v59 = vsel %vm615_vm11, %v606_v1, %v622_v62  ;;  %v626_v57 = vsel %vm616_vm13, %v612_v6, 1326507024  ;;  %v597_v36 = vshrl.u32 %v4716_v31, %v5160_v47 }
 0x115   : > { %v381_v46 = vsub.s32 32, %v380_v41  ;;  %v385_v25 = vsub.s32 4294967266, %v380_v41  ;;  %4306 = vst [vmem:[%s5118_s20 + $0x58] sm:$0xff] %v3222_v38  ;;  %v382_v44 = vshll.u32 %v5183_v50, %v380_v41  ;;  %v398_v50 = vsel %vm5206_vm7, 0, %v396_v23 }
 0x116   : > { %v624_v61 = vsel %vm614_vm10, %v621_v22, %v623_v59  ;;  %v627_v60 = vsel %vm615_vm11, %v609_v51, %v626_v57  ;;  %v618_v3 = vsel %vm616_vm13, %v606_v1, 2102212464  ;;  %v415_v47 = vadd.s32 3, %v398_v50 }
 0x117   : > { %v383_v43 = vshrl.u32 %v5163_v28, %v381_v46  ;;  %v386_v49 = vadd.s32 127, %v385_v25  ;;  %v628_v0 = vsel %vm614_vm10, %v625_v56, %v627_v60  ;;  %v654_v18 = vand.u32 65535, %v624_v61 }
 0x118   : > { %v632_v26 = vand.u32 65535, %v628_v0  ;;  %v633_v40 = vshrl.u32 %v628_v0, 16  ;;  %v655_v5 = vshrl.u32 %v624_v61, 16  ;;  %v1366_v12 = vadd.s32 1, %v5175_v20 }
 0x119   : > { %v384_v28 = vor.u32 %v383_v43, %v382_v44  ;;  %v387_v63 = vshll.u32 %v386_v49, 23  ;;  %v658_v11 = vmul.u32 %v654_v18, %v5173_v52  ;;  %v5263_v29 = vand.u32 3, %v398_v50 }
 0x11a   : > { %v617_v14 = vsel %vm613_vm9, %v597_v36, %v600_v7  ;;  %v635_v23 = vmul.u32 %v633_v40, %v5170_v42  ;;  %v636_v51 = vmul.u32 %v632_v26, %v5173_v52  ;;  %v619_v48 = vsel %vm615_vm11, %v603_v13, %v618_v3 }
 0x11b   : > { %v388_v10 = vor.u32 4788187, %v387_v63  ;;  %v391_v1 = vcvt.s32.f32 %v384_v28  ;;  %v657_v19 = vmul.u32 %v655_v5, %v5170_v42  ;;  %v634_v21 = vmul.u32 %v632_v26, %v5170_v42 }
 0x11c   : > { %v637_v20 = vmul.u32 %v633_v40, %v5173_v52  ;;  %v638_v55 = vshll.u32 %v635_v23, 16  ;;  %v656_v58 = vmul.u32 %v654_v18, %v5170_v42  ;;  %v659_v7 = vmul.u32 %v655_v5, %v5173_v52 }
 0x11d   : > { %v389_v6 = vand.u32 2147483647, %v388_v10  ;;  %v660_v32 = vshll.u32 %v657_v19, 16  ;;  %v662_v38 = vshll.u32 %v658_v11, 16  ;;  %v640_v41 = vshll.u32 %v636_v51, 16 }
 0x11e   : > { %vm642_vm12 = vc.u32 %v634_v21, %v638_v55  ;;  %v644_v46 = vadd.s32 %v638_v55, %v634_v21  ;;  %vm1367_vm15 = vcmp.gt.s32.totalorder %v1366_v12, 0  ;;  %v639_v59 = vshrl.u32 %v635_v23, 16 }
 0x11f   : > { %v392_v27 = vmul.f32 %v391_v1, %v389_v6  ;;  %v643_v13 = vsel %vm642_vm12, 1, %v4722_v30  ;;  %vm664_vm0 = vc.u32 %v656_v58, %v660_v32  ;;  %v666_v44 = vadd.s32 %v660_v32, %v656_v58 }
 0x120   : > { %v645_v22 = vadd.s32 %v643_v13, %v637_v20  ;;  %vm646_vm1 = vc.u32 %v644_v46, %v640_v41  ;;  %v665_v62 = vsel %vm664_vm0, 1, %v4722_v30  ;;  %v1368_v56 = vsel %vm1367_vm15, %v1366_v12, 0 }
 0x121   : > { %v393_v25 = vxor.u32 2147483648, %v392_v27  ;;  %v647_v52 = vsel %vm646_vm1, 1, %v4722_v30  ;;  %v667_v43 = vadd.s32 %v665_v62, %v659_v7  ;;  %vm668_vm2 = vc.u32 %v666_v44, %v662_v38 }
 0x122   : > { %v649_v57 = vadd.s32 %v647_v52, %v645_v22  ;;  %v669_v50 = vsel %vm668_vm2, 1, %v4722_v30  ;;  %v661_v61 = vshrl.u32 %v657_v19, 16  ;;  %v1370_v28 = vand.u32 31, %v1368_v56 }
 0x123   : > { %v394_v42 = vsel %vm273_vm14, %v393_v25, %v392_v27  ;;  %v671_v60 = vadd.s32 %v669_v50, %v667_v43  ;;  %v5289_v63 = vand.u32 3, %v415_v47  ;;  %v641_v0 = vshrl.u32 %v636_v51, 16 }
 0x124   : > { %v5284_v49 = vsel %vm5206_vm7, %v4927_v9, %v394_v42  ;;  %v650_v18 = vadd.s32 %v649_v57, %v639_v59  ;;  %v663_v3 = vshrl.u32 %v658_v11, 16  ;;  %v5291_v5 = vsub.s32 32, %v1370_v28 }
 0x125   : > { %v399_v36 = vmul.f32 %v5284_v49, %v5284_v49  ;;  %v672_v8 = vadd.s32 %v671_v60, %v661_v61  ;;  %v620_v10 = vsel %vm614_vm10, %v617_v14, %v619_v48  ;;  %v5297_v23 = vadd.s32 %v666_v44, %v662_v38 }
 0x126   : > { %v5295_v12 = vadd.s32 %v650_v18, %v641_v0  ;;  %v1373_v6 = vshll.u32 %v4716_v31, %v1370_v28  ;;  %v1376_v51 = vshll.u32 %v4717_v33, %v1370_v28  ;;  %v1374_v11 = vshrl.u32 %v4717_v33, %v5291_v5 }
 0x127   : > { %v400_v26 = vmul.f32 -0.001358992, %v399_v36  ;;  %v407_v40 = vmul.f32 -0.00019511016, %v399_v36  ;;  %v673_v19 = vadd.s32 %v672_v8, %v663_v3  ;;  %v1377_v54 = vshrl.u32 %v4718_v35, %v5291_v5 }
 0x128   : > { %vm676_vm14 = vc.u32 %v5295_v12, %v5297_v23  ;;  %v1379_v14 = vshll.u32 %v4718_v35, %v1370_v28  ;;  %v1380_v55 = vshrl.u32 %v4719_v37, %v5291_v5  ;;  %v674_v58 = vmul.u32 %v5157_v16, %v620_v10 }
 0x129   : > { %v401_v1 = vadd.f32 0.041655596, %v400_v26  ;;  %v408_v47 = vadd.f32 0.008332121, %v407_v40  ;;  %v677_v20 = vadd.s32 1, %v673_v19  ;;  %v5311_v27 = vshrl.u32 %v1368_v56, 5 }
 0x12a   : > { %v1382_v7 = vshll.u32 %v4719_v37, %v1370_v28  ;;  %v1383_v32 = vshrl.u32 %v4720_v39, %v5291_v5  ;;  %v5316_v25 = vor.u32 %v1374_v11, %v1373_v6  ;;  %vm2445_vm3 = vcmp.eq.s32.totalorder %v5263_v29, 0 }
 0x12b   : > { %v402_v48 = vmul.f32 %v401_v1, %v399_v36  ;;  %v409_v21 = vmul.f32 %v408_v47, %v399_v36  ;;  %v678_v46 = vsel %vm676_vm14, %v677_v20, %v673_v19  ;;  %vm2448_vm4 = vcmp.eq.s32.totalorder %v5263_v29, 2 }
 0x12c   : > { %v679_v13 = vadd.s32 %v678_v46, %v674_v58  ;;  %v1384_v44 = vor.u32 %v1383_v32, %v1382_v7  ;;  %v1385_v16 = vshll.u32 %v4720_v39, %v1370_v28  ;;  %v1386_v22 = vshrl.u32 %v4721_v45, %v5291_v5 }
 0x12d   : > { %v403_v38 = vadd.f32 -0.4999988, %v402_v48  ;;  %v410_v41 = vadd.f32 -0.16666654, %v409_v21  ;;  %vm2444_vm5 = vcmp.lt.s32.totalorder %v5263_v29, 2  ;;  %v5324_v42 = vor.u32 %v1377_v54, %v1376_v51 }
 0x12e   : > { %v5326_v52 = vor.u32 %v1380_v55, %v1379_v14  ;;  %vm414_vm6 = vweird.f32 %v4927_v9  ;;  %v680_v43 = vadd.s32 536870912, %v679_v13  ;;  %vm1388_vm7 = vcmp.lt.s32.totalorder %v5311_v27, 1 }
 0x12f   : > { %v404_v62 = vmul.f32 %v403_v38, %v399_v36  ;;  %v411_v56 = vmul.f32 %v410_v41, %v399_v36  ;;  %vm1390_vm8 = vcmp.lt.s32.totalorder %v5311_v27, 3  ;;  %vm1391_vm9 = vcmp.lt.s32.totalorder %v5311_v27, 4 }
 0x130   : > { %v1387_v50 = vor.u32 %v1386_v22, %v1385_v16  ;;  %v5334_v36 = vshll.u32 %v1364_v4, 8  ;;  %vm417_vm10 = vcmp.lt.s32.totalorder %v5289_v63, 2  ;;  %v5337_v61 = vshrl.u32 %v680_v43, 30 }
 0x131   : > { %v405_v59 = vadd.f32 1.0, %v404_v62  ;;  %v412_v57 = vadd.f32 1.0, %v411_v56  ;;  %vm1389_vm11 = vcmp.lt.s32.totalorder %v5311_v27, 2  ;;  %v1397_v60 = vsel %vm1391_vm9, %v1384_v44, 920167782 }
 0x132   : > { %v1396_v18 = vsel %vm1388_vm7, %v5316_v25, %v5324_v42  ;;  %v1398_v34 = vsel %vm1390_vm8, %v5326_v52, %v1397_v60  ;;  %vm418_vm13 = vcmp.eq.s32.totalorder %v5289_v63, 0  ;;  %vm421_vm12 = vcmp.eq.s32.totalorder %v5289_v63, 2 }
 0x133   : > { %v413_v28 = vmul.f32 %v412_v57, %v5284_v49  ;;  %v422_v0 = vxor.u32 2147483648, %v405_v59  ;;  %v682_v4 = vshll.u32 %v5337_v61, 30  ;;  %v1400_v49 = vsel %vm1388_vm7, %v5324_v42, %v5326_v52 }
 0x134   : > { %v1401_v26 = vsel %vm1391_vm9, %v1387_v50, 1326507024  ;;  %v1405_v40 = vand.u32 65535, %v5334_v36  ;;  %v1406_v8 = vshrl.u32 %v5334_v36, 16  ;;  %v1399_v1 = vsel %vm1389_vm11, %v1396_v18, %v1398_v34 }
 0x135   : > { %v419_v3 = vxor.u32 2147483648, %v413_v28  ;;  %v423_v10 = vsel %vm421_vm12, %v422_v0, %v413_v28  ;;  %v683_v6 = vsub.s32 %v679_v13, %v682_v4  ;;  %v1402_v47 = vsel %vm1390_vm8, %v1384_v44, %v1401_v26 }
 0x136   : > { %v2450_v11 = vsel %vm2448_vm4, %v422_v0, %v413_v28  ;;  %v1403_v54 = vsel %vm1389_vm11, %v1400_v49, %v1402_v47  ;;  %v1372_v63 = vshrl.u32 %v4716_v31, %v5291_v5  ;;  %v1429_v41 = vand.u32 65535, %v1399_v1 }
 0x137   : > { %v420_v19 = vsel %vm418_vm13, %v405_v59, %v419_v3  ;;  %v2447_v51 = vsel %vm2445_vm3, %v405_v59, %v419_v3  ;;  %vm684_vm15 = vcmp.lt.s32.totalorder %v683_v6, 0  ;;  %v685_v21 = vsub.s32 0, %v683_v6 }
 0x138   : > { %v424_v14 = vsel %vm417_vm10, %v420_v19, %v423_v10  ;;  %v2451_v48 = vsel %vm2444_vm5, %v2447_v51, %v2450_v11  ;;  %v1407_v7 = vand.u32 65535, %v1403_v54  ;;  %v1408_v32 = vshrl.u32 %v1403_v54, 16  ;;  %v188_v10 = vpop.permute.xlu0 %187 }
 0x139   : > { %v425_v20 = vsel %vm414_vm6, nan, %v424_v14  ;;  %v2452_v55 = vsel %vm414_vm6, nan, %v2451_v48  ;;  %v686_v58 = vsel %vm684_vm15, %v685_v21, %v683_v6  ;;  %v1430_v29 = vshrl.u32 %v1399_v1, 16 }
 0x13a   : > { %2286 = vst [vmem:[%s5118_s20] sm:$0xff] %v425_v20  ;;  %v687_v38 = vclz %v686_v58  ;;  %v1409_v46 = vmul.u32 %v1407_v7, %v1405_v40  ;;  %v1410_v13 = vmul.u32 %v1408_v32, %v1405_v40  ;;  %v1411_v44 = vmul.u32 %v1407_v7, %v1406_v8 }
 0x13b   : > { %4301 = vst [vmem:[%s5118_s20 + $0x8] sm:$0xff] %v2452_v55  ;;  %v675_v22 = vadd.s32 %v5297_v23, %v5295_v12  ;;  %v1412_v9 = vmul.u32 %v1408_v32, %v1406_v8  ;;  %v1392_v43 = vsel %vm1388_vm7, %v1372_v63, %v5316_v25  ;;  %v1431_v59 = vmul.u32 %v1429_v41, %v1405_v40 }
 0x13c   : > { %v4423_v16 = vadd.s32 4294967294, %v687_v38  ;;  %v1413_v62 = vshll.u32 %v1410_v13, 16  ;;  %v1415_v56 = vshll.u32 %v1411_v44, 16  ;;  %v1432_v57 = vmul.u32 %v1430_v29, %v1405_v40 }
 0x13d   : > { %v1433_v60 = vmul.u32 %v1429_v41, %v1406_v8  ;;  %v1414_v18 = vshrl.u32 %v1410_v13, 16  ;;  %v1434_v23 = vmul.u32 %v1430_v29, %v1406_v8  ;;  %v1393_v40 = vsel %vm1391_vm9, %v5326_v52, 2102212464 }
 0x13e   : > { %vm4424_vm0 = vcmp.lt.s32.totalorder %v4423_v16, 0  ;;  %vm1417_vm1 = vc.u32 %v1409_v46, %v1413_v62  ;;  %v1419_v50 = vadd.s32 %v1413_v62, %v1409_v46  ;;  %v1435_v4 = vshll.u32 %v1432_v57, 16  ;;  %v200_v46 = vpop.permute.xlu1 %199 }
 0x13f   : > { %v690_v5 = vsel %vm4424_vm0, 0, %v4423_v16  ;;  %v1418_v34 = vsel %vm1417_vm1, 1, %v4722_v30  ;;  %v1437_v47 = vshll.u32 %v1433_v60, 16  ;;  %v1416_v8 = vshrl.u32 %v1411_v44, 16 }
 0x140   : > { %v691_v28 = vsub.s32 32, %v690_v5  ;;  %v695_v0 = vsub.s32 4294967266, %v690_v5  ;;  %v1420_v12 = vadd.s32 %v1418_v34, %v1412_v9  ;;  %vm1421_vm2 = vc.u32 %v1419_v50, %v1415_v56 }
 0x141   : > { %v692_v49 = vshll.u32 %v683_v6, %v690_v5  ;;  %v1422_v25 = vsel %vm1421_vm2, 1, %v4722_v30  ;;  %vm1439_vm14 = vc.u32 %v1431_v59, %v1435_v4  ;;  %v1441_v54 = vadd.s32 %v1435_v4, %v1431_v59 }
 0x142   : > { %v693_v3 = vshrl.u32 %v675_v22, %v691_v28  ;;  %v696_v26 = vadd.s32 127, %v695_v0  ;;  %v1424_v1 = vadd.s32 %v1422_v25, %v1420_v12  ;;  %v1440_v11 = vsel %vm1439_vm14, 1, %v4722_v30 }
 0x143   : > { %v1442_v6 = vadd.s32 %v1440_v11, %v1434_v23  ;;  %v5395_v48 = vmul.f32 %v4845_v17, %v188_v10  ;;  %v705_v20 = vsub.s32 4, %v5337_v61  ;;  %v1436_v55 = vshrl.u32 %v1432_v57, 16 }
 0x144   : > { %v694_v19 = vor.u32 %v693_v3, %v692_v49  ;;  %v697_v51 = vshll.u32 %v696_v26, 23  ;;  %v1425_v14 = vadd.s32 %v1424_v1, %v1414_v18  ;;  %vm1443_vm3 = vc.u32 %v1441_v54, %v1437_v47 }
 0x145   : > { %v1394_v52 = vsel %vm1390_vm8, %v5324_v42, %v1393_v40  ;;  %v1444_v58 = vsel %vm1443_vm3, 1, %v4722_v30  ;;  %v426_v7 = vand.u32 2147483647, %v5395_v48  ;;  %v429_v32 = vand.u32 2139095040, %v5395_v48 }
 0x146   : > { %v698_v21 = vor.u32 4788187, %v697_v51  ;;  %v701_v63 = vcvt.s32.f32 %v694_v19  ;;  %v1438_v41 = vshrl.u32 %v1433_v60, 16  ;;  %v1446_v29 = vadd.s32 %v1444_v58, %v1442_v6 }
 0x147   : > { %vm583_vm4 = vcmp.lt.s32.totalorder %v5130_v15, 0  ;;  %v1426_v13 = vadd.s32 %v1425_v14, %v1416_v8  ;;  %v1445_v44 = vadd.s32 %v1441_v54, %v1437_v47  ;;  %v430_v16 = vshrl.u32 %v429_v32, 23 }
 0x148   : > { %v699_v38 = vand.u32 2147483647, %v698_v21  ;;  %v706_v42 = vsel %vm583_vm4, %v705_v20, %v5337_v61  ;;  %v1447_v9 = vadd.s32 %v1446_v29, %v1436_v55  ;;  %v1395_v62 = vsel %vm1389_vm11, %v1392_v43, %v1394_v52 }
 0x149   : > { %v4419_v56 = vadd.s32 4294967169, %v430_v16  ;;  %v433_v59 = vand.u32 8388607, %v426_v7  ;;  %v5413_v57 = vmul.f32 %v4845_v17, %v200_v46  ;;  %vm582_vm5 = vcmp.le.f32.partialorder %v581_v53, 0.7853982 }
 0x14a   : > { %v702_v22 = vmul.f32 %v701_v63, %v699_v38  ;;  %v1448_v50 = vadd.s32 %v1447_v9, %v1438_v41  ;;  %v708_v60 = vsel %vm582_vm5, 0, %v706_v42  ;;  %vm1451_vm6 = vc.u32 %v1426_v13, %v1445_v44 }
 0x14b   : > { %v436_v28 = vadd.s32 1, %v4419_v56  ;;  %v1449_v27 = vmul.u32 %v5334_v36, %v1395_v62  ;;  %v434_v18 = vor.u32 8388608, %v433_v59  ;;  %v739_v34 = vand.u32 2139095040, %v5413_v57 }
 0x14c   : > { %v703_v5 = vxor.u32 2147483648, %v702_v22  ;;  %v1452_v43 = vadd.s32 1, %v1448_v50  ;;  %v725_v23 = vadd.s32 3, %v708_v60  ;;  %v736_v10 = vand.u32 2147483647, %v5413_v57 }
 0x14d   : > { %vm437_vm7 = vcmp.gt.s32.totalorder %v436_v28, 0  ;;  %v5423_v1 = vshll.u32 %v434_v18, 8  ;;  %v740_v36 = vshrl.u32 %v739_v34, 23  ;;  %v5427_v11 = vand.u32 3, %v708_v60 }
 0x14e   : > { %v704_v61 = vsel %vm583_vm4, %v703_v5, %v702_v22  ;;  %v1453_v53 = vsel %vm1451_vm6, %v1452_v43, %v1448_v50  ;;  %v438_v4 = vsel %vm437_vm7, %v436_v28, 0  ;;  %v5425_v51 = vand.u32 3, %v725_v23 }
 0x14f   : > { %v707_v0 = vsel %vm582_vm5, %v5130_v15, %v704_v61  ;;  %v1454_v49 = vadd.s32 %v1453_v53, %v1449_v27  ;;  %v440_v3 = vand.u32 31, %v438_v4  ;;  %v5431_v21 = vadd.s32 %v1445_v44, %v1426_v13 }
 0x150   : > { %v709_v12 = vmul.f32 %v707_v0, %v707_v0  ;;  %v5435_v20 = vand.u32 8388607, %v736_v10  ;;  %v5438_v52 = vshrl.u32 %v438_v4, 5  ;;  %v5441_v58 = vand.u32 65535, %v5423_v1 }
 0x151   : > { %v1455_v40 = vadd.s32 536870912, %v1454_v49  ;;  %v441_v8 = vsub.s32 32, %v440_v3  ;;  %v4425_v32 = vadd.s32 4294967169, %v740_v36  ;;  %vm731_vm8 = vcmp.eq.s32.totalorder %v5425_v51, 2 }
 0x152   : > { %v710_v26 = vmul.f32 -0.001358992, %v709_v12  ;;  %v717_v25 = vmul.f32 -0.00019511016, %v709_v12  ;;  %vm2756_vm9 = vcmp.eq.s32.totalorder %v5427_v11, 2  ;;  %v443_v41 = vshll.u32 %v4716_v31, %v440_v3 }
 0x153   : > { %v5429_v54 = vshrl.u32 %v1455_v40, 30  ;;  %v5447_v29 = vshrl.u32 %v5423_v1, 16  ;;  %vm728_vm10 = vcmp.eq.s32.totalorder %v5425_v51, 0  ;;  %vm2753_vm11 = vcmp.eq.s32.totalorder %v5427_v11, 0 }
 0x154   : > { %v711_v47 = vadd.f32 0.041655596, %v710_v26  ;;  %v718_v19 = vadd.f32 0.008332121, %v717_v25  ;;  %v444_v13 = vshrl.u32 %v4717_v33, %v441_v8  ;;  %v446_v44 = vshll.u32 %v4717_v33, %v440_v3 }
 0x155   : > { %v1457_v55 = vshll.u32 %v5429_v54, 30  ;;  %v449_v16 = vshll.u32 %v4718_v35, %v440_v3  ;;  %vm727_vm13 = vcmp.lt.s32.totalorder %v5425_v51, 2  ;;  %vm2752_vm12 = vcmp.lt.s32.totalorder %v5427_v11, 2 }
 0x156   : > { %v712_v14 = vmul.f32 %v711_v47, %v709_v12  ;;  %v719_v6 = vmul.f32 %v718_v19, %v709_v12  ;;  %v447_v9 = vshrl.u32 %v4718_v35, %v441_v8  ;;  %v452_v62 = vshll.u32 %v4719_v37, %v440_v3 }
 0x157   : > { %v5451_v46 = vsub.s32 %v1454_v49, %v1457_v55  ;;  %vm724_vm15 = vweird.f32 %v5130_v15  ;;  %v450_v59 = vshrl.u32 %v4719_v37, %v441_v8  ;;  %v453_v5 = vshrl.u32 %v4720_v39, %v441_v8 }
 0x158   : > { %v713_v38 = vadd.f32 -0.4999988, %v712_v14  ;;  %v720_v63 = vadd.f32 -0.16666654, %v719_v6  ;;  %vm1358_vm1 = vcmp.lt.s32.totalorder %v5146_v2, 0  ;;  %v455_v28 = vshll.u32 %v4720_v39, %v440_v3 }
 0x159   : > { %vm1459_vm0 = vcmp.lt.s32.totalorder %v5451_v46, 0  ;;  %v1460_v56 = vsub.s32 0, %v5451_v46  ;;  %v456_v61 = vshrl.u32 %v4721_v45, %v441_v8  ;;  %v442_v43 = vshrl.u32 %v4716_v31, %v441_v8 }
 0x15a   : > { %v714_v22 = vmul.f32 %v713_v38, %v709_v12  ;;  %v721_v42 = vmul.f32 %v720_v63, %v709_v12  ;;  %v445_v18 = vor.u32 %v444_v13, %v443_v41  ;;  %v5470_v34 = vadd.s32 1, %v4425_v32 }
 0x15b   : > { %v1461_v27 = vsel %vm1459_vm0, %v1460_v56, %v5451_v46  ;;  %v448_v4 = vor.u32 %v447_v9, %v446_v44  ;;  %v1480_v49 = vsub.s32 4, %v5429_v54  ;;  %v451_v26 = vor.u32 %v450_v59, %v449_v16 }
 0x15c   : > { %v715_v50 = vadd.f32 1.0, %v714_v22  ;;  %v722_v60 = vadd.f32 1.0, %v721_v42  ;;  %v1462_v53 = vclz %v1461_v27  ;;  %v454_v25 = vor.u32 %v453_v5, %v452_v62 }
 0x15d   : > { %vm458_vm2 = vcmp.lt.s32.totalorder %v5438_v52, 1  ;;  %v457_v36 = vor.u32 %v456_v61, %v455_v28  ;;  %vm459_vm14 = vcmp.lt.s32.totalorder %v5438_v52, 2  ;;  %vm5481_vm3 = vcmp.le.f32.partialorder %v1356_v24, 0.7853982 }
 0x15e   : > { %v723_v12 = vmul.f32 %v722_v60, %v707_v0  ;;  %v732_v23 = vxor.u32 2147483648, %v715_v50  ;;  %v4438_v40 = vadd.s32 4294967294, %v1462_v53  ;;  %vm460_vm4 = vcmp.lt.s32.totalorder %v5438_v52, 3 }
 0x15f   : > { %vm461_vm5 = vcmp.lt.s32.totalorder %v5438_v52, 4  ;;  %v466_v6 = vsel %vm458_vm2, %v445_v18, %v448_v4  ;;  %v470_v38 = vsel %vm458_vm2, %v448_v4, %v451_v26  ;;  %v1481_v11 = vsel %vm1358_vm1, %v1480_v49, %v5429_v54 }
 0x160   : > { %v729_v3 = vxor.u32 2147483648, %v723_v12  ;;  %v733_v47 = vsel %vm731_vm8, %v732_v23, %v723_v12  ;;  %v2758_v0 = vsel %vm2756_vm9, %v732_v23, %v723_v12  ;;  %vm4439_vm6 = vcmp.lt.s32.totalorder %v4438_v40, 0 }
 0x161   : > { %v1465_v32 = vsel %vm4439_vm6, 0, %v4438_v40  ;;  %v463_v44 = vsel %vm461_vm5, %v451_v26, 2102212464  ;;  %v467_v16 = vsel %vm461_vm5, %v454_v25, 920167782  ;;  %v462_v42 = vsel %vm458_vm2, %v442_v43, %v445_v18 }
 0x162   : > { %v730_v8 = vsel %vm728_vm10, %v715_v50, %v729_v3  ;;  %v2755_v14 = vsel %vm2753_vm11, %v715_v50, %v729_v3  ;;  %v1466_v13 = vsub.s32 32, %v1465_v32  ;;  %v1470_v51 = vsub.s32 4294967266, %v1465_v32 }
 0x163   : > { %v734_v24 = vsel %vm727_vm13, %v730_v8, %v733_v47  ;;  %v2759_v55 = vsel %vm2752_vm12, %v2755_v14, %v2758_v0  ;;  %v471_v22 = vsel %vm461_vm5, %v457_v36, 1326507024  ;;  %v468_v9 = vsel %vm460_vm4, %v451_v26, %v467_v16 }
 0x164   : > { %v735_v63 = vsel %vm724_vm15, nan, %v734_v24  ;;  %v2760_v41 = vsel %vm724_vm15, nan, %v2759_v55  ;;  %v1468_v15 = vshrl.u32 %v5431_v21, %v1466_v13  ;;  %v472_v62 = vsel %vm460_vm4, %v454_v25, %v471_v22 }
 0x165   : > { %2288 = vst [vmem:[%s5118_s20 + $0x20] sm:$0xff] %v735_v63  ;;  %v1467_v54 = vshll.u32 %v5451_v46, %v1465_v32  ;;  %v1471_v56 = vadd.s32 127, %v1470_v51  ;;  %v469_v59 = vsel %vm459_vm14, %v466_v6, %v468_v9  ;;  %v473_v5 = vsel %vm459_vm14, %v470_v38, %v472_v62 }
 0x166   : > { %4303 = vst [vmem:[%s5118_s20 + $0x28] sm:$0xff] %v2760_v41  ;;  %v464_v21 = vsel %vm460_vm4, %v448_v4, %v463_v44  ;;  %v477_v50 = vand.u32 65535, %v473_v5  ;;  %v478_v60 = vshrl.u32 %v473_v5, 16  ;;  %v499_v28 = vand.u32 65535, %v469_v59 }
 0x167   : > { %v1469_v61 = vor.u32 %v1468_v15, %v1467_v54  ;;  %v1472_v27 = vshll.u32 %v1471_v56, 23  ;;  %v500_v43 = vshrl.u32 %v469_v59, 16  ;;  %v744_v18 = vor.u32 8388608, %v5435_v20 }
 0x168   : > { %v5531_v46 = vsel %vm5481_vm3, 0, %v1481_v11  ;;  %v479_v12 = vmul.u32 %v477_v50, %v5441_v58  ;;  %v480_v23 = vmul.u32 %v478_v60, %v5441_v58  ;;  %v481_v53 = vmul.u32 %v477_v50, %v5447_v29 }
 0x169   : > { %v1473_v49 = vor.u32 4788187, %v1472_v27  ;;  %v5538_v4 = vsel %vm459_vm14, %v462_v42, %v464_v21  ;;  %v502_v26 = vmul.u32 %v500_v43, %v5441_v58  ;;  %vm747_vm7 = vcmp.gt.s32.totalorder %v5470_v34, 0 }
 0x16a   : > { %v482_v25 = vmul.u32 %v478_v60, %v5447_v29  ;;  %v483_v3 = vshll.u32 %v480_v23, 16  ;;  %v485_v40 = vshll.u32 %v481_v53, 16  ;;  %v501_v36 = vmul.u32 %v499_v28, %v5441_v58 }
 0x16b   : > { %v1474_v47 = vand.u32 2147483647, %v1473_v49  ;;  %v1476_v0 = vcvt.s32.f32 %v1469_v61  ;;  %v503_v8 = vmul.u32 %v499_v28, %v5447_v29  ;;  %v505_v14 = vshll.u32 %v502_v26, 16 }
 0x16c   : > { %v484_v6 = vshrl.u32 %v480_v23, 16  ;;  %vm487_vm8 = vc.u32 %v479_v12, %v483_v3  ;;  %v489_v52 = vadd.s32 %v483_v3, %v479_v12  ;;  %v504_v24 = vmul.u32 %v500_v43, %v5447_v29 }
 0x16d   : > { %v1477_v55 = vmul.f32 %v1476_v0, %v1474_v47  ;;  %v488_v32 = vsel %vm487_vm8, 1, %v4722_v30  ;;  %v507_v38 = vshll.u32 %v503_v8, 16  ;;  %v748_v63 = vsel %vm747_vm7, %v5470_v34, 0 }
 0x16e   : > { %v490_v41 = vadd.s32 %v488_v32, %v482_v25  ;;  %vm491_vm9 = vc.u32 %v489_v52, %v485_v40  ;;  %vm509_vm10 = vc.u32 %v501_v36, %v505_v14  ;;  %v511_v58 = vadd.s32 %v505_v14, %v501_v36 }
 0x16f   : > { %v1478_v13 = vxor.u32 2147483648, %v1477_v55  ;;  %v486_v44 = vshrl.u32 %v481_v53, 16  ;;  %v492_v51 = vsel %vm491_vm9, 1, %v4722_v30  ;;  %v510_v11 = vsel %vm509_vm10, 1, %v4722_v30 }
 0x170   : > { %v494_v16 = vadd.s32 %v492_v51, %v490_v41  ;;  %v506_v29 = vshrl.u32 %v502_v26, 16  ;;  %v512_v22 = vadd.s32 %v510_v11, %v504_v24  ;;  %vm513_vm11 = vc.u32 %v511_v58, %v507_v38 }
 0x171   : > { %v1479_v15 = vsel %vm1358_vm1, %v1478_v13, %v1477_v55  ;;  %v1500_v42 = vadd.s32 3, %v5531_v46  ;;  %v514_v34 = vsel %vm513_vm11, 1, %v4722_v30  ;;  %v750_v9 = vand.u32 31, %v748_v63 }
 0x172   : > { %v1482_v62 = vsel %vm5481_vm3, %v5146_v2, %v1479_v15  ;;  %v495_v54 = vadd.s32 %v494_v16, %v484_v6  ;;  %v508_v56 = vshrl.u32 %v503_v8, 16  ;;  %v516_v59 = vadd.s32 %v514_v34, %v512_v22 }
 0x173   : > { %v1484_v5 = vmul.f32 %v1482_v62, %v1482_v62  ;;  %v5559_v21 = vadd.s32 %v511_v58, %v507_v38  ;;  %v519_v50 = vmul.u32 %v5423_v1, %v5538_v4  ;;  %v5563_v60 = vsub.s32 32, %v750_v9 }
 0x174   : > { %v5565_v28 = vadd.s32 %v495_v54, %v486_v44  ;;  %v517_v61 = vadd.s32 %v516_v59, %v506_v29  ;;  %v5567_v27 = vshrl.u32 %v748_v63, 5  ;;  %v753_v43 = vshll.u32 %v4716_v31, %v750_v9 }
 0x175   : > { %v1485_v19 = vmul.f32 -0.001358992, %v1484_v5  ;;  %v1492_v12 = vmul.f32 -0.00019511016, %v1484_v5  ;;  %v754_v23 = vshrl.u32 %v4717_v33, %v5563_v60  ;;  %v756_v53 = vshll.u32 %v4717_v33, %v750_v9 }
 0x176   : > { %v518_v49 = vadd.s32 %v517_v61, %v508_v56  ;;  %v757_v1 = vshrl.u32 %v4718_v35, %v5563_v60  ;;  %v759_v4 = vshll.u32 %v4718_v35, %v750_v9  ;;  %v762_v26 = vshll.u32 %v4719_v37, %v750_v9 }
 0x177   : > { %v1486_v25 = vadd.f32 0.041655596, %v1485_v19  ;;  %v1493_v3 = vadd.f32 0.008332121, %v1492_v12  ;;  %vm521_vm13 = vc.u32 %v5565_v28, %v5559_v21  ;;  %v760_v40 = vshrl.u32 %v4719_v37, %v5563_v60 }
 0x178   : > { %v522_v36 = vadd.s32 1, %v518_v49  ;;  %v5581_v47 = vor.u32 %v754_v23, %v753_v43  ;;  %v5583_v0 = vor.u32 %v757_v1, %v756_v53  ;;  %v763_v8 = vshrl.u32 %v4720_v39, %v5563_v60 }
 0x179   : > { %v1487_v14 = vmul.f32 %v1486_v25, %v1484_v5  ;;  %v1494_v6 = vmul.f32 %v1493_v3, %v1484_v5  ;;  %v765_v52 = vshll.u32 %v4720_v39, %v750_v9  ;;  %v766_v24 = vshrl.u32 %v4721_v45, %v5563_v60 }
 0x17a   : > { %v523_v55 = vsel %vm521_vm13, %v522_v36, %v518_v49  ;;  %v5590_v32 = vor.u32 %v760_v40, %v759_v4  ;;  %v764_v38 = vor.u32 %v763_v8, %v762_v26  ;;  %vm771_vm12 = vcmp.lt.s32.totalorder %v5567_v27, 4 }
 0x17b   : > { %v1488_v63 = vadd.f32 -0.4999988, %v1487_v14  ;;  %v1495_v41 = vadd.f32 -0.16666654, %v1494_v6  ;;  %v524_v58 = vadd.s32 %v523_v55, %v519_v50  ;;  %v767_v13 = vor.u32 %v766_v24, %v765_v52 }
 0x17c   : > { %v3521_v44 = vand.u32 3, %v5531_v46  ;;  %vm768_vm15 = vcmp.lt.s32.totalorder %v5567_v27, 1  ;;  %vm770_vm0 = vcmp.lt.s32.totalorder %v5567_v27, 3  ;;  %v777_v51 = vsel %vm771_vm12, %v764_v38, 920167782 }
 0x17d   : > { %v1489_v11 = vmul.f32 %v1488_v63, %v1484_v5  ;;  %v1496_v16 = vmul.f32 %v1495_v41, %v1484_v5  ;;  %v525_v29 = vadd.s32 536870912, %v524_v58  ;;  %v776_v22 = vsel %vm768_vm15, %v5581_v47, %v5583_v0 }
 0x17e   : > { %vm1499_vm1 = vweird.f32 %v5146_v2  ;;  %v1501_v15 = vand.u32 3, %v1500_v42  ;;  %vm769_vm2 = vcmp.lt.s32.totalorder %v5567_v27, 2  ;;  %v778_v46 = vsel %vm770_vm0, %v5590_v32, %v777_v51 }
 0x17f   : > { %v781_v34 = vsel %vm771_vm12, %v767_v13, 1326507024  ;;  %v1490_v9 = vadd.f32 1.0, %v1489_v11  ;;  %v1497_v54 = vadd.f32 1.0, %v1496_v16  ;;  %v5609_v56 = vshrl.u32 %v525_v29, 30 }
 0x180   : > { %v780_v59 = vsel %vm768_vm15, %v5583_v0, %v5590_v32  ;;  %vm3522_vm14 = vcmp.lt.s32.totalorder %v3521_v44, 2  ;;  %vm3523_vm3 = vcmp.eq.s32.totalorder %v3521_v44, 0  ;;  %v779_v42 = vsel %vm769_vm2, %v776_v22, %v778_v46 }
 0x181   : > { %v782_v5 = vsel %vm770_vm0, %v764_v38, %v781_v34  ;;  %v1498_v50 = vmul.f32 %v1497_v54, %v1482_v62  ;;  %v1507_v61 = vxor.u32 2147483648, %v1490_v9  ;;  %vm3526_vm4 = vcmp.eq.s32.totalorder %v3521_v44, 2 }
 0x182   : > { %v527_v43 = vshll.u32 %v5609_v56, 30  ;;  %vm1502_vm5 = vcmp.lt.s32.totalorder %v1501_v15, 2  ;;  %vm1503_vm6 = vcmp.eq.s32.totalorder %v1501_v15, 0  ;;  %v783_v19 = vsel %vm769_vm2, %v780_v59, %v782_v5 }
 0x183   : > { %v5624_v12 = vshll.u32 %v744_v18, 8  ;;  %v1504_v23 = vxor.u32 2147483648, %v1498_v50  ;;  %vm1506_vm7 = vcmp.eq.s32.totalorder %v1501_v15, 2  ;;  %v810_v49 = vshrl.u32 %v779_v42, 16 }
 0x184   : > { %v528_v53 = vsub.s32 %v524_v58, %v527_v43  ;;  %v1508_v1 = vsel %vm1506_vm7, %v1507_v61, %v1498_v50  ;;  %v3528_v62 = vsel %vm3526_vm4, %v1507_v61, %v1498_v50  ;;  %v787_v4 = vand.u32 65535, %v783_v19  ;;  %v242_v43 = vpop.permute.xlu2 %241 }
 0x185   : > { %v788_v26 = vshrl.u32 %v783_v19, 16  ;;  %v1505_v25 = vsel %vm1503_vm6, %v1490_v9, %v1504_v23  ;;  %v3525_v3 = vsel %vm3523_vm3, %v1490_v9, %v1504_v23  ;;  %v785_v18 = vand.u32 65535, %v5624_v12 }
 0x186   : > { %vm529_vm8 = vcmp.lt.s32.totalorder %v528_v53, 0  ;;  %v530_v40 = vsub.s32 0, %v528_v53  ;;  %v1509_v36 = vsel %vm1502_vm5, %v1505_v25, %v1508_v1  ;;  %v3529_v20 = vsel %vm3522_vm14, %v3525_v3, %v3528_v62  ;;  %v230_v25 = vpop.permute.xlu0 %229 }
 0x187   : > { %v786_v8 = vshrl.u32 %v5624_v12, 16  ;;  %v1510_v14 = vsel %vm1499_vm1, nan, %v1509_v36  ;;  %v3530_v6 = vsel %vm1499_vm1, nan, %v3529_v20  ;;  %v809_v24 = vand.u32 65535, %v779_v42 }
 0x188   : > { %v531_v52 = vsel %vm529_vm8, %v530_v40, %v528_v53  ;;  %2293 = vst [vmem:[%s5118_s20 + $0x70] sm:$0xff] %v1510_v14  ;;  %v790_v38 = vmul.u32 %v788_v26, %v785_v18  ;;  %v812_v63 = vmul.u32 %v810_v49, %v785_v18  ;;  %v752_v13 = vshrl.u32 %v4716_v31, %v5563_v60 }
 0x189   : > { %v532_v55 = vclz %v531_v52  ;;  %4308 = vst [vmem:[%s5118_s20 + $0x78] sm:$0xff] %v3530_v6  ;;  %v791_v41 = vmul.u32 %v787_v4, %v786_v8  ;;  %v520_v44 = vadd.s32 %v5559_v21, %v5565_v28  ;;  %v789_v51 = vmul.u32 %v787_v4, %v785_v18 }
 0x18a   : > { %v793_v11 = vshll.u32 %v790_v38, 16  ;;  %v811_v16 = vmul.u32 %v809_v24, %v785_v18  ;;  %v792_v2 = vmul.u32 %v788_v26, %v786_v8  ;;  %v813_v29 = vmul.u32 %v809_v24, %v786_v8 }
 0x18b   : > { %v4420_v58 = vadd.s32 4294967294, %v532_v55  ;;  %v815_v22 = vshll.u32 %v812_v63, 16  ;;  %v795_v46 = vshll.u32 %v791_v41, 16  ;;  %v814_v42 = vmul.u32 %v810_v49, %v786_v8 }
 0x18c   : > { %vm797_vm10 = vc.u32 %v789_v51, %v793_v11  ;;  %v799_v34 = vadd.s32 %v793_v11, %v789_v51  ;;  %v794_v5 = vshrl.u32 %v790_v38, 16  ;;  %v817_v23 = vshll.u32 %v813_v29, 16 }
 0x18d   : > { %vm4421_vm9 = vcmp.lt.s32.totalorder %v4420_v58, 0  ;;  %v798_v59 = vsel %vm797_vm10, 1, %v4722_v30  ;;  %vm819_vm13 = vc.u32 %v811_v16, %v815_v22  ;;  %v821_v62 = vadd.s32 %v815_v22, %v811_v16 }
 0x18e   : > { %v535_v15 = vsel %vm4421_vm9, 0, %v4420_v58  ;;  %v800_v50 = vadd.s32 %v798_v59, %v792_v2  ;;  %vm801_vm11 = vc.u32 %v799_v34, %v795_v46  ;;  %v820_v1 = vsel %vm819_vm13, 1, %v4722_v30 }
 0x18f   : > { %v536_v9 = vsub.s32 32, %v535_v15  ;;  %v540_v54 = vsub.s32 4294967266, %v535_v15  ;;  %v537_v60 = vshll.u32 %v528_v53, %v535_v15  ;;  %v802_v61 = vsel %vm801_vm11, 1, %v4722_v30 }
 0x190   : > { %v804_v19 = vadd.s32 %v802_v61, %v800_v50  ;;  %v773_v53 = vsel %vm771_vm12, %v5590_v32, 2102212464  ;;  %v822_v49 = vadd.s32 %v820_v1, %v814_v42  ;;  %v772_v3 = vsel %vm768_vm15, %v752_v13, %v5581_v47 }
 0x191   : > { %v538_v21 = vshrl.u32 %v520_v44, %v536_v9  ;;  %v541_v28 = vadd.s32 127, %v540_v54  ;;  %vm823_vm1 = vc.u32 %v821_v62, %v817_v23  ;;  %v5651_v36 = vmul.f32 %v4845_v17, %v242_v43 }
 0x192   : > { %v805_v40 = vadd.s32 %v804_v19, %v794_v5  ;;  %v550_v18 = vsub.s32 4, %v5609_v56  ;;  %v796_v8 = vshrl.u32 %v791_v41, 16  ;;  %v824_v14 = vsel %vm823_vm1, 1, %v4722_v30 }
 0x193   : > { %v539_v4 = vor.u32 %v538_v21, %v537_v60  ;;  %v542_v26 = vshll.u32 %v541_v28, 23  ;;  %v774_v32 = vsel %vm770_vm0, %v5583_v0, %v773_v53  ;;  %v816_v6 = vshrl.u32 %v812_v63, 16 }
 0x194   : > { %v826_v52 = vadd.s32 %v824_v14, %v822_v49  ;;  %v5659_v24 = vmul.f32 %v4845_v17, %v230_v25  ;;  %v5661_v38 = vadd.s32 %v805_v40, %v796_v8  ;;  %v1824_v58 = vand.u32 2139095040, %v5651_v36 }
 0x195   : > { %v543_v20 = vor.u32 4788187, %v542_v26  ;;  %v546_v55 = vcvt.s32.f32 %v539_v4  ;;  %vm428_vm12 = vcmp.lt.s32.totalorder %v5395_v48, 0  ;;  %v818_v41 = vshrl.u32 %v813_v29, 16 }
 0x196   : > { %v827_v13 = vadd.s32 %v826_v52, %v816_v6  ;;  %v551_v0 = vsel %vm428_vm12, %v550_v18, %v5609_v56  ;;  %v5668_v63 = vadd.s32 %v821_v62, %v817_v23  ;;  %v1825_v51 = vshrl.u32 %v1824_v58, 23 }
 0x197   : > { %v544_v47 = vand.u32 2147483647, %v543_v20  ;;  %v775_v11 = vsel %vm769_vm2, %v772_v3, %v774_v32  ;;  %v1821_v2 = vand.u32 2147483647, %v5651_v36  ;;  %v1514_v22 = vand.u32 2139095040, %v5659_v24 }
 0x198   : > { %v828_v16 = vadd.s32 %v827_v13, %v818_v41  ;;  %vm427_vm15 = vcmp.le.f32.partialorder %v426_v7, 0.7853982  ;;  %vm831_vm0 = vc.u32 %v5661_v38, %v5668_v63  ;;  %v4446_v15 = vadd.s32 4294967169, %v1825_v51 }
 0x199   : > { %v547_v44 = vmul.f32 %v546_v55, %v544_v47  ;;  %v553_v56 = vsel %vm427_vm15, 0, %v551_v0  ;;  %v829_v27 = vmul.u32 %v5624_v12, %v775_v11  ;;  %v1828_v42 = vand.u32 8388607, %v1821_v2 }
 0x19a   : > { %v832_v46 = vadd.s32 1, %v828_v16  ;;  %v1831_v9 = vadd.s32 1, %v4446_v15  ;;  %v1515_v7 = vshrl.u32 %v1514_v22, 23  ;;  %v570_v5 = vadd.s32 3, %v553_v56 }
 0x19b   : > { %v548_v29 = vxor.u32 2147483648, %v547_v44  ;;  %v5684_v19 = vand.u32 3, %v553_v56  ;;  %v1829_v23 = vor.u32 8388608, %v1828_v42  ;;  %vm738_vm14 = vcmp.lt.s32.totalorder %v5413_v57, 0 }
 0x19c   : > { %v833_v59 = vsel %vm831_vm0, %v832_v46, %v828_v16  ;;  %vm1832_vm2 = vcmp.gt.s32.totalorder %v1831_v9, 0  ;;  %v4440_v1 = vadd.s32 4294967169, %v1515_v7  ;;  %v5686_v26 = vand.u32 3, %v570_v5 }
 0x19d   : > { %v549_v34 = vsel %vm428_vm12, %v548_v29, %v547_v44  ;;  %v834_v50 = vadd.s32 %v833_v59, %v829_v27  ;;  %v1833_v21 = vsel %vm1832_vm2, %v1831_v9, 0  ;;  %v5691_v20 = vshll.u32 %v1829_v23, 8 }
 0x19e   : > { %v552_v54 = vsel %vm427_vm15, %v5395_v48, %v549_v34  ;;  %v1835_v12 = vand.u32 31, %v1833_v21  ;;  %v1511_v18 = vand.u32 2147483647, %v5659_v24  ;;  %v5694_v8 = vadd.s32 1, %v4440_v1 }
 0x19f   : > { %v554_v60 = vmul.f32 %v552_v54, %v552_v54  ;;  %v835_v43 = vadd.s32 536870912, %v834_v50  ;;  %vm576_vm3 = vcmp.eq.s32.totalorder %v5686_v26, 2  ;;  %vm2602_vm4 = vcmp.eq.s32.totalorder %v5684_v19, 2 }
 0x1a0   : > { %v5689_v40 = vsub.s32 32, %v1835_v12  ;;  %v5700_v52 = vshrl.u32 %v1833_v21, 5  ;;  %vm573_vm5 = vcmp.eq.s32.totalorder %v5686_v26, 0  ;;  %vm2599_vm6 = vcmp.eq.s32.totalorder %v5684_v19, 0 }
 0x1a1   : > { %v555_v28 = vmul.f32 -0.001358992, %v554_v60  ;;  %v562_v61 = vmul.f32 -0.00019511016, %v554_v60  ;;  %v836_v53 = vshrl.u32 %v835_v43, 30  ;;  %v1838_v55 = vshll.u32 %v4716_v31, %v1835_v12 }
 0x1a2   : > { %v1841_v58 = vshll.u32 %v4717_v33, %v1835_v12  ;;  %v1844_v41 = vshll.u32 %v4718_v35, %v1835_v12  ;;  %vm572_vm7 = vcmp.lt.s32.totalorder %v5686_v26, 2  ;;  %vm2598_vm8 = vcmp.lt.s32.totalorder %v5684_v19, 2 }
 0x1a3   : > { %v556_v62 = vadd.f32 0.041655596, %v555_v28  ;;  %v563_v4 = vadd.f32 0.008332121, %v562_v61  ;;  %v837_v3 = vshll.u32 %v836_v53, 30  ;;  %v860_v47 = vsub.s32 4, %v836_v53 }
 0x1a4   : > { %vm569_vm10 = vweird.f32 %v5395_v48  ;;  %v1839_v51 = vshrl.u32 %v4717_v33, %v5689_v40  ;;  %v1842_v11 = vshrl.u32 %v4718_v35, %v5689_v40  ;;  %v1845_v16 = vshrl.u32 %v4719_v37, %v5689_v40 }
 0x1a5   : > { %v557_v49 = vmul.f32 %v556_v62, %v554_v60  ;;  %v564_v25 = vmul.f32 %v563_v4, %v554_v60  ;;  %v5698_v6 = vsub.s32 %v834_v50, %v837_v3  ;;  %v1847_v22 = vshll.u32 %v4719_v37, %v1835_v12 }
 0x1a6   : > { %v1848_v46 = vshrl.u32 %v4720_v39, %v5689_v40  ;;  %vm5724_vm11 = vcmp.le.f32.partialorder %v736_v10, 0.7853982  ;;  %v830_v27 = vadd.s32 %v5668_v63, %v5661_v38  ;;  %v5731_v59 = vand.u32 65535, %v5691_v20 }
 0x1a7   : > { %v558_v14 = vadd.f32 -0.4999988, %v557_v49  ;;  %v565_v32 = vadd.f32 -0.16666654, %v564_v25  ;;  %vm839_vm9 = vcmp.lt.s32.totalorder %v5698_v6, 0  ;;  %v840_v0 = vsub.s32 0, %v5698_v6 }
 0x1a8   : > { %v5735_v42 = vand.u32 8388607, %v1511_v18  ;;  %v861_v5 = vsel %vm738_vm14, %v860_v47, %v836_v53  ;;  %vm1853_vm13 = vcmp.lt.s32.totalorder %v5700_v52, 1  ;;  %vm1522_vm1 = vcmp.gt.s32.totalorder %v5694_v8, 0 }
 0x1a9   : > { %v559_v13 = vmul.f32 %v558_v14, %v554_v60  ;;  %v566_v44 = vmul.f32 %v565_v32, %v554_v60  ;;  %v841_v56 = vsel %vm839_vm9, %v840_v0, %v5698_v6  ;;  %v1840_v50 = vor.u32 %v1839_v51, %v1838_v55 }
 0x1aa   : > { %v842_v9 = vclz %v841_v56  ;;  %v5741_v38 = vor.u32 %v1842_v11, %v1841_v58  ;;  %v1850_v63 = vshll.u32 %v4720_v39, %v1835_v12  ;;  %v1846_v28 = vor.u32 %v1845_v16, %v1844_v41 }
 0x1ab   : > { %v560_v29 = vadd.f32 1.0, %v559_v13  ;;  %v567_v15 = vadd.f32 1.0, %v566_v44  ;;  %v1849_v61 = vor.u32 %v1848_v46, %v1847_v22  ;;  %vm1855_vm15 = vcmp.lt.s32.totalorder %v5700_v52, 3 }
 0x1ac   : > { %v4426_v10 = vadd.s32 4294967294, %v842_v9  ;;  %vm1856_vm0 = vcmp.lt.s32.totalorder %v5700_v52, 4  ;;  %vm1854_vm2 = vcmp.lt.s32.totalorder %v5700_v52, 2  ;;  %v1861_v19 = vsel %vm1853_vm13, %v1840_v50, %v5741_v38 }
 0x1ad   : > { %v568_v7 = vmul.f32 %v567_v15, %v552_v54  ;;  %v577_v60 = vxor.u32 2147483648, %v560_v29  ;;  %v1851_v54 = vshrl.u32 %v4721_v45, %v5689_v40  ;;  %v1862_v26 = vsel %vm1856_vm0, %v1849_v61, 920167782 }
 0x1ae   : > { %vm4427_vm12 = vcmp.lt.s32.totalorder %v4426_v10, 0  ;;  %v5775_v48 = vsel %vm5724_vm11, 0, %v861_v5  ;;  %v1863_v41 = vsel %vm1855_vm15, %v1846_v28, %v1862_v26  ;;  %v1871_v51 = vshrl.u32 %v5691_v20, 16 }
 0x1af   : > { %v574_v21 = vxor.u32 2147483648, %v568_v7  ;;  %v578_v43 = vsel %vm576_vm3, %v577_v60, %v568_v7  ;;  %v2604_v23 = vsel %vm2602_vm4, %v577_v60, %v568_v7  ;;  %v845_v62 = vsel %vm4427_vm12, 0, %v4426_v10 }
 0x1b0   : > { %v846_v49 = vsub.s32 32, %v845_v62  ;;  %v1852_v25 = vor.u32 %v1851_v54, %v1850_v63  ;;  %v850_v32 = vsub.s32 4294967266, %v845_v62  ;;  %v847_v47 = vshll.u32 %v5698_v6, %v845_v62 }
 0x1b1   : > { %v575_v1 = vsel %vm573_vm5, %v560_v29, %v574_v21  ;;  %v2601_v12 = vsel %vm2599_vm6, %v560_v29, %v574_v21  ;;  %v1865_v6 = vsel %vm1853_vm13, %v5741_v38, %v1846_v28  ;;  %v1864_v44 = vsel %vm1854_vm2, %v1861_v19, %v1863_v41 }
 0x1b2   : > { %v579_v4 = vsel %vm572_vm7, %v575_v1, %v578_v43  ;;  %v2605_v53 = vsel %vm2598_vm8, %v2601_v12, %v2604_v23  ;;  %v848_v55 = vshrl.u32 %v830_v27, %v846_v49  ;;  %v851_v58 = vadd.s32 127, %v850_v32 }
 0x1b3   : > { %v580_v3 = vsel %vm569_vm10, nan, %v579_v4  ;;  %v2606_v14 = vsel %vm569_vm10, nan, %v2605_v53  ;;  %v1866_v0 = vsel %vm1856_vm0, %v1852_v25, 1326507024  ;;  %v1894_v22 = vand.u32 65535, %v1864_v44 }
 0x1b4   : > { %2287 = vst [vmem:[%s5118_s20 + $0x10] sm:$0xff] %v580_v3  ;;  %v849_v13 = vor.u32 %v848_v55, %v847_v47  ;;  %v852_v11 = vshll.u32 %v851_v58, 23  ;;  %v1867_v16 = vsel %vm1855_vm15, %v1849_v61, %v1866_v0  ;;  %v1895_v29 = vshrl.u32 %v1864_v44, 16 }
 0x1b5   : > { %4302 = vst [vmem:[%s5118_s20 + $0x18] sm:$0xff] %v2606_v14  ;;  %v880_v15 = vadd.s32 3, %v5775_v48  ;;  %v1837_v56 = vshrl.u32 %v4716_v31, %v5689_v40  ;;  %v1868_v46 = vsel %vm1854_vm2, %v1865_v6, %v1867_v16  ;;  %v5797_v27 = vsel %vm1522_vm1, %v5694_v8, 0 }
 0x1b6   : > { %v853_v9 = vor.u32 4788187, %v852_v11  ;;  %v1858_v7 = vsel %vm1856_vm0, %v1846_v28, 2102212464  ;;  %v1872_v60 = vand.u32 65535, %v1868_v46  ;;  %v1873_v5 = vshrl.u32 %v1868_v46, 16 }
 0x1b7   : > { %v856_v10 = vcvt.s32.f32 %v849_v13  ;;  %v1896_v63 = vmul.u32 %v1894_v22, %v5731_v59  ;;  %v1897_v21 = vmul.u32 %v1895_v29, %v5731_v59  ;;  %v1898_v40 = vmul.u32 %v1894_v22, %v1871_v51 }
 0x1b8   : > { %v854_v61 = vand.u32 2147483647, %v853_v9  ;;  %v1874_v54 = vmul.u32 %v1872_v60, %v5731_v59  ;;  %v1875_v43 = vmul.u32 %v1873_v5, %v5731_v59  ;;  %v1876_v23 = vmul.u32 %v1872_v60, %v1871_v51 }
 0x1b9   : > { %v1857_v8 = vsel %vm1853_vm13, %v1837_v56, %v1840_v50  ;;  %v1899_v1 = vmul.u32 %v1895_v29, %v1871_v51  ;;  %v1900_v12 = vshll.u32 %v1897_v21, 16  ;;  %v1902_v28 = vshll.u32 %v1898_v40, 16 }
 0x1ba   : > { %v857_v62 = vmul.f32 %v856_v10, %v854_v61  ;;  %v1877_v4 = vmul.u32 %v1873_v5, %v1871_v51  ;;  %v1878_v53 = vshll.u32 %v1875_v43, 16  ;;  %v1880_v49 = vshll.u32 %v1876_v23, 16 }
 0x1bb   : > { %v1859_v25 = vsel %vm1855_vm15, %v5741_v38, %v1858_v7  ;;  %v1901_v3 = vshrl.u32 %v1897_v21, 16  ;;  %vm1904_vm3 = vc.u32 %v1896_v63, %v1900_v12  ;;  %v1906_v14 = vadd.s32 %v1900_v12, %v1896_v63 }
 0x1bc   : > { %v858_v32 = vxor.u32 2147483648, %v857_v62  ;;  %vm1882_vm4 = vc.u32 %v1874_v54, %v1878_v53  ;;  %v1884_v59 = vadd.s32 %v1878_v53, %v1874_v54  ;;  %v1905_v47 = vsel %vm1904_vm3, 1, %v4722_v30 }
 0x1bd   : > { %v1879_v50 = vshrl.u32 %v1875_v43, 16  ;;  %v1883_v55 = vsel %vm1882_vm4, 1, %v4722_v30  ;;  %v1907_v19 = vadd.s32 %v1905_v47, %v1899_v1  ;;  %vm1908_vm5 = vc.u32 %v1906_v14, %v1902_v28 }
 0x1be   : > { %v859_v26 = vsel %vm738_vm14, %v858_v32, %v857_v62  ;;  %v1885_v58 = vadd.s32 %v1883_v55, %v1877_v4  ;;  %vm1886_vm6 = vc.u32 %v1884_v59, %v1880_v49  ;;  %v1909_v38 = vsel %vm1908_vm5, 1, %v4722_v30 }
 0x1bf   : > { %v5818_v41 = vsel %vm5724_vm11, %v5413_v57, %v859_v26  ;;  %v1887_v6 = vsel %vm1886_vm6, 1, %v4722_v30  ;;  %v1903_v13 = vshrl.u32 %v1898_v40, 16  ;;  %v1911_v44 = vadd.s32 %v1909_v38, %v1907_v19 }
 0x1c0   : > { %v864_v0 = vmul.f32 %v5818_v41, %v5818_v41  ;;  %v1881_v51 = vshrl.u32 %v1876_v23, 16  ;;  %v1889_v11 = vadd.s32 %v1887_v6, %v1885_v58  ;;  %v1525_v16 = vand.u32 31, %v5797_v27 }
 0x1c1   : > { %v1860_v22 = vsel %vm1854_vm2, %v1857_v8, %v1859_v25  ;;  %v5826_v29 = vadd.s32 %v1906_v14, %v1902_v28  ;;  %v1912_v56 = vadd.s32 %v1911_v44, %v1901_v3  ;;  %v1519_v34 = vor.u32 8388608, %v5735_v42 }
 0x1c2   : > { %v865_v46 = vmul.f32 -0.001358992, %v864_v0  ;;  %v872_v9 = vmul.f32 -0.00019511016, %v864_v0  ;;  %v1890_v7 = vadd.s32 %v1889_v11, %v1879_v50  ;;  %v5829_v60 = vsub.s32 32, %v1525_v16 }
 0x1c3   : > { %v5831_v5 = vand.u32 3, %v880_v15  ;;  %v5834_v10 = vand.u32 3, %v5775_v48  ;;  %v1913_v63 = vadd.s32 %v1912_v56, %v1903_v13  ;;  %v1531_v21 = vshll.u32 %v4717_v33, %v1525_v16 }
 0x1c4   : > { %v866_v52 = vadd.f32 0.041655596, %v865_v46  ;;  %v873_v40 = vadd.f32 0.008332121, %v872_v9  ;;  %v5837_v61 = vadd.s32 %v1890_v7, %v1881_v51  ;;  %v1914_v54 = vmul.u32 %v5691_v20, %v1860_v22 }
 0x1c5   : > { %v1917_v42 = vadd.s32 1, %v1913_v63  ;;  %v1532_v43 = vshrl.u32 %v4718_v35, %v5829_v60  ;;  %v1534_v23 = vshll.u32 %v4718_v35, %v1525_v16  ;;  %v1535_v15 = vshrl.u32 %v4719_v37, %v5829_v60 }
 0x1c6   : > { %v867_v48 = vmul.f32 %v866_v52, %v864_v0  ;;  %v874_v8 = vmul.f32 %v873_v40, %v864_v0  ;;  %vm1916_vm14 = vc.u32 %v5837_v61, %v5826_v29  ;;  %v5848_v1 = vshrl.u32 %v5797_v27, 5 }
 0x1c7   : > { %v1918_v12 = vsel %vm1916_vm14, %v1917_v42, %v1913_v63  ;;  %v1528_v20 = vshll.u32 %v4716_v31, %v1525_v16  ;;  %v1529_v28 = vshrl.u32 %v4717_v33, %v5829_v60  ;;  %v5853_v62 = vor.u32 %v1532_v43, %v1531_v21 }
 0x1c8   : > { %v868_v4 = vadd.f32 -0.4999988, %v867_v48  ;;  %v875_v53 = vadd.f32 -0.16666654, %v874_v8  ;;  %vm2910_vm7 = vcmp.eq.s32.totalorder %v5834_v10, 2  ;;  %v1919_v49 = vadd.s32 %v1918_v12, %v1914_v54 }
 0x1c9   : > { %v1537_v25 = vshll.u32 %v4719_v37, %v1525_v16  ;;  %vm2907_vm8 = vcmp.eq.s32.totalorder %v5834_v10, 0  ;;  %v5858_v3 = vor.u32 %v1535_v15, %v1534_v23  ;;  %v1538_v27 = vshrl.u32 %v4720_v39, %v5829_v60 }
 0x1ca   : > { %v1540_v14 = vshll.u32 %v4720_v39, %v1525_v16  ;;  %v1541_v32 = vshrl.u32 %v4721_v45, %v5829_v60  ;;  %v869_v59 = vmul.f32 %v868_v4, %v864_v0  ;;  %v876_v47 = vmul.f32 %v875_v53, %v864_v0 }
 0x1cb   : > { %vm2906_vm9 = vcmp.lt.s32.totalorder %v5834_v10, 2  ;;  %v1920_v50 = vadd.s32 536870912, %v1919_v49  ;;  %vm1546_vm10 = vcmp.lt.s32.totalorder %v5848_v1, 4  ;;  %vm879_vm11 = vweird.f32 %v5413_v57 }
 0x1cc   : > { %v1539_v55 = vor.u32 %v1538_v27, %v1537_v25  ;;  %v1542_v19 = vor.u32 %v1541_v32, %v1540_v14  ;;  %vm1543_vm13 = vcmp.lt.s32.totalorder %v5848_v1, 1  ;;  %vm1545_vm1 = vcmp.lt.s32.totalorder %v5848_v1, 3 }
 0x1cd   : > { %v870_v26 = vadd.f32 1.0, %v869_v59  ;;  %v877_v58 = vadd.f32 1.0, %v876_v47  ;;  %v5870_v38 = vshrl.u32 %v1920_v50, 30  ;;  %v1530_v6 = vor.u32 %v1529_v28, %v1528_v20 }
 0x1ce   : > { %vm882_vm12 = vcmp.lt.s32.totalorder %v5831_v5, 2  ;;  %vm1544_vm15 = vcmp.lt.s32.totalorder %v5848_v1, 2  ;;  %v1552_v13 = vsel %vm1546_vm10, %v1539_v55, 920167782  ;;  %v1556_v44 = vsel %vm1546_vm10, %v1542_v19, 1326507024 }
 0x1cf   : > { %v878_v0 = vmul.f32 %v877_v58, %v5818_v41  ;;  %v887_v51 = vxor.u32 2147483648, %v870_v26  ;;  %v1922_v11 = vshll.u32 %v5870_v38, 30  ;;  %v1555_v16 = vsel %vm1543_vm13, %v5853_v62, %v5858_v3 }
 0x1d0   : > { %vm883_vm0 = vcmp.eq.s32.totalorder %v5831_v5, 0  ;;  %vm886_vm2 = vcmp.eq.s32.totalorder %v5831_v5, 2  ;;  %v1557_v22 = vsel %vm1545_vm1, %v1539_v55, %v1556_v44  ;;  %v5888_v56 = vshll.u32 %v1519_v34, 8 }
 0x1d1   : > { %v884_v46 = vxor.u32 2147483648, %v878_v0  ;;  %v1923_v9 = vsub.s32 %v1919_v49, %v1922_v11  ;;  %v1551_v41 = vsel %vm1543_vm13, %v1530_v6, %v5853_v62  ;;  %v1553_v7 = vsel %vm1545_vm1, %v5858_v3, %v1552_v13 }
 0x1d2   : > { %v888_v63 = vsel %vm886_vm2, %v887_v51, %v878_v0  ;;  %v2912_v21 = vsel %vm2910_vm7, %v887_v51, %v878_v0  ;;  %v1558_v52 = vsel %vm1544_vm15, %v1555_v16, %v1557_v22  ;;  %v1561_v34 = vshrl.u32 %v5888_v56, 16 }
 0x1d3   : > { %v885_v40 = vsel %vm883_vm0, %v870_v26, %v884_v46  ;;  %v2909_v54 = vsel %vm2907_vm8, %v870_v26, %v884_v46  ;;  %vm1924_vm3 = vcmp.lt.s32.totalorder %v1923_v9, 0  ;;  %v1925_v42 = vsub.s32 0, %v1923_v9 }
 0x1d4   : > { %v889_v43 = vsel %vm882_vm12, %v885_v40, %v888_v63  ;;  %v2913_v23 = vsel %vm2906_vm9, %v2909_v54, %v2912_v21  ;;  %v1560_v15 = vand.u32 65535, %v5888_v56  ;;  %v1562_v48 = vand.u32 65535, %v1558_v52 }
 0x1d5   : > { %v890_v8 = vsel %vm879_vm11, nan, %v889_v43  ;;  %v2914_v12 = vsel %vm879_vm11, nan, %v2913_v23  ;;  %v1926_v20 = vsel %vm1924_vm3, %v1925_v42, %v1923_v9  ;;  %v1554_v28 = vsel %vm1544_vm15, %v1551_v41, %v1553_v7  ;;  %v218_v7 = vpop.permute.xlu1 %217 }
 0x1d6   : > { %2289 = vst [vmem:[%s5118_s20 + $0x30] sm:$0xff] %v890_v8  ;;  %v1927_v4 = vclz %v1926_v20  ;;  %v1527_v5 = vshrl.u32 %v4716_v31, %v5829_v60  ;;  %v1563_v10 = vshrl.u32 %v1558_v52, 16  ;;  %v1566_v53 = vmul.u32 %v1562_v48, %v1561_v34 }
 0x1d7   : > { %4304 = vst [vmem:[%s5118_s20 + $0x38] sm:$0xff] %v2914_v12  ;;  %v1584_v25 = vand.u32 65535, %v1554_v28  ;;  %v1585_v27 = vshrl.u32 %v1554_v28, 16  ;;  %v1915_v14 = vadd.s32 %v5826_v29, %v5837_v61  ;;  %v1564_v57 = vmul.u32 %v1562_v48, %v1560_v15 }
 0x1d8   : > { %v4447_v49 = vadd.s32 4294967294, %v1927_v4  ;;  %v1565_v32 = vmul.u32 %v1563_v10, %v1560_v15  ;;  %v1547_v59 = vsel %vm1543_vm13, %v1527_v5, %v1530_v6  ;;  %v1548_v47 = vsel %vm1546_vm10, %v5858_v3, 2102212464 }
 0x1d9   : > { %v1567_v60 = vmul.u32 %v1563_v10, %v1561_v34  ;;  %v1570_v26 = vshll.u32 %v1566_v53, 16  ;;  %v1586_v44 = vmul.u32 %v1584_v25, %v1560_v15  ;;  %v1587_v0 = vmul.u32 %v1585_v27, %v1560_v15 }
 0x1da   : > { %vm4448_vm4 = vcmp.lt.s32.totalorder %v4447_v49, 0  ;;  %v1568_v55 = vshll.u32 %v1565_v32, 16  ;;  %v1569_v19 = vshrl.u32 %v1565_v32, 16  ;;  %v1588_v51 = vmul.u32 %v1584_v25, %v1561_v34 }
 0x1db   : > { %v1930_v50 = vsel %vm4448_vm4, 0, %v4447_v49  ;;  %v1590_v22 = vshll.u32 %v1587_v0, 16  ;;  %v1589_v3 = vmul.u32 %v1585_v27, %v1561_v34  ;;  %v1549_v52 = vsel %vm1545_vm1, %v5853_v62, %v1548_v47 }
 0x1dc   : > { %v1931_v58 = vsub.s32 32, %v1930_v50  ;;  %v1935_v13 = vsub.s32 4294967266, %v1930_v50  ;;  %v1932_v29 = vshll.u32 %v1923_v9, %v1930_v50  ;;  %vm1572_vm5 = vc.u32 %v1564_v57, %v1568_v55 }
 0x1dd   : > { %v1574_v61 = vadd.s32 %v1568_v55, %v1564_v57  ;;  %v1573_v6 = vsel %vm1572_vm5, 1, %v4722_v30  ;;  %v1592_v41 = vshll.u32 %v1588_v51, 16  ;;  %v1945_v40 = vsub.s32 4, %v5870_v38  ;;  %v254_v57 = vpop.permute.xlu2 %253 }
 0x1de   : > { %v1933_v11 = vshrl.u32 %v1915_v14, %v1931_v58  ;;  %v1936_v16 = vadd.s32 127, %v1935_v13  ;;  %v1575_v46 = vadd.s32 %v1573_v6, %v1567_v60  ;;  %vm1594_vm14 = vc.u32 %v1586_v44, %v1590_v22 }
 0x1df   : > { %vm1576_vm6 = vc.u32 %v1574_v61, %v1570_v26  ;;  %v1596_v42 = vadd.s32 %v1590_v22, %v1586_v44  ;;  %v1571_v23 = vshrl.u32 %v1566_v53, 16  ;;  %v1595_v15 = vsel %vm1594_vm14, 1, %v4722_v30 }
 0x1e0   : > { %v1934_v63 = vor.u32 %v1933_v11, %v1932_v29  ;;  %v1937_v21 = vshll.u32 %v1936_v16, 23  ;;  %v1577_v9 = vsel %vm1576_vm6, 1, %v4722_v30  ;;  %v5933_v34 = vmul.f32 %v4845_v17, %v218_v7 }
 0x1e1   : > { %v1579_v54 = vadd.s32 %v1577_v9, %v1575_v46  ;;  %v1591_v8 = vshrl.u32 %v1587_v0, 16  ;;  %v1597_v12 = vadd.s32 %v1595_v15, %v1589_v3  ;;  %vm1598_vm7 = vc.u32 %v1596_v42, %v1592_v41 }
 0x1e2   : > { %v1938_v43 = vor.u32 4788187, %v1937_v21  ;;  %v1941_v62 = vcvt.s32.f32 %v1934_v63  ;;  %v1599_v28 = vsel %vm1598_vm7, 1, %v4722_v30  ;;  %v1201_v4 = vand.u32 2147483647, %v5933_v34 }
 0x1e3   : > { %v1580_v48 = vadd.s32 %v1579_v54, %v1569_v19  ;;  %vm1823_vm8 = vcmp.lt.s32.totalorder %v5651_v36, 0  ;;  %v1593_v5 = vshrl.u32 %v1588_v51, 16  ;;  %v1601_v10 = vadd.s32 %v1599_v28, %v1597_v12 }
 0x1e4   : > { %v1939_v20 = vand.u32 2147483647, %v1938_v43  ;;  %v1204_v53 = vand.u32 2139095040, %v5933_v34  ;;  %v1946_v25 = vsel %vm1823_vm8, %v1945_v40, %v5870_v38  ;;  %v1600_v14 = vadd.s32 %v1596_v42, %v1592_v41 }
 0x1e5   : > { %v1581_v27 = vadd.s32 %v1580_v48, %v1571_v23  ;;  %v1550_v32 = vsel %vm1544_vm15, %v1547_v59, %v1549_v52  ;;  %v1602_v47 = vadd.s32 %v1601_v10, %v1591_v8  ;;  %vm1822_vm9 = vcmp.le.f32.partialorder %v1821_v2, 0.7853982 }
 0x1e6   : > { %v1942_v49 = vmul.f32 %v1941_v62, %v1939_v20  ;;  %v1205_v60 = vshrl.u32 %v1204_v53, 23  ;;  %v1208_v55 = vand.u32 8388607, %v1201_v4  ;;  %v1948_v19 = vsel %vm1822_vm9, 0, %v1946_v25 }
 0x1e7   : > { %v1603_v26 = vadd.s32 %v1602_v47, %v1593_v5  ;;  %v5949_v38 = vmul.f32 %v4845_v17, %v254_v57  ;;  %v1604_v1 = vmul.u32 %v5888_v56, %v1550_v32  ;;  %vm1606_vm10 = vc.u32 %v1581_v27, %v1600_v14 }
 0x1e8   : > { %v1943_v50 = vxor.u32 2147483648, %v1942_v49  ;;  %v4434_v58 = vadd.s32 4294967169, %v1205_v60  ;;  %v1965_v29 = vadd.s32 3, %v1948_v19  ;;  %v1209_v61 = vor.u32 8388608, %v1208_v55 }
 0x1e9   : > { %v1607_v44 = vadd.s32 1, %v1603_v26  ;;  %v2131_v11 = vand.u32 2147483647, %v5949_v38  ;;  %v2134_v16 = vand.u32 2139095040, %v5949_v38  ;;  %v5959_v52 = vand.u32 3, %v1948_v19 }
 0x1ea   : > { %v1944_v13 = vsel %vm1823_vm8, %v1943_v50, %v1942_v49  ;;  %v1211_v2 = vadd.s32 1, %v4434_v58  ;;  %v5957_v21 = vand.u32 3, %v1965_v29  ;;  %v5961_v9 = vshll.u32 %v1209_v61, 8 }
 0x1eb   : > { %v1947_v59 = vsel %vm1822_vm9, %v5651_v36, %v1944_v13  ;;  %v1608_v51 = vsel %vm1606_vm10, %v1607_v44, %v1603_v26  ;;  %v2135_v40 = vshrl.u32 %v2134_v16, 23  ;;  %v5965_v23 = vand.u32 8388607, %v2131_v11 }
 0x1ec   : > { %v1949_v0 = vmul.f32 %v1947_v59, %v1947_v59  ;;  %vm1212_vm11 = vcmp.gt.s32.totalorder %v1211_v2, 0  ;;  %v1609_v46 = vadd.s32 %v1608_v51, %v1604_v1  ;;  %vm1513_vm13 = vcmp.lt.s32.totalorder %v5659_v24, 0 }
 0x1ed   : > { %v1213_v3 = vsel %vm1212_vm11, %v1211_v2, 0  ;;  %vm1968_vm1 = vcmp.eq.s32.totalorder %v5957_v21, 0  ;;  %vm1971_vm12 = vcmp.eq.s32.totalorder %v5957_v21, 2  ;;  %vm3985_vm15 = vcmp.eq.s32.totalorder %v5959_v52, 0 }
 0x1ee   : > { %v1950_v6 = vmul.f32 -0.001358992, %v1949_v0  ;;  %v1957_v22 = vmul.f32 -0.00019511016, %v1949_v0  ;;  %v1215_v41 = vand.u32 31, %v1213_v3  ;;  %v1610_v63 = vadd.s32 536870912, %v1609_v46 }
 0x1ef   : > { %vm3988_vm0 = vcmp.eq.s32.totalorder %v5959_v52, 2  ;;  %v5974_v20 = vadd.s32 %v1600_v14, %v1581_v27  ;;  %v5977_v62 = vand.u32 65535, %v5961_v9  ;;  %v5980_v28 = vshrl.u32 %v5961_v9, 16 }
 0x1f0   : > { %v1951_v56 = vadd.f32 0.041655596, %v1950_v6  ;;  %v1958_v7 = vadd.f32 0.008332121, %v1957_v22  ;;  %v1611_v43 = vshrl.u32 %v1610_v63, 30  ;;  %v5967_v15 = vsub.s32 32, %v1215_v41 }
 0x1f1   : > { %v5982_v5 = vadd.s32 4294967169, %v2135_v40  ;;  %vm1967_vm2 = vcmp.lt.s32.totalorder %v5957_v21, 2  ;;  %vm3984_vm3 = vcmp.lt.s32.totalorder %v5959_v52, 2  ;;  %v2139_v25 = vor.u32 8388608, %v5965_v23 }
 0x1f2   : > { %v1952_v54 = vmul.f32 %v1951_v56, %v1949_v0  ;;  %v1959_v42 = vmul.f32 %v1958_v7, %v1949_v0  ;;  %v1612_v12 = vshll.u32 %v1611_v43, 30  ;;  %vm1964_vm4 = vweird.f32 %v5651_v36 }
 0x1f3   : > { %v1218_v27 = vshll.u32 %v4716_v31, %v1215_v41  ;;  %v1219_v14 = vshrl.u32 %v4717_v33, %v5967_v15  ;;  %v1222_v57 = vshrl.u32 %v4718_v35, %v5967_v15  ;;  %v1225_v32 = vshrl.u32 %v4719_v37, %v5967_v15 }
 0x1f4   : > { %v1953_v48 = vadd.f32 -0.4999988, %v1952_v54  ;;  %v1960_v8 = vadd.f32 -0.16666654, %v1959_v42  ;;  %v5986_v49 = vsub.s32 %v1609_v46, %v1612_v12  ;;  %v1635_v55 = vsub.s32 4, %v1611_v43 }
 0x1f5   : > { %v1221_v19 = vshll.u32 %v4717_v33, %v1215_v41  ;;  %v1228_v26 = vshrl.u32 %v4720_v39, %v5967_v15  ;;  %v1231_v58 = vshrl.u32 %v4721_v45, %v5967_v15  ;;  %v1224_v2 = vshll.u32 %v4718_v35, %v1215_v41 }
 0x1f6   : > { %v1954_v10 = vmul.f32 %v1953_v48, %v1949_v0  ;;  %v1961_v53 = vmul.f32 %v1960_v8, %v1949_v0  ;;  %vm1614_vm5 = vcmp.lt.s32.totalorder %v5986_v49, 0  ;;  %v1615_v50 = vsub.s32 0, %v5986_v49 }
 0x1f7   : > { %vm6008_vm6 = vcmp.le.f32.partialorder %v1511_v18, 0.7853982  ;;  %v6012_v61 = vshrl.u32 %v1213_v3, 5  ;;  %v1227_v51 = vshll.u32 %v4719_v37, %v1215_v41  ;;  %v1230_v16 = vshll.u32 %v4720_v39, %v1215_v41 }
 0x1f8   : > { %v1955_v47 = vadd.f32 1.0, %v1954_v10  ;;  %v1962_v60 = vadd.f32 1.0, %v1961_v53  ;;  %v1616_v44 = vsel %vm1614_vm5, %v1615_v50, %v5986_v49  ;;  %v1223_v22 = vor.u32 %v1222_v57, %v1221_v19 }
 0x1f9   : > { %v1617_v29 = vclz %v1616_v44  ;;  %v1226_v46 = vor.u32 %v1225_v32, %v1224_v2  ;;  %v1636_v7 = vsel %vm1513_vm13, %v1635_v55, %v1611_v43  ;;  %v1229_v18 = vor.u32 %v1228_v26, %v1227_v51 }
 0x1fa   : > { %v1963_v13 = vmul.f32 %v1962_v60, %v1947_v59  ;;  %v1972_v1 = vxor.u32 2147483648, %v1955_v47  ;;  %v1220_v59 = vor.u32 %v1219_v14, %v1218_v27  ;;  %v1232_v63 = vor.u32 %v1231_v58, %v1230_v16 }
 0x1fb   : > { %v4441_v56 = vadd.s32 4294967294, %v1617_v29  ;;  %vm1233_vm7 = vcmp.lt.s32.totalorder %v6012_v61, 1  ;;  %vm1234_vm8 = vcmp.lt.s32.totalorder %v6012_v61, 2  ;;  %vm1235_vm9 = vcmp.lt.s32.totalorder %v6012_v61, 3 }
 0x1fc   : > { %v1969_v6 = vxor.u32 2147483648, %v1963_v13  ;;  %v1973_v3 = vsel %vm1971_vm12, %v1972_v1, %v1963_v13  ;;  %v3990_v54 = vsel %vm3988_vm0, %v1972_v1, %v1963_v13  ;;  %vm1236_vm10 = vcmp.lt.s32.totalorder %v6012_v61, 4 }
 0x1fd   : > { %vm4442_vm14 = vcmp.lt.s32.totalorder %v4441_v56, 0  ;;  %v1241_v52 = vsel %vm1233_vm7, %v1220_v59, %v1223_v22  ;;  %v1242_v36 = vsel %vm1236_vm10, %v1229_v18, 920167782  ;;  %v1245_v27 = vsel %vm1233_vm7, %v1223_v22, %v1226_v46 }
 0x1fe   : > { %v1970_v40 = vsel %vm1968_vm1, %v1955_v47, %v1969_v6  ;;  %v3987_v41 = vsel %vm3985_vm15, %v1955_v47, %v1969_v6  ;;  %v1620_v12 = vsel %vm4442_vm14, 0, %v4441_v56  ;;  %v1243_v32 = vsel %vm1235_vm9, %v1226_v46, %v1242_v36 }
 0x1ff   : > { %v1974_v42 = vsel %vm1967_vm2, %v1970_v40, %v1973_v3  ;;  %v3991_v43 = vsel %vm3984_vm3, %v3987_v41, %v3990_v54  ;;  %v1621_v10 = vsub.s32 32, %v1620_v12  ;;  %v1625_v53 = vsub.s32 4294967266, %v1620_v12 }
 0x200   : > { %v1975_v48 = vsel %vm1964_vm4, nan, %v1974_v42  ;;  %v3992_v8 = vsel %vm1964_vm4, nan, %v3991_v43  ;;  %v1622_v21 = vshll.u32 %v5986_v49, %v1620_v12  ;;  %v1246_v47 = vsel %vm1236_vm10, %v1232_v63, 1326507024 }
 0x201   : > { %2296 = vst [vmem:[%s5118_s20 + $0xa0] sm:$0xff] %v1975_v48  ;;  %v1623_v14 = vshrl.u32 %v5974_v20, %v1621_v10  ;;  %v1626_v57 = vadd.s32 127, %v1625_v53  ;;  %v1638_v49 = vsel %vm6008_vm6, 0, %v1636_v7  ;;  %v1217_v60 = vshrl.u32 %v4716_v31, %v5967_v15 }
 0x202   : > { %4311 = vst [vmem:[%s5118_s20 + $0xa8] sm:$0xff] %v3992_v8  ;;  %v1244_v50 = vsel %vm1234_vm8, %v1241_v52, %v1243_v32  ;;  %v1247_v55 = vsel %vm1235_vm9, %v1229_v18, %v1246_v47  ;;  %v1238_v13 = vsel %vm1236_vm10, %v1226_v46, 2102212464  ;;  %v1655_v15 = vadd.s32 3, %v1638_v49 }
 0x203   : > { %v1624_v20 = vor.u32 %v1623_v14, %v1622_v21  ;;  %v1627_v19 = vshll.u32 %v1626_v57, 23  ;;  %v1248_v26 = vsel %vm1234_vm8, %v1245_v27, %v1247_v55  ;;  %v1274_v58 = vand.u32 65535, %v1244_v50 }
 0x204   : > { %v1252_v1 = vand.u32 65535, %v1248_v26  ;;  %v1253_v44 = vshrl.u32 %v1248_v26, 16  ;;  %v1275_v2 = vshrl.u32 %v1244_v50, 16  ;;  %v2141_v16 = vadd.s32 1, %v5982_v5 }
 0x205   : > { %v1628_v29 = vor.u32 4788187, %v1627_v19  ;;  %v1278_v51 = vmul.u32 %v1274_v58, %v5980_v28  ;;  %v6066_v6 = vand.u32 3, %v1638_v49  ;;  %v1237_v56 = vsel %vm1233_vm7, %v1217_v60, %v1220_v59 }
 0x206   : > { %v1255_v7 = vmul.u32 %v1253_v44, %v5977_v62  ;;  %v1256_v18 = vmul.u32 %v1252_v1, %v5980_v28  ;;  %v1631_v46 = vcvt.s32.f32 %v1624_v20  ;;  %v1239_v40 = vsel %vm1235_vm9, %v1223_v22, %v1238_v13 }
 0x207   : > { %v1629_v63 = vand.u32 2147483647, %v1628_v29  ;;  %v1277_v3 = vmul.u32 %v1275_v2, %v5977_v62  ;;  %v1254_v41 = vmul.u32 %v1252_v1, %v5977_v62  ;;  %v1257_v5 = vmul.u32 %v1253_v44, %v5980_v28 }
 0x208   : > { %v1258_v54 = vshll.u32 %v1255_v7, 16  ;;  %v1276_v42 = vmul.u32 %v1274_v58, %v5977_v62  ;;  %v1279_v59 = vmul.u32 %v1275_v2, %v5980_v28  ;;  %v1282_v8 = vshll.u32 %v1278_v51, 16 }
 0x209   : > { %v1632_v43 = vmul.f32 %v1631_v46, %v1629_v63  ;;  %v1280_v48 = vshll.u32 %v1277_v3, 16  ;;  %v1260_v12 = vshll.u32 %v1256_v18, 16  ;;  %vm2142_vm1 = vcmp.gt.s32.totalorder %v2141_v16, 0 }
 0x20a   : > { %vm1262_vm11 = vc.u32 %v1254_v41, %v1258_v54  ;;  %v1264_v10 = vadd.s32 %v1258_v54, %v1254_v41  ;;  %v2143_v27 = vsel %vm2142_vm1, %v2141_v16, 0  ;;  %v1259_v32 = vshrl.u32 %v1255_v7, 16 }
 0x20b   : > { %v1633_v53 = vxor.u32 2147483648, %v1632_v43  ;;  %v1263_v22 = vsel %vm1262_vm11, 1, %v4722_v30  ;;  %vm1284_vm12 = vc.u32 %v1276_v42, %v1280_v48  ;;  %v1286_v21 = vadd.s32 %v1280_v48, %v1276_v42 }
 0x20c   : > { %v1265_v52 = vadd.s32 %v1263_v22, %v1257_v5  ;;  %vm1266_vm15 = vc.u32 %v1264_v10, %v1260_v12  ;;  %v1285_v36 = vsel %vm1284_vm12, 1, %v4722_v30  ;;  %v1281_v50 = vshrl.u32 %v1277_v3, 16 }
 0x20d   : > { %v1634_v62 = vsel %vm1513_vm13, %v1633_v53, %v1632_v43  ;;  %v1267_v28 = vsel %vm1266_vm15, 1, %v4722_v30  ;;  %v1287_v14 = vadd.s32 %v1285_v36, %v1279_v59  ;;  %vm1288_vm0 = vc.u32 %v1286_v21, %v1282_v8 }
 0x20e   : > { %v6087_v57 = vsel %vm6008_vm6, %v5659_v24, %v1634_v62  ;;  %v1269_v47 = vadd.s32 %v1267_v28, %v1265_v52  ;;  %v1289_v49 = vsel %vm1288_vm0, 1, %v4722_v30  ;;  %v2145_v20 = vand.u32 31, %v2143_v27 }
 0x20f   : > { %v1639_v60 = vmul.f32 %v6087_v57, %v6087_v57  ;;  %v1291_v55 = vadd.s32 %v1289_v49, %v1287_v14  ;;  %v6092_v19 = vand.u32 3, %v1655_v15  ;;  %v1261_v26 = vshrl.u32 %v1256_v18, 16 }
 0x210   : > { %v1270_v58 = vadd.s32 %v1269_v47, %v1259_v32  ;;  %v1283_v13 = vshrl.u32 %v1278_v51, 16  ;;  %v6094_v2 = vsub.s32 32, %v2145_v20  ;;  %v1240_v29 = vsel %vm1234_vm8, %v1237_v56, %v1239_v40 }
 0x211   : > { %v1640_v1 = vmul.f32 -0.001358992, %v1639_v60  ;;  %v1647_v44 = vmul.f32 -0.00019511016, %v1639_v60  ;;  %v1292_v0 = vadd.s32 %v1291_v55, %v1281_v50  ;;  %v6100_v7 = vadd.s32 %v1286_v21, %v1282_v8 }
 0x212   : > { %v6098_v16 = vadd.s32 %v1270_v58, %v1261_v26  ;;  %v2148_v63 = vshll.u32 %v4716_v31, %v2145_v20  ;;  %v2151_v18 = vshll.u32 %v4717_v33, %v2145_v20  ;;  %v2149_v51 = vshrl.u32 %v4717_v33, %v6094_v2 }
 0x213   : > { %v1641_v46 = vadd.f32 0.041655596, %v1640_v1  ;;  %v1648_v15 = vadd.f32 0.008332121, %v1647_v44  ;;  %v1293_v3 = vadd.s32 %v1292_v0, %v1283_v13  ;;  %v2152_v61 = vshrl.u32 %v4718_v35, %v6094_v2 }
 0x214   : > { %vm1296_vm13 = vc.u32 %v6098_v16, %v6100_v7  ;;  %v2154_v56 = vshll.u32 %v4718_v35, %v2145_v20  ;;  %v2155_v54 = vshrl.u32 %v4719_v37, %v6094_v2  ;;  %v1294_v42 = vmul.u32 %v5961_v9, %v1240_v29 }
 0x215   : > { %v1642_v40 = vmul.f32 %v1641_v46, %v1639_v60  ;;  %v1649_v41 = vmul.f32 %v1648_v15, %v1639_v60  ;;  %v1297_v5 = vadd.s32 1, %v1293_v3  ;;  %v6114_v43 = vshrl.u32 %v2143_v27, 5 }
 0x216   : > { %v2157_v59 = vshll.u32 %v4719_v37, %v2145_v20  ;;  %v2158_v48 = vshrl.u32 %v4720_v39, %v6094_v2  ;;  %v6119_v53 = vor.u32 %v2149_v51, %v2148_v63  ;;  %vm3677_vm2 = vcmp.eq.s32.totalorder %v6066_v6, 0 }
 0x217   : > { %v1643_v8 = vadd.f32 -0.4999988, %v1642_v40  ;;  %v1650_v12 = vadd.f32 -0.16666654, %v1649_v41  ;;  %v1298_v10 = vsel %vm1296_vm13, %v1297_v5, %v1293_v3  ;;  %vm3680_vm3 = vcmp.eq.s32.totalorder %v6066_v6, 2 }
 0x218   : > { %v1299_v22 = vadd.s32 %v1298_v10, %v1294_v42  ;;  %v2159_v21 = vor.u32 %v2158_v48, %v2157_v59  ;;  %v2160_v9 = vshll.u32 %v4720_v39, %v2145_v20  ;;  %v2161_v52 = vshrl.u32 %v4721_v45, %v6094_v2 }
 0x219   : > { %v1644_v36 = vmul.f32 %v1643_v8, %v1639_v60  ;;  %v1651_v27 = vmul.f32 %v1650_v12, %v1639_v60  ;;  %vm3676_vm4 = vcmp.lt.s32.totalorder %v6066_v6, 2  ;;  %v6127_v62 = vor.u32 %v2152_v61, %v2151_v18 }
 0x21a   : > { %v2156_v28 = vor.u32 %v2155_v54, %v2154_v56  ;;  %vm1654_vm5 = vweird.f32 %v5659_v24  ;;  %v1300_v14 = vadd.s32 536870912, %v1299_v22  ;;  %vm2163_vm6 = vcmp.lt.s32.totalorder %v6114_v43, 1 }
 0x21b   : > { %vm2165_vm14 = vcmp.lt.s32.totalorder %v6114_v43, 3  ;;  %vm2166_vm7 = vcmp.lt.s32.totalorder %v6114_v43, 4  ;;  %v1645_v32 = vadd.f32 1.0, %v1644_v36  ;;  %v1652_v47 = vadd.f32 1.0, %v1651_v27 }
 0x21c   : > { %v2162_v49 = vor.u32 %v2161_v52, %v2160_v9  ;;  %v6135_v60 = vshll.u32 %v2139_v25, 8  ;;  %vm1657_vm8 = vcmp.lt.s32.totalorder %v6092_v19, 2  ;;  %v6138_v50 = vshrl.u32 %v1300_v14, 30 }
 0x21d   : > { %vm2164_vm9 = vcmp.lt.s32.totalorder %v6114_v43, 2  ;;  %v2172_v55 = vsel %vm2166_vm7, %v2159_v21, 920167782  ;;  %v1653_v20 = vmul.f32 %v1652_v47, %v6087_v57  ;;  %v1662_v26 = vxor.u32 2147483648, %v1645_v32 }
 0x21e   : > { %v2171_v58 = vsel %vm2163_vm6, %v6119_v53, %v6127_v62  ;;  %v2173_v23 = vsel %vm2165_vm14, %v2156_v28, %v2172_v55  ;;  %vm1658_vm10 = vcmp.eq.s32.totalorder %v6092_v19, 0  ;;  %vm1661_vm11 = vcmp.eq.s32.totalorder %v6092_v19, 2 }
 0x21f   : > { %v1302_v25 = vshll.u32 %v6138_v50, 30  ;;  %v2175_v13 = vsel %vm2163_vm6, %v6127_v62, %v2156_v28  ;;  %v1659_v57 = vxor.u32 2147483648, %v1653_v20  ;;  %v2176_v1 = vsel %vm2166_vm7, %v2162_v49, 1326507024 }
 0x220   : > { %v2180_v44 = vand.u32 65535, %v6135_v60  ;;  %v2181_v0 = vshrl.u32 %v6135_v60, 16  ;;  %v1663_v29 = vsel %vm1661_vm11, %v1662_v26, %v1653_v20  ;;  %v2174_v46 = vsel %vm2164_vm9, %v2171_v58, %v2173_v23 }
 0x221   : > { %v1303_v63 = vsub.s32 %v1299_v22, %v1302_v25  ;;  %v2177_v15 = vsel %vm2165_vm14, %v2159_v21, %v2176_v1  ;;  %v1660_v3 = vsel %vm1658_vm10, %v1645_v32, %v1659_v57  ;;  %v3679_v18 = vsel %vm3677_vm2, %v1645_v32, %v1659_v57 }
 0x222   : > { %v3682_v51 = vsel %vm3680_vm3, %v1662_v26, %v1653_v20  ;;  %v2178_v61 = vsel %vm2164_vm9, %v2175_v13, %v2177_v15  ;;  %v1664_v56 = vsel %vm1657_vm8, %v1660_v3, %v1663_v29  ;;  %v2204_v12 = vand.u32 65535, %v2174_v46  ;;  %v236_v26 = vpop.permute.xlu1 %235 }
 0x223   : > { %v3683_v40 = vsel %vm3676_vm4, %v3679_v18, %v3682_v51  ;;  %vm1304_vm1 = vcmp.lt.s32.totalorder %v1303_v63, 0  ;;  %v1305_v41 = vsub.s32 0, %v1303_v63  ;;  %v1665_v5 = vsel %vm1654_vm5, nan, %v1664_v56 }
 0x224   : > { %v3684_v54 = vsel %vm1654_vm5, nan, %v3683_v40  ;;  %2294 = vst [vmem:[%s5118_s20 + $0x80] sm:$0xff] %v1665_v5  ;;  %v2182_v59 = vand.u32 65535, %v2178_v61  ;;  %v2183_v48 = vshrl.u32 %v2178_v61, 16  ;;  %v2205_v19 = vshrl.u32 %v2174_v46, 16 }
 0x225   : > { %v1306_v42 = vsel %vm1304_vm1, %v1305_v41, %v1303_v63  ;;  %4309 = vst [vmem:[%s5118_s20 + $0x88] sm:$0xff] %v3684_v54  ;;  %v2147_v9 = vshrl.u32 %v4716_v31, %v6094_v2  ;;  %v1295_v52 = vadd.s32 %v6100_v7, %v6098_v16  ;;  %v2168_v14 = vsel %vm2166_vm7, %v2156_v28, 2102212464 }
 0x226   : > { %v1307_v8 = vclz %v1306_v42  ;;  %v2184_v10 = vmul.u32 %v2182_v59, %v2180_v44  ;;  %v2185_v22 = vmul.u32 %v2183_v48, %v2180_v44  ;;  %v2186_v6 = vmul.u32 %v2182_v59, %v2181_v0 }
 0x227   : > { %v2187_v24 = vmul.u32 %v2183_v48, %v2181_v0  ;;  %v2206_v32 = vmul.u32 %v2204_v12, %v2180_v44  ;;  %v2207_v47 = vmul.u32 %v2205_v19, %v2180_v44  ;;  %v2208_v20 = vmul.u32 %v2204_v12, %v2181_v0 }
 0x228   : > { %v4435_v21 = vadd.s32 4294967294, %v1307_v8  ;;  %v2188_v36 = vshll.u32 %v2185_v22, 16  ;;  %v2190_v27 = vshll.u32 %v2186_v6, 16  ;;  %vm1203_vm0 = vcmp.lt.s32.totalorder %v5933_v34, 0 }
 0x229   : > { %v2189_v23 = vshrl.u32 %v2185_v22, 16  ;;  %v2209_v25 = vmul.u32 %v2205_v19, %v2181_v0  ;;  %v2210_v13 = vshll.u32 %v2207_v47, 16  ;;  %v1325_v29 = vsub.s32 4, %v6138_v50 }
 0x22a   : > { %vm4436_vm12 = vcmp.lt.s32.totalorder %v4435_v21, 0  ;;  %vm2192_vm15 = vc.u32 %v2184_v10, %v2188_v36  ;;  %v2194_v55 = vadd.s32 %v2188_v36, %v2184_v10  ;;  %v2212_v15 = vshll.u32 %v2208_v20, 16  ;;  %v248_v12 = vpop.permute.xlu1 %247 }
 0x22b   : > { %v1310_v49 = vsel %vm4436_vm12, 0, %v4435_v21  ;;  %v2193_v16 = vsel %vm2192_vm15, 1, %v4722_v30  ;;  %vm2214_vm2 = vc.u32 %v2206_v32, %v2210_v13  ;;  %v2216_v61 = vadd.s32 %v2210_v13, %v2206_v32 }
 0x22c   : > { %v1311_v2 = vsub.s32 32, %v1310_v49  ;;  %v1315_v58 = vsub.s32 4294967266, %v1310_v49  ;;  %v2195_v7 = vadd.s32 %v2193_v16, %v2187_v24  ;;  %vm2196_vm13 = vc.u32 %v2194_v55, %v2190_v27 }
 0x22d   : > { %v1312_v57 = vshll.u32 %v1303_v63, %v1310_v49  ;;  %v2197_v44 = vsel %vm2196_vm13, 1, %v4722_v30  ;;  %v2215_v51 = vsel %vm2214_vm2, 1, %v4722_v30  ;;  %v2191_v56 = vshrl.u32 %v2186_v6, 16 }
 0x22e   : > { %v1313_v28 = vshrl.u32 %v1295_v52, %v1311_v2  ;;  %v1316_v1 = vadd.s32 127, %v1315_v58  ;;  %v2199_v46 = vadd.s32 %v2197_v44, %v2195_v7  ;;  %v2217_v41 = vadd.s32 %v2215_v51, %v2209_v25 }
 0x22f   : > { %v6192_v0 = vmul.f32 %v4845_v17, %v236_v26  ;;  %v2167_v5 = vsel %vm2163_vm6, %v2147_v9, %v6119_v53  ;;  %v2211_v54 = vshrl.u32 %v2207_v47, 16  ;;  %vm2218_vm3 = vc.u32 %v2216_v61, %v2212_v15 }
 0x230   : > { %v1314_v3 = vor.u32 %v1313_v28, %v1312_v57  ;;  %v1317_v18 = vshll.u32 %v1316_v1, 23  ;;  %v2200_v40 = vadd.s32 %v2199_v46, %v2189_v23  ;;  %v2169_v42 = vsel %vm2165_vm14, %v6127_v62, %v2168_v14 }
 0x231   : > { %v2213_v59 = vshrl.u32 %v2208_v20, 16  ;;  %v2219_v48 = vsel %vm2218_vm3, 1, %v4722_v30  ;;  %v1666_v8 = vand.u32 2147483647, %v6192_v0  ;;  %v1669_v6 = vand.u32 2139095040, %v6192_v0 }
 0x232   : > { %v1318_v63 = vor.u32 4788187, %v1317_v18  ;;  %v1321_v10 = vcvt.s32.f32 %v1314_v3  ;;  %v2221_v22 = vadd.s32 %v2219_v48, %v2217_v41  ;;  %v1326_v53 = vsel %vm1203_vm0, %v1325_v29, %v6138_v50 }
 0x233   : > { %v2201_v21 = vadd.s32 %v2200_v40, %v2191_v56  ;;  %v2220_v9 = vadd.s32 %v2216_v61, %v2212_v15  ;;  %v1670_v62 = vshrl.u32 %v1669_v6, 23  ;;  %v6207_v36 = vmul.f32 %v4845_v17, %v248_v12 }
 0x234   : > { %v1319_v19 = vand.u32 2147483647, %v1318_v63  ;;  %v2222_v24 = vadd.s32 %v2221_v22, %v2211_v54  ;;  %vm1202_vm4 = vcmp.le.f32.partialorder %v1201_v4, 0.7853982  ;;  %v2170_v27 = vsel %vm2164_vm9, %v2167_v5, %v2169_v42 }
 0x235   : > { %v1673_v14 = vand.u32 8388607, %v1666_v8  ;;  %v1328_v47 = vsel %vm1202_vm4, 0, %v1326_v53  ;;  %v4443_v49 = vadd.s32 4294967169, %v1670_v62  ;;  %vm2226_vm5 = vc.u32 %v2201_v21, %v2220_v9 }
 0x236   : > { %v1322_v52 = vmul.f32 %v1321_v10, %v1319_v19  ;;  %v2223_v50 = vadd.s32 %v2222_v24, %v2213_v59  ;;  %v1979_v55 = vand.u32 2139095040, %v6207_v36  ;;  %v1345_v2 = vadd.s32 3, %v1328_v47 }
 0x237   : > { %v1676_v26 = vadd.s32 1, %v4443_v49  ;;  %v2224_v43 = vmul.u32 %v6135_v60, %v2170_v27  ;;  %v1674_v58 = vor.u32 8388608, %v1673_v14  ;;  %v6220_v1 = vand.u32 3, %v1328_v47 }
 0x238   : > { %v1323_v32 = vxor.u32 2147483648, %v1322_v52  ;;  %v2227_v20 = vadd.s32 1, %v2223_v50  ;;  %v1980_v13 = vshrl.u32 %v1979_v55, 23  ;;  %v6222_v44 = vand.u32 3, %v1345_v2 }
 0x239   : > { %vm1677_vm6 = vcmp.gt.s32.totalorder %v1676_v26, 0  ;;  %v6224_v15 = vshll.u32 %v1674_v58, 8  ;;  %v1976_v60 = vand.u32 2147483647, %v6207_v36  ;;  %vm6229_vm14 = vcmp.le.f32.partialorder %v2131_v11, 0.7853982 }
 0x23a   : > { %v1324_v17 = vsel %vm1203_vm0, %v1323_v32, %v1322_v52  ;;  %v2228_v16 = vsel %vm2226_vm5, %v2227_v20, %v2223_v50  ;;  %v1678_v25 = vsel %vm1677_vm6, %v1676_v26, 0  ;;  %v4449_v61 = vadd.s32 4294967169, %v1980_v13 }
 0x23b   : > { %v1327_v4 = vsel %vm1202_vm4, %v5933_v34, %v1324_v17  ;;  %v2229_v7 = vadd.s32 %v2228_v16, %v2224_v43  ;;  %v1680_v46 = vand.u32 31, %v1678_v25  ;;  %vm2133_vm7 = vcmp.lt.s32.totalorder %v5949_v38, 0 }
 0x23c   : > { %v1329_v23 = vmul.f32 %v1327_v4, %v1327_v4  ;;  %v6235_v54 = vand.u32 65535, %v6224_v15  ;;  %vm1351_vm8 = vcmp.eq.s32.totalorder %v6222_v44, 2  ;;  %vm3372_vm9 = vcmp.eq.s32.totalorder %v6220_v1, 2 }
 0x23d   : > { %v2230_v29 = vadd.s32 536870912, %v2229_v7  ;;  %v1681_v5 = vsub.s32 32, %v1680_v46  ;;  %v2225_v48 = vadd.s32 %v2220_v9, %v2201_v21  ;;  %v6241_v11 = vand.u32 8388607, %v1976_v60 }
 0x23e   : > { %v1330_v57 = vmul.f32 -0.001358992, %v1329_v23  ;;  %v1337_v28 = vmul.f32 -0.00019511016, %v1329_v23  ;;  %vm1348_vm10 = vcmp.eq.s32.totalorder %v6222_v44, 0  ;;  %vm3369_vm11 = vcmp.eq.s32.totalorder %v6220_v1, 0 }
 0x23f   : > { %v2231_v51 = vshrl.u32 %v2230_v29, 30  ;;  %v6247_v10 = vshrl.u32 %v1678_v25, 5  ;;  %v6249_v22 = vadd.s32 1, %v4449_v61  ;;  %vm1347_vm1 = vcmp.lt.s32.totalorder %v6222_v44, 2 }
 0x240   : > { %v1331_v3 = vadd.f32 0.041655596, %v1330_v57  ;;  %v1338_v18 = vadd.f32 0.008332121, %v1337_v28  ;;  %vm3368_vm12 = vcmp.lt.s32.totalorder %v6220_v1, 2  ;;  %v1683_v21 = vshll.u32 %v4716_v31, %v1680_v46 }
 0x241   : > { %v2232_v63 = vshll.u32 %v2231_v51, 30  ;;  %v2255_v19 = vsub.s32 4, %v2231_v51  ;;  %v1686_v9 = vshll.u32 %v4717_v33, %v1680_v46  ;;  %vm1344_vm15 = vweird.f32 %v5933_v34 }
 0x242   : > { %v1332_v56 = vmul.f32 %v1331_v3, %v1329_v23  ;;  %v1339_v40 = vmul.f32 %v1338_v18, %v1329_v23  ;;  %v1684_v24 = vshrl.u32 %v4717_v33, %v1681_v5  ;;  %v1687_v62 = vshrl.u32 %v4718_v35, %v1681_v5 }
 0x243   : > { %v6245_v12 = vsub.s32 %v2229_v7, %v2232_v63  ;;  %v1689_v32 = vshll.u32 %v4718_v35, %v1680_v46  ;;  %v1690_v47 = vshrl.u32 %v4719_v37, %v1681_v5  ;;  %v2256_v49 = vsel %vm2133_vm7, %v2255_v19, %v2231_v51 }
 0x244   : > { %v1333_v42 = vadd.f32 -0.4999988, %v1332_v56  ;;  %v1340_v59 = vadd.f32 -0.16666654, %v1339_v40  ;;  %v1693_v55 = vshrl.u32 %v4720_v39, %v1681_v5  ;;  %v1696_v17 = vshrl.u32 %v4721_v45, %v1681_v5 }
 0x245   : > { %vm2234_vm0 = vcmp.lt.s32.totalorder %v6245_v12, 0  ;;  %v2235_v52 = vsub.s32 0, %v6245_v12  ;;  %v1692_v43 = vshll.u32 %v4719_v37, %v1680_v46  ;;  %v1682_v58 = vshrl.u32 %v4716_v31, %v1681_v5 }
 0x246   : > { %v1334_v6 = vmul.f32 %v1333_v42, %v1329_v23  ;;  %v1341_v53 = vmul.f32 %v1340_v59, %v1329_v23  ;;  %v1685_v23 = vor.u32 %v1684_v24, %v1683_v21  ;;  %v1688_v16 = vor.u32 %v1687_v62, %v1686_v9 }
 0x247   : > { %v2236_v50 = vsel %vm2234_vm0, %v2235_v52, %v6245_v12  ;;  %v1695_v7 = vshll.u32 %v4720_v39, %v1680_v46  ;;  %v6272_v57 = vsel %vm6229_vm14, 0, %v2256_v49  ;;  %v1691_v28 = vor.u32 %v1690_v47, %v1689_v32 }
 0x248   : > { %v1335_v27 = vadd.f32 1.0, %v1334_v6  ;;  %v1342_v14 = vadd.f32 1.0, %v1341_v53  ;;  %v2237_v2 = vclz %v2236_v50  ;;  %v1694_v3 = vor.u32 %v1693_v55, %v1692_v43 }
 0x249   : > { %v1697_v18 = vor.u32 %v1696_v17, %v1695_v7  ;;  %vm1698_vm2 = vcmp.lt.s32.totalorder %v6247_v10, 1  ;;  %vm1699_vm3 = vcmp.lt.s32.totalorder %v6247_v10, 2  ;;  %vm1701_vm4 = vcmp.lt.s32.totalorder %v6247_v10, 4 }
 0x24a   : > { %v1343_v20 = vmul.f32 %v1342_v14, %v1327_v4  ;;  %v1352_v26 = vxor.u32 2147483648, %v1335_v27  ;;  %v4453_v13 = vadd.s32 4294967294, %v2237_v2  ;;  %vm1700_vm5 = vcmp.lt.s32.totalorder %v6247_v10, 3 }
 0x24b   : > { %v1706_v1 = vsel %vm1698_vm2, %v1685_v23, %v1688_v16  ;;  %v1707_v44 = vsel %vm1701_vm4, %v1694_v3, 920167782  ;;  %v1710_v34 = vsel %vm1698_vm2, %v1688_v16, %v1691_v28  ;;  %v1703_v9 = vsel %vm1701_vm4, %v1691_v28, 2102212464 }
 0x24c   : > { %v1349_v25 = vxor.u32 2147483648, %v1343_v20  ;;  %v1353_v4 = vsel %vm1351_vm8, %v1352_v26, %v1343_v20  ;;  %v3374_v29 = vsel %vm3372_vm9, %v1352_v26, %v1343_v20  ;;  %vm4454_vm13 = vcmp.lt.s32.totalorder %v4453_v13, 0 }
 0x24d   : > { %v2240_v40 = vsel %vm4454_vm13, 0, %v4453_v13  ;;  %v1708_v53 = vsel %vm1700_vm5, %v1691_v28, %v1707_v44  ;;  %v1711_v24 = vsel %vm1701_vm4, %v1697_v18, 1326507024  ;;  %v1716_v47 = vshrl.u32 %v6224_v15, 16 }
 0x24e   : > { %v1350_v51 = vsel %vm1348_vm10, %v1335_v27, %v1349_v25  ;;  %v3371_v46 = vsel %vm3369_vm11, %v1335_v27, %v1349_v25  ;;  %v2241_v42 = vsub.s32 32, %v2240_v40  ;;  %v2245_v59 = vsub.s32 4294967266, %v2240_v40 }
 0x24f   : > { %v1354_v61 = vsel %vm1347_vm1, %v1350_v51, %v1353_v4  ;;  %v3375_v56 = vsel %vm3368_vm12, %v3371_v46, %v3374_v29  ;;  %v2242_v19 = vshll.u32 %v6245_v12, %v2240_v40  ;;  %v1709_v52 = vsel %vm1699_vm3, %v1706_v1, %v1708_v53 }
 0x250   : > { %v1355_v63 = vsel %vm1344_vm15, nan, %v1354_v61  ;;  %v3376_v5 = vsel %vm1344_vm15, nan, %v3375_v56  ;;  %v2243_v6 = vshrl.u32 %v2225_v48, %v2241_v42  ;;  %v2246_v21 = vadd.s32 127, %v2245_v59 }
 0x251   : > { %2292 = vst [vmem:[%s5118_s20 + $0x60] sm:$0xff] %v1355_v63  ;;  %v1712_v27 = vsel %vm1700_vm5, %v1694_v3, %v1711_v24  ;;  %v1739_v14 = vand.u32 65535, %v1709_v52  ;;  %v1740_v32 = vshrl.u32 %v1709_v52, 16  ;;  %v1984_v50 = vor.u32 8388608, %v6241_v11 }
 0x252   : > { %4307 = vst [vmem:[%s5118_s20 + $0x68] sm:$0xff] %v3376_v5  ;;  %v2244_v62 = vor.u32 %v2243_v6, %v2242_v19  ;;  %v2247_v12 = vshll.u32 %v2246_v21, 23  ;;  %v1713_v48 = vsel %vm1699_vm3, %v1710_v34, %v1712_v27  ;;  %v2275_v49 = vadd.s32 3, %v6272_v57 }
 0x253   : > { %v1702_v55 = vsel %vm1698_vm2, %v1682_v58, %v1685_v23  ;;  %v1717_v17 = vand.u32 65535, %v1713_v48  ;;  %v1718_v20 = vshrl.u32 %v1713_v48, 16  ;;  %v1704_v2 = vsel %vm1700_vm5, %v1688_v16, %v1703_v9 }
 0x254   : > { %v2248_v26 = vor.u32 4788187, %v2247_v12  ;;  %v1742_v43 = vmul.u32 %v1740_v32, %v6235_v54  ;;  %v1743_v7 = vmul.u32 %v1739_v14, %v1716_v47  ;;  %v2251_v25 = vcvt.s32.f32 %v2244_v62 }
 0x255   : > { %v1720_v13 = vmul.u32 %v1718_v20, %v6235_v54  ;;  %v1721_v28 = vmul.u32 %v1717_v17, %v1716_v47  ;;  %vm1987_vm6 = vcmp.gt.s32.totalorder %v6249_v22, 0  ;;  %v1741_v29 = vmul.u32 %v1739_v14, %v6235_v54 }
 0x256   : > { %v2249_v4 = vand.u32 2147483647, %v2248_v26  ;;  %v1744_v3 = vmul.u32 %v1740_v32, %v1716_v47  ;;  %v1745_v58 = vshll.u32 %v1742_v43, 16  ;;  %v1719_v23 = vmul.u32 %v1717_v17, %v6235_v54 }
 0x257   : > { %v1722_v18 = vmul.u32 %v1718_v20, %v1716_v47  ;;  %v1723_v51 = vshll.u32 %v1720_v13, 16  ;;  %v1747_v46 = vshll.u32 %v1743_v7, 16  ;;  %v1725_v61 = vshll.u32 %v1721_v28, 16 }
 0x258   : > { %v2252_v16 = vmul.f32 %v2251_v25, %v2249_v4  ;;  %vm1749_vm8 = vc.u32 %v1741_v29, %v1745_v58  ;;  %v1751_v56 = vadd.s32 %v1745_v58, %v1741_v29  ;;  %v1988_v5 = vsel %vm1987_vm6, %v6249_v22, 0 }
 0x259   : > { %vm1727_vm9 = vc.u32 %v1719_v23, %v1723_v51  ;;  %v1729_v40 = vadd.s32 %v1723_v51, %v1719_v23  ;;  %v1750_v63 = vsel %vm1749_vm8, 1, %v4722_v30  ;;  %v1705_v54 = vsel %vm1699_vm3, %v1702_v55, %v1704_v2 }
 0x25a   : > { %v2253_v42 = vxor.u32 2147483648, %v2252_v16  ;;  %v1728_v59 = vsel %vm1727_vm9, 1, %v4722_v30  ;;  %v1752_v1 = vadd.s32 %v1750_v63, %v1744_v3  ;;  %vm1753_vm10 = vc.u32 %v1751_v56, %v1747_v46 }
 0x25b   : > { %v1730_v44 = vadd.s32 %v1728_v59, %v1722_v18  ;;  %vm1731_vm11 = vc.u32 %v1729_v40, %v1725_v61  ;;  %v1754_v19 = vsel %vm1753_vm10, 1, %v4722_v30  ;;  %v1746_v34 = vshrl.u32 %v1742_v43, 16 }
 0x25c   : > { %v2254_v6 = vsel %vm2133_vm7, %v2253_v42, %v2252_v16  ;;  %v1732_v53 = vsel %vm1731_vm11, 1, %v4722_v30  ;;  %v1756_v21 = vadd.s32 %v1754_v19, %v1752_v1  ;;  %v1724_v9 = vshrl.u32 %v1720_v13, 16 }
 0x25d   : > { %v2257_v22 = vsel %vm6229_vm14, %v5949_v38, %v2254_v6  ;;  %v1734_v52 = vadd.s32 %v1732_v53, %v1730_v44  ;;  %v1990_v24 = vand.u32 31, %v1988_v5  ;;  %v6336_v62 = vand.u32 3, %v6272_v57 }
 0x25e   : > { %v2259_v10 = vmul.f32 %v2257_v22, %v2257_v22  ;;  %v1748_v27 = vshrl.u32 %v1743_v7, 16  ;;  %v1757_v14 = vadd.s32 %v1756_v21, %v1746_v34  ;;  %v6338_v32 = vand.u32 3, %v2275_v49 }
 0x25f   : > { %v1726_v12 = vshrl.u32 %v1721_v28, 16  ;;  %v1735_v48 = vadd.s32 %v1734_v52, %v1724_v9  ;;  %v6340_v47 = vsub.s32 32, %v1990_v24  ;;  %v1759_v41 = vmul.u32 %v6224_v15, %v1705_v54 }
 0x260   : > { %v2260_v55 = vmul.f32 -0.001358992, %v2259_v10  ;;  %v2267_v17 = vmul.f32 -0.00019511016, %v2259_v10  ;;  %v1758_v20 = vadd.s32 %v1757_v14, %v1748_v27  ;;  %v6345_v2 = vadd.s32 %v1751_v56, %v1747_v46 }
 0x261   : > { %v6343_v26 = vadd.s32 %v1735_v48, %v1726_v12  ;;  %v6347_v43 = vshrl.u32 %v1988_v5, 5  ;;  %v1994_v57 = vshrl.u32 %v4717_v33, %v6340_v47  ;;  %v1993_v13 = vshll.u32 %v4716_v31, %v1990_v24 }
 0x262   : > { %v2261_v49 = vadd.f32 0.041655596, %v2260_v55  ;;  %v2268_v7 = vadd.f32 0.008332121, %v2267_v17  ;;  %v1762_v25 = vadd.s32 1, %v1758_v20  ;;  %v1996_v28 = vshll.u32 %v4717_v33, %v1990_v24 }
 0x263   : > { %vm1761_vm14 = vc.u32 %v6343_v26, %v6345_v2  ;;  %v1997_v15 = vshrl.u32 %v4718_v35, %v6340_v47  ;;  %v2000_v4 = vshrl.u32 %v4719_v37, %v6340_v47  ;;  %v1999_v23 = vshll.u32 %v4718_v35, %v1990_v24 }
 0x264   : > { %v2262_v29 = vmul.f32 %v2261_v49, %v2259_v10  ;;  %v2269_v3 = vmul.f32 %v2268_v7, %v2259_v10  ;;  %v1763_v58 = vsel %vm1761_vm14, %v1762_v25, %v1758_v20  ;;  %v6360_v51 = vor.u32 %v1994_v57, %v1993_v13 }
 0x265   : > { %v1764_v18 = vadd.s32 %v1763_v58, %v1759_v41  ;;  %v2002_v46 = vshll.u32 %v4719_v37, %v1990_v24  ;;  %v2003_v16 = vshrl.u32 %v4720_v39, %v6340_v47  ;;  %v2005_v56 = vshll.u32 %v4720_v39, %v1990_v24 }
 0x266   : > { %v2263_v33 = vadd.f32 -0.4999988, %v2262_v29  ;;  %v2270_v61 = vadd.f32 -0.16666654, %v2269_v3  ;;  %v2006_v40 = vshrl.u32 %v4721_v45, %v6340_v47  ;;  %v6368_v5 = vor.u32 %v1997_v15, %v1996_v28 }
 0x267   : > { %v1765_v63 = vadd.s32 536870912, %v1764_v18  ;;  %v6370_v42 = vor.u32 %v2000_v4, %v1999_v23  ;;  %v2004_v35 = vor.u32 %v2003_v16, %v2002_v46  ;;  %vm2011_vm7 = vcmp.lt.s32.totalorder %v6347_v43, 4 }
 0x268   : > { %v2264_v59 = vmul.f32 %v2263_v33, %v2259_v10  ;;  %v2271_v1 = vmul.f32 %v2270_v61, %v2259_v10  ;;  %v2007_v54 = vor.u32 %v2006_v40, %v2005_v56  ;;  %vm2274_vm1 = vweird.f32 %v5949_v38 }
 0x269   : > { %vm4292_vm12 = vcmp.lt.s32.totalorder %v6336_v62, 2  ;;  %vm4293_vm15 = vcmp.eq.s32.totalorder %v6336_v62, 0  ;;  %v6376_v37 = vshrl.u32 %v1765_v63, 30  ;;  %v2017_v39 = vsel %vm2011_vm7, %v2004_v35, 920167782 }
 0x26a   : > { %v2265_v45 = vadd.f32 1.0, %v2264_v59  ;;  %v2272_v44 = vadd.f32 1.0, %v2271_v1  ;;  %vm2008_vm0 = vcmp.lt.s32.totalorder %v6347_v43, 1  ;;  %vm2010_vm13 = vcmp.lt.s32.totalorder %v6347_v43, 3 }
 0x26b   : > { %vm4296_vm2 = vcmp.eq.s32.totalorder %v6336_v62, 2  ;;  %v1767_v19 = vshll.u32 %v6376_v37, 30  ;;  %v2016_v6 = vsel %vm2008_vm0, %v6360_v51, %v6368_v5  ;;  %v2018_v53 = vsel %vm2010_vm13, %v6370_v42, %v2017_v39 }
 0x26c   : > { %v2273_v34 = vmul.f32 %v2272_v44, %v2257_v22  ;;  %vm2277_vm3 = vcmp.lt.s32.totalorder %v6338_v32, 2  ;;  %v2282_v21 = vxor.u32 2147483648, %v2265_v45  ;;  %v2021_v9 = vsel %vm2011_vm7, %v2007_v54, 1326507024 }
 0x26d   : > { %v1768_v52 = vsub.s32 %v1764_v18, %v1767_v19  ;;  %vm2009_vm4 = vcmp.lt.s32.totalorder %v6347_v43, 2  ;;  %v2020_v24 = vsel %vm2008_vm0, %v6368_v5, %v6370_v42  ;;  %v2022_v10 = vsel %vm2010_vm13, %v2004_v35, %v2021_v9 }
 0x26e   : > { %vm2278_vm5 = vcmp.eq.s32.totalorder %v6338_v32, 0  ;;  %v2279_v22 = vxor.u32 2147483648, %v2273_v34  ;;  %vm2281_vm6 = vcmp.eq.s32.totalorder %v6338_v32, 2  ;;  %v2019_v27 = vsel %vm2009_vm4, %v2016_v6, %v2018_v53 }
 0x26f   : > { %v2283_v14 = vsel %vm2281_vm6, %v2282_v21, %v2273_v34  ;;  %vm1769_vm8 = vcmp.lt.s32.totalorder %v1768_v52, 0  ;;  %v1770_v12 = vsub.s32 0, %v1768_v52  ;;  %v6407_v48 = vshll.u32 %v1984_v50, 8 }
 0x270   : > { %v2280_v55 = vsel %vm2278_vm5, %v2265_v45, %v2279_v22  ;;  %v4295_v17 = vsel %vm4293_vm15, %v2265_v45, %v2279_v22  ;;  %v4298_v20 = vsel %vm4296_vm2, %v2282_v21, %v2273_v34  ;;  %v2023_v41 = vsel %vm2009_vm4, %v2020_v24, %v2022_v10 }
 0x271   : > { %v2284_v57 = vsel %vm2277_vm3, %v2280_v55, %v2283_v14  ;;  %v4299_v49 = vsel %vm4292_vm12, %v4295_v17, %v4298_v20  ;;  %v1771_v11 = vsel %vm1769_vm8, %v1770_v12, %v1768_v52  ;;  %v2050_v7 = vshrl.u32 %v2019_v27, 16 }
 0x272   : > { %v2285_v50 = vsel %vm2274_vm1, nan, %v2284_v57  ;;  %v4300_v25 = vsel %vm2274_vm1, nan, %v4299_v49  ;;  %v1772_v13 = vclz %v1771_v11  ;;  %v2025_v28 = vand.u32 65535, %v6407_v48 }
 0x273   : > { %2298 = vst [vmem:[%s5118_s20 + $0xc0] sm:$0xff] %v2285_v50  ;;  %v2049_v15 = vand.u32 65535, %v2019_v27  ;;  %v2026_v32 = vshrl.u32 %v6407_v48, 16  ;;  %v2027_v29 = vand.u32 65535, %v2023_v41  ;;  %v2028_v62 = vshrl.u32 %v2023_v41, 16 }
 0x274   : > { %4313 = vst [vmem:[%s5118_s20 + $0xc8] sm:$0xff] %v4300_v25  ;;  %v4444_v4 = vadd.s32 4294967294, %v1772_v13  ;;  %v2052_v3 = vmul.u32 %v2050_v7, %v2025_v28  ;;  %v1760_v58 = vadd.s32 %v6345_v2, %v6343_v26  ;;  %v2013_v21 = vsel %vm2011_vm7, %v6370_v42, 2102212464 }
 0x275   : > { %v2030_v23 = vmul.u32 %v2028_v62, %v2025_v28  ;;  %v2031_v18 = vmul.u32 %v2027_v29, %v2026_v32  ;;  %v2051_v46 = vmul.u32 %v2049_v15, %v2025_v28  ;;  %v2053_v16 = vmul.u32 %v2049_v15, %v2026_v32 }
 0x276   : > { %vm4445_vm9 = vcmp.lt.s32.totalorder %v4444_v4, 0  ;;  %v2055_v33 = vshll.u32 %v2052_v3, 16  ;;  %v2029_v40 = vmul.u32 %v2027_v29, %v2025_v28  ;;  %v2032_v59 = vmul.u32 %v2028_v62, %v2026_v32 }
 0x277   : > { %v1775_v38 = vsel %vm4445_vm9, 0, %v4444_v4  ;;  %v2033_v63 = vshll.u32 %v2030_v23, 16  ;;  %v2035_v1 = vshll.u32 %v2031_v18, 16  ;;  %v2054_v54 = vmul.u32 %v2050_v7, %v2026_v32 }
 0x278   : > { %v1776_v61 = vsub.s32 32, %v1775_v38  ;;  %v1780_v56 = vsub.s32 4294967266, %v1775_v38  ;;  %v1777_v35 = vshll.u32 %v1768_v52, %v1775_v38  ;;  %v2057_v2 = vshll.u32 %v2053_v16, 16 }
 0x279   : > { %vm2037_vm10 = vc.u32 %v2029_v40, %v2033_v63  ;;  %v2039_v44 = vadd.s32 %v2033_v63, %v2029_v40  ;;  %vm2059_vm11 = vc.u32 %v2051_v46, %v2055_v33  ;;  %v2061_v19 = vadd.s32 %v2055_v33, %v2051_v46 }
 0x27a   : > { %v1778_v39 = vshrl.u32 %v1760_v58, %v1776_v61  ;;  %v1781_v45 = vadd.s32 127, %v1780_v56  ;;  %v2038_v26 = vsel %vm2037_vm10, 1, %v4722_v30  ;;  %v2060_v52 = vsel %vm2059_vm11, 1, %v4722_v30 }
 0x27b   : > { %v2040_v34 = vadd.s32 %v2038_v26, %v2032_v59  ;;  %vm2041_vm14 = vc.u32 %v2039_v44, %v2035_v1  ;;  %vm2063_vm1 = vc.u32 %v2061_v19, %v2057_v2  ;;  %v2034_v10 = vshrl.u32 %v2030_v23, 16 }
 0x27c   : > { %v1779_v6 = vor.u32 %v1778_v39, %v1777_v35  ;;  %v1782_v53 = vshll.u32 %v1781_v45, 23  ;;  %v2042_v9 = vsel %vm2041_vm14, 1, %v4722_v30  ;;  %v2062_v27 = vadd.s32 %v2060_v52, %v2054_v54 }
 0x27d   : > { %v2044_v22 = vadd.s32 %v2042_v9, %v2040_v34  ;;  %v1992_v14 = vshrl.u32 %v4716_v31, %v6340_v47  ;;  %v2036_v12 = vshrl.u32 %v2031_v18, 16  ;;  %v2056_v55 = vshrl.u32 %v2052_v3, 16 }
 0x27e   : > { %v1783_v24 = vor.u32 4788187, %v1782_v53  ;;  %v2064_v17 = vsel %vm2063_vm1, 1, %v4722_v30  ;;  %v1786_v41 = vcvt.s32.f32 %v1779_v6  ;;  %v2014_v11 = vsel %vm2010_vm13, %v6368_v5, %v2013_v21 }
 0x27f   : > { %v2045_v57 = vadd.s32 %v2044_v22, %v2034_v10  ;;  %v2066_v42 = vadd.s32 %v2064_v17, %v2062_v27  ;;  %v2012_v49 = vsel %vm2008_vm0, %v1992_v14, %v6360_v51  ;;  %v2058_v31 = vshrl.u32 %v2053_v16, 16 }
 0x280   : > { %v1784_v20 = vand.u32 2147483647, %v1783_v24  ;;  %v2065_v25 = vadd.s32 %v2061_v19, %v2057_v2  ;;  %v2015_v30 = vsel %vm2009_vm4, %v2012_v49, %v2014_v11  ;;  %vm1668_vm7 = vcmp.lt.s32.totalorder %v6192_v0, 0 }
 0x281   : > { %v6444_v50 = vadd.s32 %v2045_v57, %v2036_v12  ;;  %v2067_v47 = vadd.s32 %v2066_v42, %v2056_v55  ;;  %vm1667_vm15 = vcmp.le.f32.partialorder %v1666_v8, 0.7853982  ;;  %v1790_v5 = vsub.s32 4, %v6376_v37 }
 0x282   : > { %v1787_v7 = vmul.f32 %v1786_v41, %v1784_v20  ;;  %v2069_v32 = vmul.u32 %v6407_v48, %v2015_v30  ;;  %vm1809_vm9 = vweird.f32 %v6192_v0  ;;  %vm1978_vm10 = vcmp.lt.s32.totalorder %v6207_v36, 0 }
 0x283   : > { %v2068_v28 = vadd.s32 %v2067_v47, %v2058_v31  ;;  %vm2071_vm12 = vc.u32 %v6444_v50, %v2065_v25  ;;  %v1791_v3 = vsel %vm1668_vm7, %v1790_v5, %v6376_v37  ;;  %v2070_v55 = vadd.s32 %v2065_v25, %v6444_v50 }
 0x284   : > { %v1788_v13 = vxor.u32 2147483648, %v1787_v7  ;;  %v1793_v16 = vsel %vm1667_vm15, 0, %v1791_v3  ;;  %vm1977_vm11 = vcmp.le.f32.partialorder %v1976_v60, 0.7853982 }
 0x285   : > { %v2072_v15 = vadd.s32 1, %v2068_v28  ;;  %v1810_v48 = vadd.s32 3, %v1793_v16  ;;  %v3829_v54 = vand.u32 3, %v1793_v16 }
 0x286   : > { %v1789_v51 = vsel %vm1668_vm7, %v1788_v13, %v1787_v7 }
 0x287   : > { %v1792_v4 = vsel %vm1667_vm15, %v6192_v0, %v1789_v51  ;;  %v2073_v62 = vsel %vm2071_vm12, %v2072_v15, %v2068_v28  ;;  %v1811_v44 = vand.u32 3, %v1810_v48  ;;  %vm3830_vm13 = vcmp.lt.s32.totalorder %v3829_v54, 2 }
 0x288   : > { %v1794_v29 = vmul.f32 %v1792_v4, %v1792_v4  ;;  %v2074_v43 = vadd.s32 %v2073_v62, %v2069_v32  ;;  %vm3831_vm5 = vcmp.eq.s32.totalorder %v3829_v54, 0  ;;  %vm3834_vm6 = vcmp.eq.s32.totalorder %v3829_v54, 2 }
 0x289   : > { %vm1812_vm2 = vcmp.lt.s32.totalorder %v1811_v44, 2  ;;  %vm1816_vm3 = vcmp.eq.s32.totalorder %v1811_v44, 2  ;;  %vm1813_vm4 = vcmp.eq.s32.totalorder %v1811_v44, 0 }
 0x28a   : > { %v1795_v58 = vmul.f32 -0.001358992, %v1794_v29  ;;  %v1802_v23 = vmul.f32 -0.00019511016, %v1794_v29  ;;  %v2075_v18 = vadd.s32 536870912, %v2074_v43 }
 0x28c   : > { %v1796_v38 = vadd.f32 0.041655596, %v1795_v58  ;;  %v1803_v46 = vadd.f32 0.008332121, %v1802_v23  ;;  %v6456_v8 = vshrl.u32 %v2075_v18, 30 }
 0x28e   : > { %v1797_v33 = vmul.f32 %v1796_v38, %v1794_v29  ;;  %v1804_v61 = vmul.f32 %v1803_v46, %v1794_v29  ;;  %v2077_v56 = vshll.u32 %v6456_v8, 30  ;;  %v2100_v25 = vsub.s32 4, %v6456_v8 }
 0x290   : > { %v1798_v40 = vadd.f32 -0.4999988, %v1797_v33  ;;  %v1805_v63 = vadd.f32 -0.16666654, %v1804_v61  ;;  %v2078_v35 = vsub.s32 %v2074_v43, %v2077_v56  ;;  %v2101_v15 = vsel %vm1978_vm10, %v2100_v25, %v6456_v8 }
 0x292   : > { %v1799_v59 = vmul.f32 %v1798_v40, %v1794_v29  ;;  %v1806_v1 = vmul.f32 %v1805_v63, %v1794_v29  ;;  %vm2079_vm0 = vcmp.lt.s32.totalorder %v2078_v35, 0  ;;  %v2080_v37 = vsub.s32 0, %v2078_v35 }
 0x293   : > { %v2103_v29 = vsel %vm1977_vm11, 0, %v2101_v15 }
 0x294   : > { %v1800_v39 = vadd.f32 1.0, %v1799_v59  ;;  %v1807_v45 = vadd.f32 1.0, %v1806_v1  ;;  %v2081_v26 = vsel %vm2079_vm0, %v2080_v37, %v2078_v35  ;;  %v2120_v60 = vadd.s32 3, %v2103_v29 }
 0x295   : > { %v2082_v6 = vclz %v2081_v26  ;;  %v4137_v16 = vand.u32 3, %v2103_v29 }
 0x296   : > { %v1808_v2 = vmul.f32 %v1807_v45, %v1792_v4  ;;  %v1817_v19 = vxor.u32 2147483648, %v1800_v39  ;;  %v2121_v33 = vand.u32 3, %v2120_v60 }
 0x297   : > { %v4450_v34 = vadd.s32 4294967294, %v2082_v6  ;;  %vm4138_vm14 = vcmp.lt.s32.totalorder %v4137_v16, 2  ;;  %vm4139_vm1 = vcmp.eq.s32.totalorder %v4137_v16, 0  ;;  %vm4142_vm0 = vcmp.eq.s32.totalorder %v4137_v16, 2 }
 0x298   : > { %v1814_v53 = vxor.u32 2147483648, %v1808_v2  ;;  %v1818_v21 = vsel %vm1816_vm3, %v1817_v19, %v1808_v2  ;;  %v3836_v24 = vsel %vm3834_vm6, %v1817_v19, %v1808_v2  ;;  %vm2122_vm7 = vcmp.lt.s32.totalorder %v2121_v33, 2 }
 0x299   : > { %vm4451_vm8 = vcmp.lt.s32.totalorder %v4450_v34, 0  ;;  %vm2123_vm12 = vcmp.eq.s32.totalorder %v2121_v33, 0  ;;  %vm2126_vm15 = vcmp.eq.s32.totalorder %v2121_v33, 2 }
 0x29a   : > { %v1815_v9 = vsel %vm1813_vm4, %v1800_v39, %v1814_v53  ;;  %v3833_v52 = vsel %vm3831_vm5, %v1800_v39, %v1814_v53  ;;  %v2085_v27 = vsel %vm4451_vm8, 0, %v4450_v34 }
 0x29b   : > { %v1819_v10 = vsel %vm1812_vm2, %v1815_v9, %v1818_v21  ;;  %v3837_v22 = vsel %vm3830_vm13, %v3833_v52, %v3836_v24  ;;  %v2086_v17 = vsub.s32 32, %v2085_v27  ;;  %v2090_v20 = vsub.s32 4294967266, %v2085_v27 }
 0x29c   : > { %v1820_v14 = vsel %vm1809_vm9, nan, %v1819_v10  ;;  %v3838_v12 = vsel %vm1809_vm9, nan, %v3837_v22  ;;  %v2087_v57 = vshll.u32 %v2078_v35, %v2085_v27  ;;  %vm2119_vm13 = vweird.f32 %v6207_v36 }
 0x29d   : > { %2295 = vst [vmem:[%s5118_s20 + $0x90] sm:$0xff] %v1820_v14  ;;  %v2088_v41 = vshrl.u32 %v2070_v55, %v2086_v17  ;;  %v2091_v42 = vadd.s32 127, %v2090_v20 }
 0x29e   : > { %4310 = vst [vmem:[%s5118_s20 + $0x98] sm:$0xff] %v3838_v12 }
 0x29f   : > { %v2089_v49 = vor.u32 %v2088_v41, %v2087_v57  ;;  %v2092_v11 = vshll.u32 %v2091_v42, 23 }
 0x2a1   : > { %v2093_v7 = vor.u32 4788187, %v2092_v11  ;;  %v2096_v47 = vcvt.s32.f32 %v2089_v49 }
 0x2a3   : > { %v2094_v31 = vand.u32 2147483647, %v2093_v7 }
 0x2a5   : > { %v2097_v0 = vmul.f32 %v2096_v47, %v2094_v31 }
 0x2a7   : > { %v2098_v13 = vxor.u32 2147483648, %v2097_v0 }
 0x2a9   : > { %v2099_v50 = vsel %vm1978_vm10, %v2098_v13, %v2097_v0 }
 0x2aa   : > { %v2102_v30 = vsel %vm1977_vm11, %v6207_v36, %v2099_v50 }
 0x2ab   : > { %v2104_v28 = vmul.f32 %v2102_v30, %v2102_v30 }
 0x2ad   : > { %v2105_v51 = vmul.f32 -0.001358992, %v2104_v28  ;;  %v2112_v5 = vmul.f32 -0.00019511016, %v2104_v28 }
 0x2af   : > { %v2106_v4 = vadd.f32 0.041655596, %v2105_v51  ;;  %v2113_v32 = vadd.f32 0.008332121, %v2112_v5 }
 0x2b1   : > { %v2107_v62 = vmul.f32 %v2106_v4, %v2104_v28  ;;  %v2114_v43 = vmul.f32 %v2113_v32, %v2104_v28 }
 0x2b3   : > { %v2108_v3 = vadd.f32 -0.4999988, %v2107_v62  ;;  %v2115_v58 = vadd.f32 -0.16666654, %v2114_v43 }
 0x2b5   : > { %v2109_v23 = vmul.f32 %v2108_v3, %v2104_v28  ;;  %v2116_v18 = vmul.f32 %v2115_v58, %v2104_v28 }
 0x2b7   : > { %v2110_v38 = vadd.f32 1.0, %v2109_v23  ;;  %v2117_v46 = vadd.f32 1.0, %v2116_v18 }
 0x2b9   : > { %v2118_v61 = vmul.f32 %v2117_v46, %v2102_v30  ;;  %v2127_v56 = vxor.u32 2147483648, %v2110_v38 }
 0x2bb   : > { %v2124_v8 = vxor.u32 2147483648, %v2118_v61  ;;  %v2128_v63 = vsel %vm2126_vm15, %v2127_v56, %v2118_v61  ;;  %v4144_v35 = vsel %vm4142_vm0, %v2127_v56, %v2118_v61 }
 0x2bd   : > { %v2125_v40 = vsel %vm2123_vm12, %v2110_v38, %v2124_v8  ;;  %v4141_v48 = vsel %vm4139_vm1, %v2110_v38, %v2124_v8 }
 0x2be   : > { %v2129_v59 = vsel %vm2122_vm7, %v2125_v40, %v2128_v63  ;;  %v4145_v1 = vsel %vm4138_vm14, %v4141_v48, %v4144_v35 }
 0x2bf   : > { %v2130_v54 = vsel %vm2119_vm13, nan, %v2129_v59  ;;  %v4146_v37 = vsel %vm2119_vm13, nan, %v4145_v1 }
 0x2c0   : > { %2297 = vst [vmem:[%s5118_s20 + $0xb0] sm:$0xff] %v2130_v54 }
 0x2c1   : > { %4312 = vst [vmem:[%s5118_s20 + $0xb8] sm:$0xff] %v4146_v37 }
 0x2c2   : > { %4670 = shalt.err (!%p4667_p11)
}
 0x2c3   : > { %s4723_s24 = smov 256   ;;  %s4724_s25 = smov 16  }
 0x2c4   : > { %4508 = dma.vmem_to_hbm [thread:$0]  (%p4807_p7), %s4329_s6, 3328, %s4331_s13, %s4315_s7, %s4723_s24, %s4723_s24, %s4724_s25  }
 0x2c5 PF: > { %s4345_s28 = sand.u32 1, %s4701_s9   ;;  %p6526_p12 = scmp.ge.s32.totalorder %s4713_s12, 2 }
 0x2c6   : > { %s4346_s29 = scalar_lea.sflag [#allocation4], %s4345_s28 }
 0x2c7   : > { %p4519_p13 = pnand %p6526_p12, %p4775_p6 }
 0x2c9   : > { %p4520_p0 = pneg %p4519_p13 }
 0x2cb   : > { %4696 = dma.done.wait (%p4520_p0), %s4346_s29, 3328  }
 0x2cc   : > { %4698 = vsyncadd (%p4520_p0), %s4346_s29, 4294963968  ;;  %p16_p3 = scmp.ge.s32.totalorder %s4793_s23, 4   ;;  %s6527_s9 = smov %s4705_s10 }
 0x2cd   : > { %s6528_s10 = smov %s4709_s11  ;;  %s6529_s11 = smov %s4803_s26 }
 0x2ce   : > { %s6530_s12 = smov %s4793_s23  ;;  %18 = sbr.rel (!%p16_p3) target bundleno = 6 (0x6), region = 77 }
 0x2d3   :  { %4352 = vsyncpa [#allocation3], 1 }
 0x2d4   :  { %4354 = vsyncpa [#allocation3 + $0x1], 1 }
 0x2d5   :  { %4355 = vsyncpa [#allocation6], 1 }
 0x2d6   :  { %4356 = vsyncpa [#allocation4], 1 }
 0x2d7   :  { %4358 = vsyncpa [#allocation4 + $0x1], 1 }

</bundles_post_ra>
